<compile_context>
chip_gen: v6e
topology: v6e:2x2x1
jax: 0.10.0
libtpu: 0.0.40
codegen_flags: <defaults>
</compile_context>

<pallas_src>
import functools

import jax
import jax.numpy as jnp
from jax.experimental import pallas as pl
from jax.experimental.pallas import tpu as pltpu

F32 = jnp.float32
BF16 = jnp.bfloat16
NEG_SLOPE = 0.01


# ------------------------------ fused kernel ------------------------------

def _fused_attentive_fp_kernel(*refs, num_layers, num_timesteps):
    it = iter(refs[:-1])
    out_ref = refs[-1]
    rd = lambda: next(it)[...]

    # Graph-structure operands (bf16 on the wire, f32 in-kernel).
    x0 = rd()                       # [N, Fin]
    ea = rd()                       # [E, Fe]
    m_src = rd().astype(F32)        # [E, N]  edge -> source node one-hot
    m_dst = rd().astype(F32)        # [E, N]  edge -> destination node one-hot
    s_dst = rd().astype(F32)        # [N, E]  = m_dst.T (scatter-add)
    m_pool = rd().astype(F32)       # [N, G]  node -> graph one-hot
    s_pool = rd().astype(F32)       # [G, N]  = m_pool.T (pool / scatter-add)

    def dot(a, b):
        return jnp.dot(a, b, preferred_element_type=F32)

    def leaky_relu(a):
        return jnp.where(a > 0, a, NEG_SLOPE * a)

    def seg_softmax(alpha, mdst, sdst):
        # softmax of per-edge scores grouped by destination; stabilized with
        # the global max (equivalent to per-segment max up to exp underflow).
        ex = jnp.exp(alpha - jnp.max(alpha))
        den = dot(mdst, dot(sdst, ex)) + 1e-16
        return ex * pl.reciprocal(den, approx=True)

    def gru(h_in, x_hid, wi, wh, bi, bh, lnw, lnb, use_norm):
        # PyTorch GRUCell(input=h_in, hidden=x_hid) with fused (r|z|n) weights.
        H = x_hid.shape[1]
        gi = dot(h_in, wi) + bi            # [*, 3H]
        gh = dot(x_hid, wh) + bh           # [*, 3H]
        r = jax.nn.sigmoid(gi[:, 0:H] + gh[:, 0:H])
        z = jax.nn.sigmoid(gi[:, H:2 * H] + gh[:, H:2 * H])
        n = jnp.tanh(gi[:, 2 * H:3 * H] + r * gh[:, 2 * H:3 * H])
        new = (1.0 - z) * n + z * x_hid
        if use_norm:                       # LayerNorm(eps=1e-5), as in spec
            mu = jnp.mean(new, axis=-1, keepdims=True)
            var = jnp.mean((new - mu) ** 2, axis=-1, keepdims=True)
            new = (new - mu) * jax.lax.rsqrt(var + 1e-5) * lnw + lnb
        return jnp.tanh(new)

    # ---- atom embedding: lin1 + tanh ----
    w, b = rd(), rd()
    x = jnp.tanh(dot(x0, w) + b)                               # [N, H]

    # ---- GATEConv (+tanh) -> GRU -> LayerNorm -> tanh ----
    w1x, w1e, w2, att_l, att_r, gbias = rd(), rd(), rd(), rd(), rd(), rd()
    x_j = dot(m_src, x)                                        # [E, H]
    x_i = dot(m_dst, x)                                        # [E, H]
    t = jnp.tanh(dot(x_j, w1x) + dot(ea, w1e))                 # lin1(cat) split
    alpha = (jnp.sum(t * att_l, axis=-1, keepdims=True)
             + jnp.sum(x_i * att_r, axis=-1, keepdims=True))   # [E, 1]
    attn = seg_softmax(alpha, m_dst, s_dst)
    h = jnp.tanh(dot(s_dst, dot(t, w2) * attn) + gbias)        # [N, H]

    wi, wh, bi, bh, lnw, lnb = rd(), rd(), rd(), rd(), rd(), rd()
    x = gru(h, x, wi, wh, bi, bh, lnw, lnb, True)

    # ---- remaining atom layers: GATConv (+tanh) -> GRU -> LayerNorm -> tanh ----
    for _ in range(1, num_layers):
        gw, asrc, adst, gb = rd(), rd(), rd(), rd()
        xt = dot(x, gw)                                        # shared lin
        x_j = dot(m_src, xt)
        x_i = dot(m_dst, xt)
        alpha = leaky_relu(jnp.sum(x_j * asrc, axis=-1, keepdims=True)
                           + jnp.sum(x_i * adst, axis=-1, keepdims=True))
        attn = seg_softmax(alpha, m_dst, s_dst)
        h = jnp.tanh(dot(s_dst, x_j * attn) + gb)              # [N, H]
        wi, wh, bi, bh, lnw, lnb = rd(), rd(), rd(), rd(), rd(), rd()
        x = gru(h, x, wi, wh, bi, bh, lnw, lnb, True)

    # ---- molecule embedding: global_add_pool + tanh ----
    out = jnp.tanh(dot(s_pool, x))                             # [G, H]

    mw, masrc, madst, mb = rd(), rd(), rd(), rd()
    gwi, gwh, gbi, gbh = rd(), rd(), rd(), rd()
    # Source side of mol GATConv: edge src index == arange(N) (identity
    # gather) and x is constant over timesteps -> hoist.
    xt_nodes = dot(x, mw)                                      # x_j == lin(x)
    a_src = jnp.sum(xt_nodes * masrc, axis=-1, keepdims=True)  # [N, 1]
    for _ in range(num_timesteps):
        outt = dot(out, mw)                                    # [G, H]
        a_dst = dot(m_pool, jnp.sum(outt * madst, axis=-1, keepdims=True))
        alpha = leaky_relu(a_src + a_dst)                      # [N, 1]
        attn = seg_softmax(alpha, m_pool, s_pool)
        h = jnp.tanh(dot(s_pool, xt_nodes * attn) + mb)        # [G, H]
        out = gru(h, out, gwi, gwh, gbi, gbh, None, None, False)

    # ---- lin2 ----
    lw, lb = rd(), rd()
    out_ref[...] = dot(out, lw) + lb


# ------------------------------ full forward ------------------------------

def attentive_fp_forward(params, x, edge_index, edge_attr, batch, num_graphs,
                         num_layers, num_timesteps):
    n = x.shape[0]
    src, dst = edge_index[0], edge_index[1]
    m_src = jax.nn.one_hot(src, n, dtype=BF16)                 # [E, N]
    m_dst = jax.nn.one_hot(dst, n, dtype=BF16)                 # [E, N]
    s_dst = m_dst.T                                            # [N, E]
    m_pool = jax.nn.one_hot(batch, num_graphs, dtype=BF16)     # [N, G]
    s_pool = m_pool.T                                          # [G, N]

    args = [x.astype(F32), edge_attr.astype(F32),
            m_src, m_dst, s_dst, m_pool, s_pool,
            params['lin1_w'], params['lin1_b']]
    g = params['gate']
    args += [g['w1x'], g['w1e'], g['w2'], g['att_l'], g['att_r'], g['bias']]
    gr, nm = params['grus'][0], params['norms'][0]
    args += [gr['wi'], gr['wh'], gr['bi'], gr['bh'], nm['w'], nm['b']]
    for layer in range(1, num_layers):
        ga = params['gats'][layer - 1]
        args += [ga['w'], ga['att_src'], ga['att_dst'], ga['bias']]
        gr, nm = params['grus'][layer], params['norms'][layer]
        args += [gr['wi'], gr['wh'], gr['bi'], gr['bh'], nm['w'], nm['b']]
    mc, mg = params['mol_conv'], params['mol_gru']
    args += [mc['w'], mc['att_src'], mc['att_dst'], mc['bias'],
             mg['wi'], mg['wh'], mg['bi'], mg['bh'],
             params['lin2_w'], params['lin2_b']]

    out_ch = params['lin2_w'].shape[1]
    vm = pl.BlockSpec(memory_space=pltpu.MemorySpace.VMEM)
    kernel = functools.partial(_fused_attentive_fp_kernel,
                               num_layers=num_layers,
                               num_timesteps=num_timesteps)
    return pl.pallas_call(
        kernel,
        out_shape=jax.ShapeDtypeStruct((num_graphs, out_ch), F32),
        in_specs=[vm] * len(args),
        out_specs=vm,
    )(*args)


# --------------------------- parameter creation ---------------------------

def init_params(key, in_channels, hidden, out_channels, edge_dim, num_layers):
    keys = iter(jax.random.split(key, 256))
    nk = lambda: next(keys)
    H = hidden

    def glorot(shape):
        lim = (6.0 / (shape[0] + shape[1])) ** 0.5
        return jax.random.uniform(nk(), shape, F32, -lim, lim)

    def gat_p():
        return dict(w=glorot((H, H)),
                    att_src=glorot((1, H)),
                    att_dst=glorot((1, H)),
                    bias=jnp.zeros((1, H), F32))

    def gru_p():
        s = 1.0 / (H ** 0.5)
        u = lambda shp: jax.random.uniform(nk(), shp, F32, -s, s)
        # fused (r|z|n) weights/biases: two matmuls instead of six per GRU.
        return dict(wi=u((H, 3 * H)), wh=u((H, 3 * H)),
                    bi=u((1, 3 * H)), bh=u((1, 3 * H)))

    def ln_p():
        return dict(w=jnp.ones((1, H), F32), b=jnp.zeros((1, H), F32))

    p = {}
    p['lin1_w'] = glorot((in_channels, H))          # pre-transposed [in, out]
    p['lin1_b'] = jnp.zeros((1, H), F32)
    p['gate'] = dict(w1x=glorot((H, H)),            # lin1 weight, x part
                     w1e=glorot((edge_dim, H)),     # lin1 weight, edge part
                     w2=glorot((H, H)),
                     att_l=glorot((1, H)),
                     att_r=glorot((1, H)),
                     bias=jnp.zeros((1, H), F32))
    p['gats'] = [gat_p() for _ in range(num_layers - 1)]
    p['grus'] = [gru_p() for _ in range(num_layers)]
    p['norms'] = [ln_p() for _ in range(num_layers)]
    p['mol_conv'] = gat_p()
    p['mol_gru'] = gru_p()
    p['lin2_w'] = glorot((H, out_channels))
    p['lin2_b'] = jnp.zeros((1, out_channels), F32)
    return p


if __name__ == "__main__":
    key = jax.random.PRNGKey(0)
    k_x, k_e, k_s1, k_d1, k_s2, k_d2, k_p = jax.random.split(key, 7)

    in_channels, hidden, out_channels, edge_dim = 8, 32, 4, 6
    num_layers, num_timesteps = 2, 2
    N, E_half, G = 16, 16, 2

    x = jax.random.normal(k_x, (N, in_channels), F32)
    edge_attr = jax.random.normal(k_e, (2 * E_half, edge_dim), F32)
    # two graphs: nodes 0..7 belong to graph 0, nodes 8..15 to graph 1
    src0 = jax.random.randint(k_s1, (E_half,), 0, N // 2)
    dst0 = jax.random.randint(k_d1, (E_half,), 0, N // 2)
    src1 = jax.random.randint(k_s2, (E_half,), N // 2, N)
    dst1 = jax.random.randint(k_d2, (E_half,), N // 2, N)
    edge_index = jnp.stack([jnp.concatenate([src0, src1]),
                            jnp.concatenate([dst0, dst1])], axis=0).astype(jnp.int32)
    batch = jnp.concatenate([jnp.zeros((N // 2,), jnp.int32),
                             jnp.ones((N // 2,), jnp.int32)])

    params = init_params(k_p, in_channels, hidden, out_channels, edge_dim,
                         num_layers)

    fwd = jax.jit(attentive_fp_forward, static_argnums=(5, 6, 7))
    out = fwd(params, x, edge_index, edge_attr, batch, G,
              num_layers, num_timesteps)
    out = jax.block_until_ready(out)
    assert out.shape == (G, out_channels)
    assert bool(jnp.all(jnp.isfinite(out)))
    print("KERNEL_OK")
</pallas_src>

<mosaic_0001>
module attributes {stable_mosaic.version = 11 : i64} {
  func.func @_fused_attentive_fp_kernel(%arg0: memref<16x8xf32, #tpu.memory_space<vmem>>, %arg1: memref<32x6xf32, #tpu.memory_space<vmem>>, %arg2: memref<32x16xbf16, #tpu.memory_space<vmem>>, %arg3: memref<32x16xbf16, #tpu.memory_space<vmem>>, %arg4: memref<16x32xbf16, #tpu.memory_space<vmem>>, %arg5: memref<16x2xbf16, #tpu.memory_space<vmem>>, %arg6: memref<2x16xbf16, #tpu.memory_space<vmem>>, %arg7: memref<8x32xf32, #tpu.memory_space<vmem>>, %arg8: memref<1x32xf32, #tpu.memory_space<vmem>>, %arg9: memref<32x32xf32, #tpu.memory_space<vmem>>, %arg10: memref<6x32xf32, #tpu.memory_space<vmem>>, %arg11: memref<32x32xf32, #tpu.memory_space<vmem>>, %arg12: memref<1x32xf32, #tpu.memory_space<vmem>>, %arg13: memref<1x32xf32, #tpu.memory_space<vmem>>, %arg14: memref<1x32xf32, #tpu.memory_space<vmem>>, %arg15: memref<32x96xf32, #tpu.memory_space<vmem>>, %arg16: memref<32x96xf32, #tpu.memory_space<vmem>>, %arg17: memref<1x96xf32, #tpu.memory_space<vmem>>, %arg18: memref<1x96xf32, #tpu.memory_space<vmem>>, %arg19: memref<1x32xf32, #tpu.memory_space<vmem>>, %arg20: memref<1x32xf32, #tpu.memory_space<vmem>>, %arg21: memref<32x32xf32, #tpu.memory_space<vmem>>, %arg22: memref<1x32xf32, #tpu.memory_space<vmem>>, %arg23: memref<1x32xf32, #tpu.memory_space<vmem>>, %arg24: memref<1x32xf32, #tpu.memory_space<vmem>>, %arg25: memref<32x96xf32, #tpu.memory_space<vmem>>, %arg26: memref<32x96xf32, #tpu.memory_space<vmem>>, %arg27: memref<1x96xf32, #tpu.memory_space<vmem>>, %arg28: memref<1x96xf32, #tpu.memory_space<vmem>>, %arg29: memref<1x32xf32, #tpu.memory_space<vmem>>, %arg30: memref<1x32xf32, #tpu.memory_space<vmem>>, %arg31: memref<32x32xf32, #tpu.memory_space<vmem>>, %arg32: memref<1x32xf32, #tpu.memory_space<vmem>>, %arg33: memref<1x32xf32, #tpu.memory_space<vmem>>, %arg34: memref<1x32xf32, #tpu.memory_space<vmem>>, %arg35: memref<32x96xf32, #tpu.memory_space<vmem>>, %arg36: memref<32x96xf32, #tpu.memory_space<vmem>>, %arg37: memref<1x96xf32, #tpu.memory_space<vmem>>, %arg38: memref<1x96xf32, #tpu.memory_space<vmem>>, %arg39: memref<32x4xf32, #tpu.memory_space<vmem>>, %arg40: memref<1x4xf32, #tpu.memory_space<vmem>>, %arg41: memref<2x4xf32, #tpu.memory_space<vmem>>) attributes {dimension_semantics = [], scalar_prefetch = 0 : i64, scratch_operands = 0 : i64, tpu.core_type = #tpu.core_type<tc>} {
    %c0 = arith.constant 0 : index
    %c0_0 = arith.constant 0 : index
    %0 = vector.load %arg0[%c0, %c0_0] : memref<16x8xf32, #tpu.memory_space<vmem>>, vector<16x8xf32>
    %c0_1 = arith.constant 0 : index
    %c0_2 = arith.constant 0 : index
    %1 = vector.load %arg1[%c0_1, %c0_2] : memref<32x6xf32, #tpu.memory_space<vmem>>, vector<32x6xf32>
    %c0_3 = arith.constant 0 : index
    %c0_4 = arith.constant 0 : index
    %2 = vector.load %arg2[%c0_3, %c0_4] : memref<32x16xbf16, #tpu.memory_space<vmem>>, vector<32x16xbf16>
    %3 = arith.extf %2 : vector<32x16xbf16> to vector<32x16xf32>
    %c0_5 = arith.constant 0 : index
    %c0_6 = arith.constant 0 : index
    %4 = vector.load %arg3[%c0_5, %c0_6] : memref<32x16xbf16, #tpu.memory_space<vmem>>, vector<32x16xbf16>
    %5 = arith.extf %4 : vector<32x16xbf16> to vector<32x16xf32>
    %c0_7 = arith.constant 0 : index
    %c0_8 = arith.constant 0 : index
    %6 = vector.load %arg4[%c0_7, %c0_8] : memref<16x32xbf16, #tpu.memory_space<vmem>>, vector<16x32xbf16>
    %7 = arith.extf %6 : vector<16x32xbf16> to vector<16x32xf32>
    %c0_9 = arith.constant 0 : index
    %c0_10 = arith.constant 0 : index
    %8 = vector.load %arg5[%c0_9, %c0_10] : memref<16x2xbf16, #tpu.memory_space<vmem>>, vector<16x2xbf16>
    %9 = arith.extf %8 : vector<16x2xbf16> to vector<16x2xf32>
    %c0_11 = arith.constant 0 : index
    %c0_12 = arith.constant 0 : index
    %10 = vector.load %arg6[%c0_11, %c0_12] : memref<2x16xbf16, #tpu.memory_space<vmem>>, vector<2x16xbf16>
    %11 = arith.extf %10 : vector<2x16xbf16> to vector<2x16xf32>
    %c0_13 = arith.constant 0 : index
    %c0_14 = arith.constant 0 : index
    %12 = vector.load %arg7[%c0_13, %c0_14] : memref<8x32xf32, #tpu.memory_space<vmem>>, vector<8x32xf32>
    %c0_15 = arith.constant 0 : index
    %c0_16 = arith.constant 0 : index
    %13 = vector.load %arg8[%c0_15, %c0_16] : memref<1x32xf32, #tpu.memory_space<vmem>>, vector<1x32xf32>
    %cst = arith.constant dense<0.000000e+00> : vector<16x32xf32>
    %14 = tpu.matmul %0, %12, %cst {dimension_numbers = #tpu.dot_dimension_numbers<[1], [0], [0], [1], [0, 0, 1, 1], [], []>} : vector<16x8xf32>, vector<8x32xf32>, vector<16x32xf32> -> vector<16x32xf32>
    %15 = vector.broadcast %13 : vector<1x32xf32> to vector<16x32xf32>
    %16 = arith.addf %14, %15 : vector<16x32xf32>
    %17 = math.tanh %16 : vector<16x32xf32>
    %c0_17 = arith.constant 0 : index
    %c0_18 = arith.constant 0 : index
    %18 = vector.load %arg9[%c0_17, %c0_18] : memref<32x32xf32, #tpu.memory_space<vmem>>, vector<32x32xf32>
    %c0_19 = arith.constant 0 : index
    %c0_20 = arith.constant 0 : index
    %19 = vector.load %arg10[%c0_19, %c0_20] : memref<6x32xf32, #tpu.memory_space<vmem>>, vector<6x32xf32>
    %c0_21 = arith.constant 0 : index
    %c0_22 = arith.constant 0 : index
    %20 = vector.load %arg11[%c0_21, %c0_22] : memref<32x32xf32, #tpu.memory_space<vmem>>, vector<32x32xf32>
    %c0_23 = arith.constant 0 : index
    %c0_24 = arith.constant 0 : index
    %21 = vector.load %arg12[%c0_23, %c0_24] : memref<1x32xf32, #tpu.memory_space<vmem>>, vector<1x32xf32>
    %c0_25 = arith.constant 0 : index
    %c0_26 = arith.constant 0 : index
    %22 = vector.load %arg13[%c0_25, %c0_26] : memref<1x32xf32, #tpu.memory_space<vmem>>, vector<1x32xf32>
    %c0_27 = arith.constant 0 : index
    %c0_28 = arith.constant 0 : index
    %23 = vector.load %arg14[%c0_27, %c0_28] : memref<1x32xf32, #tpu.memory_space<vmem>>, vector<1x32xf32>
    %cst_29 = arith.constant dense<0.000000e+00> : vector<32x32xf32>
    %24 = tpu.matmul %3, %17, %cst_29 {dimension_numbers = #tpu.dot_dimension_numbers<[1], [0], [0], [1], [0, 0, 1, 1], [], []>} : vector<32x16xf32>, vector<16x32xf32>, vector<32x32xf32> -> vector<32x32xf32>
    %cst_30 = arith.constant dense<0.000000e+00> : vector<32x32xf32>
    %25 = tpu.matmul %5, %17, %cst_30 {dimension_numbers = #tpu.dot_dimension_numbers<[1], [0], [0], [1], [0, 0, 1, 1], [], []>} : vector<32x16xf32>, vector<16x32xf32>, vector<32x32xf32> -> vector<32x32xf32>
    %cst_31 = arith.constant dense<0.000000e+00> : vector<32x32xf32>
    %26 = tpu.matmul %24, %18, %cst_31 {dimension_numbers = #tpu.dot_dimension_numbers<[1], [0], [0], [1], [0, 0, 1, 1], [], []>} : vector<32x32xf32>, vector<32x32xf32>, vector<32x32xf32> -> vector<32x32xf32>
    %cst_32 = arith.constant dense<0.000000e+00> : vector<32x32xf32>
    %27 = tpu.matmul %1, %19, %cst_32 {dimension_numbers = #tpu.dot_dimension_numbers<[1], [0], [0], [1], [0, 0, 1, 1], [], []>} : vector<32x6xf32>, vector<6x32xf32>, vector<32x32xf32> -> vector<32x32xf32>
    %28 = arith.addf %26, %27 : vector<32x32xf32>
    %29 = math.tanh %28 : vector<32x32xf32>
    %30 = vector.broadcast %21 : vector<1x32xf32> to vector<32x32xf32>
    %31 = arith.mulf %29, %30 : vector<32x32xf32>
    %cst_33 = arith.constant dense<0.000000e+00> : vector<32xf32>
    %32 = vector.multi_reduction <add>, %31, %cst_33 [1] : vector<32x32xf32> to vector<32xf32>
    %33 = vector.shape_cast %32 : vector<32xf32> to vector<32x1xf32>
    %34 = vector.broadcast %22 : vector<1x32xf32> to vector<32x32xf32>
    %35 = arith.mulf %25, %34 : vector<32x32xf32>
    %cst_34 = arith.constant dense<0.000000e+00> : vector<32xf32>
    %36 = vector.multi_reduction <add>, %35, %cst_34 [1] : vector<32x32xf32> to vector<32xf32>
    %37 = vector.shape_cast %36 : vector<32xf32> to vector<32x1xf32>
    %38 = arith.addf %33, %37 : vector<32x1xf32>
    %39 = vector.shape_cast %38 : vector<32x1xf32> to vector<1x32x1xf32>
    %cst_35 = arith.constant dense<0xFF800000> : vector<1xf32>
    %40 = vector.multi_reduction <maximumf>, %39, %cst_35 [1, 2] : vector<1x32x1xf32> to vector<1xf32>
    %41 = vector.shape_cast %40 : vector<1xf32> to vector<1x1x1xf32>
    %42 = vector.extract %41[0, 0, 0] : f32 from vector<1x1x1xf32>
    %43 = vector.broadcast %42 : f32 to vector<32x1xf32>
    %44 = arith.subf %38, %43 : vector<32x1xf32>
    %45 = math.exp %44 : vector<32x1xf32>
    %cst_36 = arith.constant dense<0.000000e+00> : vector<16x1xf32>
    %46 = tpu.matmul %7, %45, %cst_36 {dimension_numbers = #tpu.dot_dimension_numbers<[1], [0], [0], [1], [0, 0, 1, 1], [], []>} : vector<16x32xf32>, vector<32x1xf32>, vector<16x1xf32> -> vector<16x1xf32>
    %cst_37 = arith.constant dense<0.000000e+00> : vector<32x1xf32>
    %47 = tpu.matmul %5, %46, %cst_37 {dimension_numbers = #tpu.dot_dimension_numbers<[1], [0], [0], [1], [0, 0, 1, 1], [], []>} : vector<32x16xf32>, vector<16x1xf32>, vector<32x1xf32> -> vector<32x1xf32>
    %cst_38 = arith.constant 1.000000e-16 : f32
    %48 = vector.broadcast %cst_38 : f32 to vector<32x1xf32>
    %49 = arith.addf %47, %48 : vector<32x1xf32>
    %50 = tpu.reciprocal %49 {approx = true} : vector<32x1xf32> -> vector<32x1xf32>
    %51 = arith.mulf %45, %50 : vector<32x1xf32>
    %cst_39 = arith.constant dense<0.000000e+00> : vector<32x32xf32>
    %52 = tpu.matmul %29, %20, %cst_39 {dimension_numbers = #tpu.dot_dimension_numbers<[1], [0], [0], [1], [0, 0, 1, 1], [], []>} : vector<32x32xf32>, vector<32x32xf32>, vector<32x32xf32> -> vector<32x32xf32>
    %53 = vector.broadcast %51 : vector<32x1xf32> to vector<32x32xf32>
    %54 = arith.mulf %52, %53 : vector<32x32xf32>
    %cst_40 = arith.constant dense<0.000000e+00> : vector<16x32xf32>
    %55 = tpu.matmul %7, %54, %cst_40 {dimension_numbers = #tpu.dot_dimension_numbers<[1], [0], [0], [1], [0, 0, 1, 1], [], []>} : vector<16x32xf32>, vector<32x32xf32>, vector<16x32xf32> -> vector<16x32xf32>
    %56 = vector.broadcast %23 : vector<1x32xf32> to vector<16x32xf32>
    %57 = arith.addf %55, %56 : vector<16x32xf32>
    %58 = math.tanh %57 : vector<16x32xf32>
    %c0_41 = arith.constant 0 : index
    %c0_42 = arith.constant 0 : index
    %59 = vector.load %arg15[%c0_41, %c0_42] : memref<32x96xf32, #tpu.memory_space<vmem>>, vector<32x96xf32>
    %c0_43 = arith.constant 0 : index
    %c0_44 = arith.constant 0 : index
    %60 = vector.load %arg16[%c0_43, %c0_44] : memref<32x96xf32, #tpu.memory_space<vmem>>, vector<32x96xf32>
    %c0_45 = arith.constant 0 : index
    %c0_46 = arith.constant 0 : index
    %61 = vector.load %arg17[%c0_45, %c0_46] : memref<1x96xf32, #tpu.memory_space<vmem>>, vector<1x96xf32>
    %c0_47 = arith.constant 0 : index
    %c0_48 = arith.constant 0 : index
    %62 = vector.load %arg18[%c0_47, %c0_48] : memref<1x96xf32, #tpu.memory_space<vmem>>, vector<1x96xf32>
    %c0_49 = arith.constant 0 : index
    %c0_50 = arith.constant 0 : index
    %63 = vector.load %arg19[%c0_49, %c0_50] : memref<1x32xf32, #tpu.memory_space<vmem>>, vector<1x32xf32>
    %c0_51 = arith.constant 0 : index
    %c0_52 = arith.constant 0 : index
    %64 = vector.load %arg20[%c0_51, %c0_52] : memref<1x32xf32, #tpu.memory_space<vmem>>, vector<1x32xf32>
    %cst_53 = arith.constant dense<0.000000e+00> : vector<16x96xf32>
    %65 = tpu.matmul %58, %59, %cst_53 {dimension_numbers = #tpu.dot_dimension_numbers<[1], [0], [0], [1], [0, 0, 1, 1], [], []>} : vector<16x32xf32>, vector<32x96xf32>, vector<16x96xf32> -> vector<16x96xf32>
    %66 = vector.broadcast %61 : vector<1x96xf32> to vector<16x96xf32>
    %67 = arith.addf %65, %66 : vector<16x96xf32>
    %cst_54 = arith.constant dense<0.000000e+00> : vector<16x96xf32>
    %68 = tpu.matmul %17, %60, %cst_54 {dimension_numbers = #tpu.dot_dimension_numbers<[1], [0], [0], [1], [0, 0, 1, 1], [], []>} : vector<16x32xf32>, vector<32x96xf32>, vector<16x96xf32> -> vector<16x96xf32>
    %69 = vector.broadcast %62 : vector<1x96xf32> to vector<16x96xf32>
    %70 = arith.addf %68, %69 : vector<16x96xf32>
    %71 = vector.extract_strided_slice %67 {offsets = [0, 0], sizes = [16, 32], strides = [1, 1]} : vector<16x96xf32> to vector<16x32xf32>
    %72 = vector.extract_strided_slice %70 {offsets = [0, 0], sizes = [16, 32], strides = [1, 1]} : vector<16x96xf32> to vector<16x32xf32>
    %73 = arith.addf %71, %72 : vector<16x32xf32>
    %74 = arith.negf %73 : vector<16x32xf32>
    %75 = math.exp %74 : vector<16x32xf32>
    %cst_55 = arith.constant 1.000000e+00 : f32
    %76 = vector.broadcast %cst_55 : f32 to vector<16x32xf32>
    %77 = arith.addf %76, %75 : vector<16x32xf32>
    %78 = arith.divf %76, %77 : vector<16x32xf32>
    %79 = vector.extract_strided_slice %67 {offsets = [0, 32], sizes = [16, 32], strides = [1, 1]} : vector<16x96xf32> to vector<16x32xf32>
    %80 = vector.extract_strided_slice %70 {offsets = [0, 32], sizes = [16, 32], strides = [1, 1]} : vector<16x96xf32> to vector<16x32xf32>
    %81 = arith.addf %79, %80 : vector<16x32xf32>
    %82 = arith.negf %81 : vector<16x32xf32>
    %83 = math.exp %82 : vector<16x32xf32>
    %cst_56 = arith.constant 1.000000e+00 : f32
    %84 = vector.broadcast %cst_56 : f32 to vector<16x32xf32>
    %85 = arith.addf %84, %83 : vector<16x32xf32>
    %86 = arith.divf %84, %85 : vector<16x32xf32>
    %87 = vector.extract_strided_slice %67 {offsets = [0, 64], sizes = [16, 32], strides = [1, 1]} : vector<16x96xf32> to vector<16x32xf32>
    %88 = vector.extract_strided_slice %70 {offsets = [0, 64], sizes = [16, 32], strides = [1, 1]} : vector<16x96xf32> to vector<16x32xf32>
    %89 = arith.mulf %78, %88 : vector<16x32xf32>
    %90 = arith.addf %87, %89 : vector<16x32xf32>
    %91 = math.tanh %90 : vector<16x32xf32>
    %cst_57 = arith.constant 1.000000e+00 : f32
    %92 = vector.broadcast %cst_57 : f32 to vector<16x32xf32>
    %93 = arith.subf %92, %86 : vector<16x32xf32>
    %94 = arith.mulf %93, %91 : vector<16x32xf32>
    %95 = arith.mulf %86, %17 : vector<16x32xf32>
    %96 = arith.addf %94, %95 : vector<16x32xf32>
    %cst_58 = arith.constant dense<0.000000e+00> : vector<16xf32>
    %97 = vector.multi_reduction <add>, %96, %cst_58 [1] : vector<16x32xf32> to vector<16xf32>
    %98 = vector.shape_cast %97 : vector<16xf32> to vector<16x1xf32>
    %cst_59 = arith.constant 3.200000e+01 : f32
    %99 = vector.broadcast %cst_59 : f32 to vector<16x1xf32>
    %100 = arith.divf %98, %99 : vector<16x1xf32>
    %101 = vector.broadcast %100 : vector<16x1xf32> to vector<16x32xf32>
    %102 = arith.subf %96, %101 : vector<16x32xf32>
    %103 = arith.mulf %102, %102 : vector<16x32xf32>
    %cst_60 = arith.constant dense<0.000000e+00> : vector<16xf32>
    %104 = vector.multi_reduction <add>, %103, %cst_60 [1] : vector<16x32xf32> to vector<16xf32>
    %105 = vector.shape_cast %104 : vector<16xf32> to vector<16x1xf32>
    %cst_61 = arith.constant 3.200000e+01 : f32
    %106 = vector.broadcast %cst_61 : f32 to vector<16x1xf32>
    %107 = arith.divf %105, %106 : vector<16x1xf32>
    %108 = vector.broadcast %100 : vector<16x1xf32> to vector<16x32xf32>
    %109 = arith.subf %96, %108 : vector<16x32xf32>
    %cst_62 = arith.constant 9.99999974E-6 : f32
    %110 = vector.broadcast %cst_62 : f32 to vector<16x1xf32>
    %111 = arith.addf %107, %110 : vector<16x1xf32>
    %112 = math.rsqrt %111 : vector<16x1xf32>
    %113 = vector.broadcast %112 : vector<16x1xf32> to vector<16x32xf32>
    %114 = arith.mulf %109, %113 : vector<16x32xf32>
    %115 = vector.broadcast %63 : vector<1x32xf32> to vector<16x32xf32>
    %116 = arith.mulf %114, %115 : vector<16x32xf32>
    %117 = vector.broadcast %64 : vector<1x32xf32> to vector<16x32xf32>
    %118 = arith.addf %116, %117 : vector<16x32xf32>
    %119 = math.tanh %118 : vector<16x32xf32>
    %c0_63 = arith.constant 0 : index
    %c0_64 = arith.constant 0 : index
    %120 = vector.load %arg21[%c0_63, %c0_64] : memref<32x32xf32, #tpu.memory_space<vmem>>, vector<32x32xf32>
    %c0_65 = arith.constant 0 : index
    %c0_66 = arith.constant 0 : index
    %121 = vector.load %arg22[%c0_65, %c0_66] : memref<1x32xf32, #tpu.memory_space<vmem>>, vector<1x32xf32>
    %c0_67 = arith.constant 0 : index
    %c0_68 = arith.constant 0 : index
    %122 = vector.load %arg23[%c0_67, %c0_68] : memref<1x32xf32, #tpu.memory_space<vmem>>, vector<1x32xf32>
    %c0_69 = arith.constant 0 : index
    %c0_70 = arith.constant 0 : index
    %123 = vector.load %arg24[%c0_69, %c0_70] : memref<1x32xf32, #tpu.memory_space<vmem>>, vector<1x32xf32>
    %cst_71 = arith.constant dense<0.000000e+00> : vector<16x32xf32>
    %124 = tpu.matmul %119, %120, %cst_71 {dimension_numbers = #tpu.dot_dimension_numbers<[1], [0], [0], [1], [0, 0, 1, 1], [], []>} : vector<16x32xf32>, vector<32x32xf32>, vector<16x32xf32> -> vector<16x32xf32>
    %cst_72 = arith.constant dense<0.000000e+00> : vector<32x32xf32>
    %125 = tpu.matmul %3, %124, %cst_72 {dimension_numbers = #tpu.dot_dimension_numbers<[1], [0], [0], [1], [0, 0, 1, 1], [], []>} : vector<32x16xf32>, vector<16x32xf32>, vector<32x32xf32> -> vector<32x32xf32>
    %cst_73 = arith.constant dense<0.000000e+00> : vector<32x32xf32>
    %126 = tpu.matmul %5, %124, %cst_73 {dimension_numbers = #tpu.dot_dimension_numbers<[1], [0], [0], [1], [0, 0, 1, 1], [], []>} : vector<32x16xf32>, vector<16x32xf32>, vector<32x32xf32> -> vector<32x32xf32>
    %127 = vector.broadcast %121 : vector<1x32xf32> to vector<32x32xf32>
    %128 = arith.mulf %125, %127 : vector<32x32xf32>
    %cst_74 = arith.constant dense<0.000000e+00> : vector<32xf32>
    %129 = vector.multi_reduction <add>, %128, %cst_74 [1] : vector<32x32xf32> to vector<32xf32>
    %130 = vector.shape_cast %129 : vector<32xf32> to vector<32x1xf32>
    %131 = vector.broadcast %122 : vector<1x32xf32> to vector<32x32xf32>
    %132 = arith.mulf %126, %131 : vector<32x32xf32>
    %cst_75 = arith.constant dense<0.000000e+00> : vector<32xf32>
    %133 = vector.multi_reduction <add>, %132, %cst_75 [1] : vector<32x32xf32> to vector<32xf32>
    %134 = vector.shape_cast %133 : vector<32xf32> to vector<32x1xf32>
    %135 = arith.addf %130, %134 : vector<32x1xf32>
    %cst_76 = arith.constant 0.000000e+00 : f32
    %136 = vector.broadcast %cst_76 : f32 to vector<32x1xf32>
    %137 = arith.cmpf ogt, %135, %136 : vector<32x1xf32>
    %cst_77 = arith.constant 0.00999999977 : f32
    %138 = vector.broadcast %cst_77 : f32 to vector<32x1xf32>
    %139 = arith.mulf %138, %135 : vector<32x1xf32>
    %140 = arith.select %137, %135, %139 : vector<32x1xi1>, vector<32x1xf32>
    %141 = vector.shape_cast %140 : vector<32x1xf32> to vector<1x32x1xf32>
    %cst_78 = arith.constant dense<0xFF800000> : vector<1xf32>
    %142 = vector.multi_reduction <maximumf>, %141, %cst_78 [1, 2] : vector<1x32x1xf32> to vector<1xf32>
    %143 = vector.shape_cast %142 : vector<1xf32> to vector<1x1x1xf32>
    %144 = vector.extract %143[0, 0, 0] : f32 from vector<1x1x1xf32>
    %145 = vector.broadcast %144 : f32 to vector<32x1xf32>
    %146 = arith.subf %140, %145 : vector<32x1xf32>
    %147 = math.exp %146 : vector<32x1xf32>
    %cst_79 = arith.constant dense<0.000000e+00> : vector<16x1xf32>
    %148 = tpu.matmul %7, %147, %cst_79 {dimension_numbers = #tpu.dot_dimension_numbers<[1], [0], [0], [1], [0, 0, 1, 1], [], []>} : vector<16x32xf32>, vector<32x1xf32>, vector<16x1xf32> -> vector<16x1xf32>
    %cst_80 = arith.constant dense<0.000000e+00> : vector<32x1xf32>
    %149 = tpu.matmul %5, %148, %cst_80 {dimension_numbers = #tpu.dot_dimension_numbers<[1], [0], [0], [1], [0, 0, 1, 1], [], []>} : vector<32x16xf32>, vector<16x1xf32>, vector<32x1xf32> -> vector<32x1xf32>
    %cst_81 = arith.constant 1.000000e-16 : f32
    %150 = vector.broadcast %cst_81 : f32 to vector<32x1xf32>
    %151 = arith.addf %149, %150 : vector<32x1xf32>
    %152 = tpu.reciprocal %151 {approx = true} : vector<32x1xf32> -> vector<32x1xf32>
    %153 = arith.mulf %147, %152 : vector<32x1xf32>
    %154 = vector.broadcast %153 : vector<32x1xf32> to vector<32x32xf32>
    %155 = arith.mulf %125, %154 : vector<32x32xf32>
    %cst_82 = arith.constant dense<0.000000e+00> : vector<16x32xf32>
    %156 = tpu.matmul %7, %155, %cst_82 {dimension_numbers = #tpu.dot_dimension_numbers<[1], [0], [0], [1], [0, 0, 1, 1], [], []>} : vector<16x32xf32>, vector<32x32xf32>, vector<16x32xf32> -> vector<16x32xf32>
    %157 = vector.broadcast %123 : vector<1x32xf32> to vector<16x32xf32>
    %158 = arith.addf %156, %157 : vector<16x32xf32>
    %159 = math.tanh %158 : vector<16x32xf32>
    %c0_83 = arith.constant 0 : index
    %c0_84 = arith.constant 0 : index
    %160 = vector.load %arg25[%c0_83, %c0_84] : memref<32x96xf32, #tpu.memory_space<vmem>>, vector<32x96xf32>
    %c0_85 = arith.constant 0 : index
    %c0_86 = arith.constant 0 : index
    %161 = vector.load %arg26[%c0_85, %c0_86] : memref<32x96xf32, #tpu.memory_space<vmem>>, vector<32x96xf32>
    %c0_87 = arith.constant 0 : index
    %c0_88 = arith.constant 0 : index
    %162 = vector.load %arg27[%c0_87, %c0_88] : memref<1x96xf32, #tpu.memory_space<vmem>>, vector<1x96xf32>
    %c0_89 = arith.constant 0 : index
    %c0_90 = arith.constant 0 : index
    %163 = vector.load %arg28[%c0_89, %c0_90] : memref<1x96xf32, #tpu.memory_space<vmem>>, vector<1x96xf32>
    %c0_91 = arith.constant 0 : index
    %c0_92 = arith.constant 0 : index
    %164 = vector.load %arg29[%c0_91, %c0_92] : memref<1x32xf32, #tpu.memory_space<vmem>>, vector<1x32xf32>
    %c0_93 = arith.constant 0 : index
    %c0_94 = arith.constant 0 : index
    %165 = vector.load %arg30[%c0_93, %c0_94] : memref<1x32xf32, #tpu.memory_space<vmem>>, vector<1x32xf32>
    %cst_95 = arith.constant dense<0.000000e+00> : vector<16x96xf32>
    %166 = tpu.matmul %159, %160, %cst_95 {dimension_numbers = #tpu.dot_dimension_numbers<[1], [0], [0], [1], [0, 0, 1, 1], [], []>} : vector<16x32xf32>, vector<32x96xf32>, vector<16x96xf32> -> vector<16x96xf32>
    %167 = vector.broadcast %162 : vector<1x96xf32> to vector<16x96xf32>
    %168 = arith.addf %166, %167 : vector<16x96xf32>
    %cst_96 = arith.constant dense<0.000000e+00> : vector<16x96xf32>
    %169 = tpu.matmul %119, %161, %cst_96 {dimension_numbers = #tpu.dot_dimension_numbers<[1], [0], [0], [1], [0, 0, 1, 1], [], []>} : vector<16x32xf32>, vector<32x96xf32>, vector<16x96xf32> -> vector<16x96xf32>
    %170 = vector.broadcast %163 : vector<1x96xf32> to vector<16x96xf32>
    %171 = arith.addf %169, %170 : vector<16x96xf32>
    %172 = vector.extract_strided_slice %168 {offsets = [0, 0], sizes = [16, 32], strides = [1, 1]} : vector<16x96xf32> to vector<16x32xf32>
    %173 = vector.extract_strided_slice %171 {offsets = [0, 0], sizes = [16, 32], strides = [1, 1]} : vector<16x96xf32> to vector<16x32xf32>
    %174 = arith.addf %172, %173 : vector<16x32xf32>
    %175 = arith.negf %174 : vector<16x32xf32>
    %176 = math.exp %175 : vector<16x32xf32>
    %cst_97 = arith.constant 1.000000e+00 : f32
    %177 = vector.broadcast %cst_97 : f32 to vector<16x32xf32>
    %178 = arith.addf %177, %176 : vector<16x32xf32>
    %179 = arith.divf %177, %178 : vector<16x32xf32>
    %180 = vector.extract_strided_slice %168 {offsets = [0, 32], sizes = [16, 32], strides = [1, 1]} : vector<16x96xf32> to vector<16x32xf32>
    %181 = vector.extract_strided_slice %171 {offsets = [0, 32], sizes = [16, 32], strides = [1, 1]} : vector<16x96xf32> to vector<16x32xf32>
    %182 = arith.addf %180, %181 : vector<16x32xf32>
    %183 = arith.negf %182 : vector<16x32xf32>
    %184 = math.exp %183 : vector<16x32xf32>
    %cst_98 = arith.constant 1.000000e+00 : f32
    %185 = vector.broadcast %cst_98 : f32 to vector<16x32xf32>
    %186 = arith.addf %185, %184 : vector<16x32xf32>
    %187 = arith.divf %185, %186 : vector<16x32xf32>
    %188 = vector.extract_strided_slice %168 {offsets = [0, 64], sizes = [16, 32], strides = [1, 1]} : vector<16x96xf32> to vector<16x32xf32>
    %189 = vector.extract_strided_slice %171 {offsets = [0, 64], sizes = [16, 32], strides = [1, 1]} : vector<16x96xf32> to vector<16x32xf32>
    %190 = arith.mulf %179, %189 : vector<16x32xf32>
    %191 = arith.addf %188, %190 : vector<16x32xf32>
    %192 = math.tanh %191 : vector<16x32xf32>
    %cst_99 = arith.constant 1.000000e+00 : f32
    %193 = vector.broadcast %cst_99 : f32 to vector<16x32xf32>
    %194 = arith.subf %193, %187 : vector<16x32xf32>
    %195 = arith.mulf %194, %192 : vector<16x32xf32>
    %196 = arith.mulf %187, %119 : vector<16x32xf32>
    %197 = arith.addf %195, %196 : vector<16x32xf32>
    %cst_100 = arith.constant dense<0.000000e+00> : vector<16xf32>
    %198 = vector.multi_reduction <add>, %197, %cst_100 [1] : vector<16x32xf32> to vector<16xf32>
    %199 = vector.shape_cast %198 : vector<16xf32> to vector<16x1xf32>
    %cst_101 = arith.constant 3.200000e+01 : f32
    %200 = vector.broadcast %cst_101 : f32 to vector<16x1xf32>
    %201 = arith.divf %199, %200 : vector<16x1xf32>
    %202 = vector.broadcast %201 : vector<16x1xf32> to vector<16x32xf32>
    %203 = arith.subf %197, %202 : vector<16x32xf32>
    %204 = arith.mulf %203, %203 : vector<16x32xf32>
    %cst_102 = arith.constant dense<0.000000e+00> : vector<16xf32>
    %205 = vector.multi_reduction <add>, %204, %cst_102 [1] : vector<16x32xf32> to vector<16xf32>
    %206 = vector.shape_cast %205 : vector<16xf32> to vector<16x1xf32>
    %cst_103 = arith.constant 3.200000e+01 : f32
    %207 = vector.broadcast %cst_103 : f32 to vector<16x1xf32>
    %208 = arith.divf %206, %207 : vector<16x1xf32>
    %209 = vector.broadcast %201 : vector<16x1xf32> to vector<16x32xf32>
    %210 = arith.subf %197, %209 : vector<16x32xf32>
    %cst_104 = arith.constant 9.99999974E-6 : f32
    %211 = vector.broadcast %cst_104 : f32 to vector<16x1xf32>
    %212 = arith.addf %208, %211 : vector<16x1xf32>
    %213 = math.rsqrt %212 : vector<16x1xf32>
    %214 = vector.broadcast %213 : vector<16x1xf32> to vector<16x32xf32>
    %215 = arith.mulf %210, %214 : vector<16x32xf32>
    %216 = vector.broadcast %164 : vector<1x32xf32> to vector<16x32xf32>
    %217 = arith.mulf %215, %216 : vector<16x32xf32>
    %218 = vector.broadcast %165 : vector<1x32xf32> to vector<16x32xf32>
    %219 = arith.addf %217, %218 : vector<16x32xf32>
    %220 = math.tanh %219 : vector<16x32xf32>
    %cst_105 = arith.constant dense<0.000000e+00> : vector<2x32xf32>
    %221 = tpu.matmul %11, %220, %cst_105 {dimension_numbers = #tpu.dot_dimension_numbers<[1], [0], [0], [1], [0, 0, 1, 1], [], []>} : vector<2x16xf32>, vector<16x32xf32>, vector<2x32xf32> -> vector<2x32xf32>
    %222 = math.tanh %221 : vector<2x32xf32>
    %c0_106 = arith.constant 0 : index
    %c0_107 = arith.constant 0 : index
    %223 = vector.load %arg31[%c0_106, %c0_107] : memref<32x32xf32, #tpu.memory_space<vmem>>, vector<32x32xf32>
    %c0_108 = arith.constant 0 : index
    %c0_109 = arith.constant 0 : index
    %224 = vector.load %arg32[%c0_108, %c0_109] : memref<1x32xf32, #tpu.memory_space<vmem>>, vector<1x32xf32>
    %c0_110 = arith.constant 0 : index
    %c0_111 = arith.constant 0 : index
    %225 = vector.load %arg33[%c0_110, %c0_111] : memref<1x32xf32, #tpu.memory_space<vmem>>, vector<1x32xf32>
    %c0_112 = arith.constant 0 : index
    %c0_113 = arith.constant 0 : index
    %226 = vector.load %arg34[%c0_112, %c0_113] : memref<1x32xf32, #tpu.memory_space<vmem>>, vector<1x32xf32>
    %c0_114 = arith.constant 0 : index
    %c0_115 = arith.constant 0 : index
    %227 = vector.load %arg35[%c0_114, %c0_115] : memref<32x96xf32, #tpu.memory_space<vmem>>, vector<32x96xf32>
    %c0_116 = arith.constant 0 : index
    %c0_117 = arith.constant 0 : index
    %228 = vector.load %arg36[%c0_116, %c0_117] : memref<32x96xf32, #tpu.memory_space<vmem>>, vector<32x96xf32>
    %c0_118 = arith.constant 0 : index
    %c0_119 = arith.constant 0 : index
    %229 = vector.load %arg37[%c0_118, %c0_119] : memref<1x96xf32, #tpu.memory_space<vmem>>, vector<1x96xf32>
    %c0_120 = arith.constant 0 : index
    %c0_121 = arith.constant 0 : index
    %230 = vector.load %arg38[%c0_120, %c0_121] : memref<1x96xf32, #tpu.memory_space<vmem>>, vector<1x96xf32>
    %cst_122 = arith.constant dense<0.000000e+00> : vector<16x32xf32>
    %231 = tpu.matmul %220, %223, %cst_122 {dimension_numbers = #tpu.dot_dimension_numbers<[1], [0], [0], [1], [0, 0, 1, 1], [], []>} : vector<16x32xf32>, vector<32x32xf32>, vector<16x32xf32> -> vector<16x32xf32>
    %232 = vector.broadcast %224 : vector<1x32xf32> to vector<16x32xf32>
    %233 = arith.mulf %231, %232 : vector<16x32xf32>
    %cst_123 = arith.constant dense<0.000000e+00> : vector<16xf32>
    %234 = vector.multi_reduction <add>, %233, %cst_123 [1] : vector<16x32xf32> to vector<16xf32>
    %235 = vector.shape_cast %234 : vector<16xf32> to vector<16x1xf32>
    %cst_124 = arith.constant dense<0.000000e+00> : vector<2x32xf32>
    %236 = tpu.matmul %222, %223, %cst_124 {dimension_numbers = #tpu.dot_dimension_numbers<[1], [0], [0], [1], [0, 0, 1, 1], [], []>} : vector<2x32xf32>, vector<32x32xf32>, vector<2x32xf32> -> vector<2x32xf32>
    %237 = vector.broadcast %225 : vector<1x32xf32> to vector<2x32xf32>
    %238 = arith.mulf %236, %237 : vector<2x32xf32>
    %cst_125 = arith.constant dense<0.000000e+00> : vector<2xf32>
    %239 = vector.multi_reduction <add>, %238, %cst_125 [1] : vector<2x32xf32> to vector<2xf32>
    %240 = vector.shape_cast %239 : vector<2xf32> to vector<2x1xf32>
    %cst_126 = arith.constant dense<0.000000e+00> : vector<16x1xf32>
    %241 = tpu.matmul %9, %240, %cst_126 {dimension_numbers = #tpu.dot_dimension_numbers<[1], [0], [0], [1], [0, 0, 1, 1], [], []>} : vector<16x2xf32>, vector<2x1xf32>, vector<16x1xf32> -> vector<16x1xf32>
    %242 = arith.addf %235, %241 : vector<16x1xf32>
    %cst_127 = arith.constant 0.000000e+00 : f32
    %243 = vector.broadcast %cst_127 : f32 to vector<16x1xf32>
    %244 = arith.cmpf ogt, %242, %243 : vector<16x1xf32>
    %cst_128 = arith.constant 0.00999999977 : f32
    %245 = vector.broadcast %cst_128 : f32 to vector<16x1xf32>
    %246 = arith.mulf %245, %242 : vector<16x1xf32>
    %247 = arith.select %244, %242, %246 : vector<16x1xi1>, vector<16x1xf32>
    %248 = vector.shape_cast %247 : vector<16x1xf32> to vector<1x16x1xf32>
    %cst_129 = arith.constant dense<0xFF800000> : vector<1xf32>
    %249 = vector.multi_reduction <maximumf>, %248, %cst_129 [1, 2] : vector<1x16x1xf32> to vector<1xf32>
    %250 = vector.shape_cast %249 : vector<1xf32> to vector<1x1x1xf32>
    %251 = vector.extract %250[0, 0, 0] : f32 from vector<1x1x1xf32>
    %252 = vector.broadcast %251 : f32 to vector<16x1xf32>
    %253 = arith.subf %247, %252 : vector<16x1xf32>
    %254 = math.exp %253 : vector<16x1xf32>
    %cst_130 = arith.constant dense<0.000000e+00> : vector<2x1xf32>
    %255 = tpu.matmul %11, %254, %cst_130 {dimension_numbers = #tpu.dot_dimension_numbers<[1], [0], [0], [1], [0, 0, 1, 1], [], []>} : vector<2x16xf32>, vector<16x1xf32>, vector<2x1xf32> -> vector<2x1xf32>
    %cst_131 = arith.constant dense<0.000000e+00> : vector<16x1xf32>
    %256 = tpu.matmul %9, %255, %cst_131 {dimension_numbers = #tpu.dot_dimension_numbers<[1], [0], [0], [1], [0, 0, 1, 1], [], []>} : vector<16x2xf32>, vector<2x1xf32>, vector<16x1xf32> -> vector<16x1xf32>
    %cst_132 = arith.constant 1.000000e-16 : f32
    %257 = vector.broadcast %cst_132 : f32 to vector<16x1xf32>
    %258 = arith.addf %256, %257 : vector<16x1xf32>
    %259 = tpu.reciprocal %258 {approx = true} : vector<16x1xf32> -> vector<16x1xf32>
    %260 = arith.mulf %254, %259 : vector<16x1xf32>
    %261 = vector.broadcast %260 : vector<16x1xf32> to vector<16x32xf32>
    %262 = arith.mulf %231, %261 : vector<16x32xf32>
    %cst_133 = arith.constant dense<0.000000e+00> : vector<2x32xf32>
    %263 = tpu.matmul %11, %262, %cst_133 {dimension_numbers = #tpu.dot_dimension_numbers<[1], [0], [0], [1], [0, 0, 1, 1], [], []>} : vector<2x16xf32>, vector<16x32xf32>, vector<2x32xf32> -> vector<2x32xf32>
    %264 = vector.broadcast %226 : vector<1x32xf32> to vector<2x32xf32>
    %265 = arith.addf %263, %264 : vector<2x32xf32>
    %266 = math.tanh %265 : vector<2x32xf32>
    %cst_134 = arith.constant dense<0.000000e+00> : vector<2x96xf32>
    %267 = tpu.matmul %266, %227, %cst_134 {dimension_numbers = #tpu.dot_dimension_numbers<[1], [0], [0], [1], [0, 0, 1, 1], [], []>} : vector<2x32xf32>, vector<32x96xf32>, vector<2x96xf32> -> vector<2x96xf32>
    %268 = vector.broadcast %229 : vector<1x96xf32> to vector<2x96xf32>
    %269 = arith.addf %267, %268 : vector<2x96xf32>
    %cst_135 = arith.constant dense<0.000000e+00> : vector<2x96xf32>
    %270 = tpu.matmul %222, %228, %cst_135 {dimension_numbers = #tpu.dot_dimension_numbers<[1], [0], [0], [1], [0, 0, 1, 1], [], []>} : vector<2x32xf32>, vector<32x96xf32>, vector<2x96xf32> -> vector<2x96xf32>
    %271 = vector.broadcast %230 : vector<1x96xf32> to vector<2x96xf32>
    %272 = arith.addf %270, %271 : vector<2x96xf32>
    %273 = vector.extract_strided_slice %269 {offsets = [0, 0], sizes = [2, 32], strides = [1, 1]} : vector<2x96xf32> to vector<2x32xf32>
    %274 = vector.extract_strided_slice %272 {offsets = [0, 0], sizes = [2, 32], strides = [1, 1]} : vector<2x96xf32> to vector<2x32xf32>
    %275 = arith.addf %273, %274 : vector<2x32xf32>
    %276 = arith.negf %275 : vector<2x32xf32>
    %277 = math.exp %276 : vector<2x32xf32>
    %cst_136 = arith.constant 1.000000e+00 : f32
    %278 = vector.broadcast %cst_136 : f32 to vector<2x32xf32>
    %279 = arith.addf %278, %277 : vector<2x32xf32>
    %280 = arith.divf %278, %279 : vector<2x32xf32>
    %281 = vector.extract_strided_slice %269 {offsets = [0, 32], sizes = [2, 32], strides = [1, 1]} : vector<2x96xf32> to vector<2x32xf32>
    %282 = vector.extract_strided_slice %272 {offsets = [0, 32], sizes = [2, 32], strides = [1, 1]} : vector<2x96xf32> to vector<2x32xf32>
    %283 = arith.addf %281, %282 : vector<2x32xf32>
    %284 = arith.negf %283 : vector<2x32xf32>
    %285 = math.exp %284 : vector<2x32xf32>
    %cst_137 = arith.constant 1.000000e+00 : f32
    %286 = vector.broadcast %cst_137 : f32 to vector<2x32xf32>
    %287 = arith.addf %286, %285 : vector<2x32xf32>
    %288 = arith.divf %286, %287 : vector<2x32xf32>
    %289 = vector.extract_strided_slice %269 {offsets = [0, 64], sizes = [2, 32], strides = [1, 1]} : vector<2x96xf32> to vector<2x32xf32>
    %290 = vector.extract_strided_slice %272 {offsets = [0, 64], sizes = [2, 32], strides = [1, 1]} : vector<2x96xf32> to vector<2x32xf32>
    %291 = arith.mulf %280, %290 : vector<2x32xf32>
    %292 = arith.addf %289, %291 : vector<2x32xf32>
    %293 = math.tanh %292 : vector<2x32xf32>
    %cst_138 = arith.constant 1.000000e+00 : f32
    %294 = vector.broadcast %cst_138 : f32 to vector<2x32xf32>
    %295 = arith.subf %294, %288 : vector<2x32xf32>
    %296 = arith.mulf %295, %293 : vector<2x32xf32>
    %297 = arith.mulf %288, %222 : vector<2x32xf32>
    %298 = arith.addf %296, %297 : vector<2x32xf32>
    %299 = math.tanh %298 : vector<2x32xf32>
    %cst_139 = arith.constant dense<0.000000e+00> : vector<2x32xf32>
    %300 = tpu.matmul %299, %223, %cst_139 {dimension_numbers = #tpu.dot_dimension_numbers<[1], [0], [0], [1], [0, 0, 1, 1], [], []>} : vector<2x32xf32>, vector<32x32xf32>, vector<2x32xf32> -> vector<2x32xf32>
    %301 = vector.broadcast %225 : vector<1x32xf32> to vector<2x32xf32>
    %302 = arith.mulf %300, %301 : vector<2x32xf32>
    %cst_140 = arith.constant dense<0.000000e+00> : vector<2xf32>
    %303 = vector.multi_reduction <add>, %302, %cst_140 [1] : vector<2x32xf32> to vector<2xf32>
    %304 = vector.shape_cast %303 : vector<2xf32> to vector<2x1xf32>
    %cst_141 = arith.constant dense<0.000000e+00> : vector<16x1xf32>
    %305 = tpu.matmul %9, %304, %cst_141 {dimension_numbers = #tpu.dot_dimension_numbers<[1], [0], [0], [1], [0, 0, 1, 1], [], []>} : vector<16x2xf32>, vector<2x1xf32>, vector<16x1xf32> -> vector<16x1xf32>
    %306 = arith.addf %235, %305 : vector<16x1xf32>
    %cst_142 = arith.constant 0.000000e+00 : f32
    %307 = vector.broadcast %cst_142 : f32 to vector<16x1xf32>
    %308 = arith.cmpf ogt, %306, %307 : vector<16x1xf32>
    %cst_143 = arith.constant 0.00999999977 : f32
    %309 = vector.broadcast %cst_143 : f32 to vector<16x1xf32>
    %310 = arith.mulf %309, %306 : vector<16x1xf32>
    %311 = arith.select %308, %306, %310 : vector<16x1xi1>, vector<16x1xf32>
    %312 = vector.shape_cast %311 : vector<16x1xf32> to vector<1x16x1xf32>
    %cst_144 = arith.constant dense<0xFF800000> : vector<1xf32>
    %313 = vector.multi_reduction <maximumf>, %312, %cst_144 [1, 2] : vector<1x16x1xf32> to vector<1xf32>
    %314 = vector.shape_cast %313 : vector<1xf32> to vector<1x1x1xf32>
    %315 = vector.extract %314[0, 0, 0] : f32 from vector<1x1x1xf32>
    %316 = vector.broadcast %315 : f32 to vector<16x1xf32>
    %317 = arith.subf %311, %316 : vector<16x1xf32>
    %318 = math.exp %317 : vector<16x1xf32>
    %cst_145 = arith.constant dense<0.000000e+00> : vector<2x1xf32>
    %319 = tpu.matmul %11, %318, %cst_145 {dimension_numbers = #tpu.dot_dimension_numbers<[1], [0], [0], [1], [0, 0, 1, 1], [], []>} : vector<2x16xf32>, vector<16x1xf32>, vector<2x1xf32> -> vector<2x1xf32>
    %cst_146 = arith.constant dense<0.000000e+00> : vector<16x1xf32>
    %320 = tpu.matmul %9, %319, %cst_146 {dimension_numbers = #tpu.dot_dimension_numbers<[1], [0], [0], [1], [0, 0, 1, 1], [], []>} : vector<16x2xf32>, vector<2x1xf32>, vector<16x1xf32> -> vector<16x1xf32>
    %cst_147 = arith.constant 1.000000e-16 : f32
    %321 = vector.broadcast %cst_147 : f32 to vector<16x1xf32>
    %322 = arith.addf %320, %321 : vector<16x1xf32>
    %323 = tpu.reciprocal %322 {approx = true} : vector<16x1xf32> -> vector<16x1xf32>
    %324 = arith.mulf %318, %323 : vector<16x1xf32>
    %325 = vector.broadcast %324 : vector<16x1xf32> to vector<16x32xf32>
    %326 = arith.mulf %231, %325 : vector<16x32xf32>
    %cst_148 = arith.constant dense<0.000000e+00> : vector<2x32xf32>
    %327 = tpu.matmul %11, %326, %cst_148 {dimension_numbers = #tpu.dot_dimension_numbers<[1], [0], [0], [1], [0, 0, 1, 1], [], []>} : vector<2x16xf32>, vector<16x32xf32>, vector<2x32xf32> -> vector<2x32xf32>
    %328 = vector.broadcast %226 : vector<1x32xf32> to vector<2x32xf32>
    %329 = arith.addf %327, %328 : vector<2x32xf32>
    %330 = math.tanh %329 : vector<2x32xf32>
    %cst_149 = arith.constant dense<0.000000e+00> : vector<2x96xf32>
    %331 = tpu.matmul %330, %227, %cst_149 {dimension_numbers = #tpu.dot_dimension_numbers<[1], [0], [0], [1], [0, 0, 1, 1], [], []>} : vector<2x32xf32>, vector<32x96xf32>, vector<2x96xf32> -> vector<2x96xf32>
    %332 = vector.broadcast %229 : vector<1x96xf32> to vector<2x96xf32>
    %333 = arith.addf %331, %332 : vector<2x96xf32>
    %cst_150 = arith.constant dense<0.000000e+00> : vector<2x96xf32>
    %334 = tpu.matmul %299, %228, %cst_150 {dimension_numbers = #tpu.dot_dimension_numbers<[1], [0], [0], [1], [0, 0, 1, 1], [], []>} : vector<2x32xf32>, vector<32x96xf32>, vector<2x96xf32> -> vector<2x96xf32>
    %335 = vector.broadcast %230 : vector<1x96xf32> to vector<2x96xf32>
    %336 = arith.addf %334, %335 : vector<2x96xf32>
    %337 = vector.extract_strided_slice %333 {offsets = [0, 0], sizes = [2, 32], strides = [1, 1]} : vector<2x96xf32> to vector<2x32xf32>
    %338 = vector.extract_strided_slice %336 {offsets = [0, 0], sizes = [2, 32], strides = [1, 1]} : vector<2x96xf32> to vector<2x32xf32>
    %339 = arith.addf %337, %338 : vector<2x32xf32>
    %340 = arith.negf %339 : vector<2x32xf32>
    %341 = math.exp %340 : vector<2x32xf32>
    %cst_151 = arith.constant 1.000000e+00 : f32
    %342 = vector.broadcast %cst_151 : f32 to vector<2x32xf32>
    %343 = arith.addf %342, %341 : vector<2x32xf32>
    %344 = arith.divf %342, %343 : vector<2x32xf32>
    %345 = vector.extract_strided_slice %333 {offsets = [0, 32], sizes = [2, 32], strides = [1, 1]} : vector<2x96xf32> to vector<2x32xf32>
    %346 = vector.extract_strided_slice %336 {offsets = [0, 32], sizes = [2, 32], strides = [1, 1]} : vector<2x96xf32> to vector<2x32xf32>
    %347 = arith.addf %345, %346 : vector<2x32xf32>
    %348 = arith.negf %347 : vector<2x32xf32>
    %349 = math.exp %348 : vector<2x32xf32>
    %cst_152 = arith.constant 1.000000e+00 : f32
    %350 = vector.broadcast %cst_152 : f32 to vector<2x32xf32>
    %351 = arith.addf %350, %349 : vector<2x32xf32>
    %352 = arith.divf %350, %351 : vector<2x32xf32>
    %353 = vector.extract_strided_slice %333 {offsets = [0, 64], sizes = [2, 32], strides = [1, 1]} : vector<2x96xf32> to vector<2x32xf32>
    %354 = vector.extract_strided_slice %336 {offsets = [0, 64], sizes = [2, 32], strides = [1, 1]} : vector<2x96xf32> to vector<2x32xf32>
    %355 = arith.mulf %344, %354 : vector<2x32xf32>
    %356 = arith.addf %353, %355 : vector<2x32xf32>
    %357 = math.tanh %356 : vector<2x32xf32>
    %cst_153 = arith.constant 1.000000e+00 : f32
    %358 = vector.broadcast %cst_153 : f32 to vector<2x32xf32>
    %359 = arith.subf %358, %352 : vector<2x32xf32>
    %360 = arith.mulf %359, %357 : vector<2x32xf32>
    %361 = arith.mulf %352, %299 : vector<2x32xf32>
    %362 = arith.addf %360, %361 : vector<2x32xf32>
    %363 = math.tanh %362 : vector<2x32xf32>
    %c0_154 = arith.constant 0 : index
    %c0_155 = arith.constant 0 : index
    %364 = vector.load %arg39[%c0_154, %c0_155] : memref<32x4xf32, #tpu.memory_space<vmem>>, vector<32x4xf32>
    %c0_156 = arith.constant 0 : index
    %c0_157 = arith.constant 0 : index
    %365 = vector.load %arg40[%c0_156, %c0_157] : memref<1x4xf32, #tpu.memory_space<vmem>>, vector<1x4xf32>
    %cst_158 = arith.constant dense<0.000000e+00> : vector<2x4xf32>
    %366 = tpu.matmul %363, %364, %cst_158 {dimension_numbers = #tpu.dot_dimension_numbers<[1], [0], [0], [1], [0, 0, 1, 1], [], []>} : vector<2x32xf32>, vector<32x4xf32>, vector<2x4xf32> -> vector<2x4xf32>
    %367 = vector.broadcast %365 : vector<1x4xf32> to vector<2x4xf32>
    %368 = arith.addf %366, %367 : vector<2x4xf32>
    %c0_159 = arith.constant 0 : index
    %c0_160 = arith.constant 0 : index
    %369 = vector.load %arg41[%c0_159, %c0_160] : memref<2x4xf32, #tpu.memory_space<vmem>>, vector<2x4xf32>
    tpu.vector_store %arg41[%c0_159, %c0_160], %368 {strides = array<i32>} : memref<2x4xf32, #tpu.memory_space<vmem>>, vector<2x4xf32>,
    return
  }
}

</mosaic_0001>

<bundles_post_ra>
// kernel: attentive_fp_forward.1
= control target key start
LH: loop header
LB: loop body
LE: loop exit
PB: predicated region body
PF: predicated region fallthrough
CT: control target
= control target key end

     0   :  { %s5597_s6 = smov 1   ;;  %s5598_s10 = smov 2   ;;  %s6429_s0 = inlined_call_operand.smem [shape: u32[42], index: -1, kind: input, shape index: {}] }
   0x1   :  { %s5678_s5 = sld [smem:[%s6429_s0]]   ;;  %s5599_s14 = smov 3  }
   0x2   :  { %s5683_s9 = sld [smem:[%s6429_s0 + %s5597_s6]]   ;;  %s5600_s18 = smov 4  }
   0x3   :  { %s5688_s13 = sld [smem:[%s6429_s0 + %s5598_s10]]   ;;  %s5601_s22 = smov 5  }
   0x4   :  { %s5693_s17 = sld [smem:[%s6429_s0 + %s5599_s14]]   ;;  %s5602_s26 = smov 6  }
   0x5   :  { %s5698_s21 = sld [smem:[%s6429_s0 + %s5600_s18]]   ;;  %s5603_s30 = smov 7  }
   0x6   :  { %s5703_s25 = sld [smem:[%s6429_s0 + %s5601_s22]]   ;;  %s5604_s4 = smov 8  }
   0x7   :  { %6440 = sst [smem:[#allocation52_spill]] %s5678_s5  ;;  %s5605_s10 = smov 9  }
   0x8   :  { %6441 = sst [smem:[#allocation53_spill]] %s5683_s9  ;;  %s5606_s15 = smov 10  }
   0x9   :  { %6442 = sst [smem:[#allocation54_spill]] %s5688_s13  ;;  %s5607_s20 = smov 11  }
   0xa   :  { %6443 = sst [smem:[#allocation55_spill]] %s5693_s17  ;;  %s5609_s1 = smov 13  }
   0xb   :  { %6444 = sst [smem:[#allocation56_spill]] %s5698_s21  ;;  %s5610_s7 = smov 14  }
   0xc   :  { %6445 = sst [smem:[#allocation57_spill]] %s5703_s25  ;;  %s5612_s22 = smov 16  }
   0xd   :  { %s5708_s29 = sld [smem:[%s6429_s0 + %s5602_s26]]   ;;  %s5608_s26 = smov 12  }
   0xe   :  { %s5713_s3 = sld [smem:[%s6429_s0 + %s5603_s30]]   ;;  %s5613_s28 = smov 17  }
   0xf   :  { %s5718_s8 = sld [smem:[%s6429_s0 + %s5604_s4]]  }
  0x10   :  { %s5723_s14 = sld [smem:[%s6429_s0 + %s5605_s10]]  }
  0x11   :  { %s5728_s19 = sld [smem:[%s6429_s0 + %s5606_s15]]   ;;  %s5611_s15 = smov 15  }
  0x12   :  { %s5733_s24 = sld [smem:[%s6429_s0 + %s5607_s20]]  }
  0x13   :  { %6446 = sst [smem:[#allocation58_spill]] %s5708_s29 }
  0x14   :  { %s5738_s30 = sld [smem:[%s6429_s0 + %s5608_s26]]  }
  0x15   :  { %s5743_s6 = sld [smem:[%s6429_s0 + %s5609_s1]]  }
  0x16   :  { %6447 = sst [smem:[#allocation59_spill]] %s5723_s14 }
  0x17   :  { %s5748_s12 = sld [smem:[%s6429_s0 + %s5610_s7]]   ;;  %s5614_s7 = smov 18  }
  0x18   :  { %6448 = sst [smem:[#allocation60_spill]] %s5733_s24 }
  0x19   :  { %s5753_s20 = sld [smem:[%s6429_s0 + %s5611_s15]]   ;;  %s5615_s15 = smov 19  }
  0x1a   :  { %s5758_s27 = sld [smem:[%s6429_s0 + %s5612_s22]]   ;;  %s5616_s22 = smov 20  }
  0x1b   :  { %s5763_s4 = sld [smem:[%s6429_s0 + %s5613_s28]]   ;;  %s5617_s28 = smov 21  }
  0x1c   :  { %s5768_s25 = sld [smem:[%s6429_s0 + %s5614_s7]]   ;;  %s5618_s7 = smov 22  }
  0x1d   :  { %s5773_s29 = sld [smem:[%s6429_s0 + %s5615_s15]]   ;;  %s5619_s15 = smov 23  }
  0x1e   :  { %s5788_s24 = sld [smem:[%s6429_s0 + %s5618_s7]]   ;;  %s5622_s7 = smov 26  }
  0x1f   :  { %6449 = sst [smem:[#allocation61_spill]] %s5753_s20 }
  0x20   :  { %6450 = sst [smem:[#allocation62_spill]] %s5758_s27 }
  0x21   :  { %s5778_s20 = sld [smem:[%s6429_s0 + %s5616_s22]]   ;;  %s5620_s22 = smov 24  }
  0x22   :  { %s5783_s27 = sld [smem:[%s6429_s0 + %s5617_s28]]   ;;  %s5621_s28 = smov 25  }
  0x23   :  { %6451 = sst [smem:[#allocation63_spill]] %s5773_s29 }
  0x24   :  { %6454 = sst [smem:[#allocation66_spill]] %s5788_s24 }
  0x25   :  { %s5793_s29 = sld [smem:[%s6429_s0 + %s5619_s15]]   ;;  %s5623_s15 = smov 27  }
  0x26   :  { %s5808_s21 = sld [smem:[%s6429_s0 + %s5622_s7]]   ;;  %s5626_s7 = smov 30  }
  0x27   :  { %6452 = sst [smem:[#allocation64_spill]] %s5778_s20 }
  0x28   :  { %6453 = sst [smem:[#allocation65_spill]] %s5783_s27 }
  0x29   :  { %s5798_s20 = sld [smem:[%s6429_s0 + %s5620_s22]]   ;;  %s5624_s22 = smov 28  }
  0x2a   :  { %s5803_s27 = sld [smem:[%s6429_s0 + %s5621_s28]]   ;;  %s5625_s28 = smov 29  }
  0x2b   :  { %s5813_s9 = sld [smem:[%s6429_s0 + %s5623_s15]]   ;;  %s5627_s15 = smov 31  }
  0x2c   :  { %s5818_s14 = sld [smem:[%s6429_s0 + %s5624_s22]]   ;;  %s5628_s22 = smov 32  }
  0x2d   :  { %s5828_s17 = sld [smem:[%s6429_s0 + %s5626_s7]]   ;;  %s5630_s7 = smov 34  }
  0x2e   :  { %s5833_s13 = sld [smem:[%s6429_s0 + %s5627_s15]]   ;;  %s5631_s15 = smov 35  }
  0x2f   :  { %6455 = sst [smem:[#allocation67_spill]] %s5798_s20 }
  0x30   :  { %6456 = sst [smem:[#allocation68_spill]] %s5803_s27 }
  0x31   :  { %6457 = sst [smem:[#allocation69_spill]] %s5813_s9 }
  0x32   :  { %s5823_s27 = sld [smem:[%s6429_s0 + %s5625_s28]]   ;;  %s5629_s28 = smov 33  }
  0x33   :  { %6459 = sst [smem:[#allocation71_spill]] %s5828_s17 }
  0x34   :  { %6460 = sst [smem:[#allocation72_spill]] %s5833_s13 }
  0x35   :  { %s5838_s5 = sld [smem:[%s6429_s0 + %s5628_s22]]   ;;  %s5632_s22 = smov 36  }
  0x36   :  { %s5848_s17 = sld [smem:[%s6429_s0 + %s5630_s7]]   ;;  %s5634_s7 = smov 38  }
  0x37   :  { %s5853_s13 = sld [smem:[%s6429_s0 + %s5631_s15]]   ;;  %s5635_s15 = smov 39  }
  0x38   :  { %6458 = sst [smem:[#allocation70_spill]] %s5823_s27 }
  0x39   :  { %s5843_s27 = sld [smem:[%s6429_s0 + %s5629_s28]]   ;;  %s5633_s28 = smov 37  }
  0x3a   :  { %s5858_s9 = sld [smem:[%s6429_s0 + %s5632_s22]]   ;;  %s5636_s22 = smov 40  }
  0x3b   :  { %s5868_s20 = sld [smem:[%s6429_s0 + %s5634_s7]]  }
  0x3c   :  { %s5878_s24 = sld [smem:[%s6429_s0 + %s5636_s22]]  }
  0x3d   :  { %6462 = sst [smem:[#allocation74_spill]] %s5853_s13 }
  0x3e   :  { %s5873_s13 = sld [smem:[%s6429_s0 + %s5635_s15]]  }
  0x3f   :  { %6461 = sst [smem:[#allocation73_spill]] %s5843_s27 }
  0x40   :  { %s5863_s27 = sld [smem:[%s6429_s0 + %s5633_s28]]   ;;  %s5637_s28 = smov 41  }
  0x46   :  { %6463 = sst [smem:[#allocation75_spill]] %s5863_s27 }
  0x47   :  { %s5883_s27 = sld [smem:[%s6429_s0 + %s5637_s28]]  }
  0x48   :  { %88 = vsyncpa [#allocation3], 0 }
  0x49   :  { %89 = vsyncpa [#allocation6], 0 }
  0x4a   :  { %90 = vsyncpa [#allocation9], 0 }
  0x4b   :  { %91 = vsyncpa [#allocation12], 0 }
  0x4c   :  { %92 = vsyncpa [#allocation15], 0 }
  0x4d   :  { %93 = vsyncpa [#allocation18], 0 }
  0x4e   :  { %94 = vsyncpa [#allocation21], 0 }
  0x4f   :  { %95 = vsyncpa [#allocation24], 0 }
  0x50   :  { %96 = vsyncpa [#allocation27], 0 }
  0x51   :  { %97 = vsyncpa [#allocation30], 0 }
  0x52   :  { %98 = vsyncpa [#allocation33], 0 }
  0x53   :  { %99 = vsyncpa [#allocation36], 0 }
  0x54   :  { %100 = vsyncpa [#allocation4], 0  ;;  %s5638_s7 = smov [#allocation5]   ;;  %s5639_s11 = smov [#allocation8]  }
  0x55   :  { %s131_s10 = sshll.u32 %s5638_s7, 4  ;;  %s155_s15 = sshll.u32 %s5639_s11, 4  ;;  %s132_s10 = int_to_ptr.vmem [resolvable:$true] %s131_s10  ;;  %s156_s15 = int_to_ptr.vmem [resolvable:$true] %s155_s15 }
  0x56   :  { %s5099_s0 = scalar_lea.vmem %s132_s10, 16  ;;  %s5103_s16 = scalar_lea.vmem %s132_s10, 32 }
  0x57   :  { %p5100_p0 = scmp.ne.s32.totalorder %s132_s10, %s5099_s0  ;;  %p5104_p1 = scmp.lt.s32.totalorder %s132_s10, %s132_s10 }
  0x58   :  { %p5105_p2 = scmp.lt.s32.totalorder %s5103_s16, %s5099_s0 }
  0x5a   :  { %p5106_p3 = por %p5105_p2, %p5104_p1 }
  0x5c   :  { %p5107_p4 = pnand %p5106_p3, %p5100_p0 }
  0x5e   :  { %5110 = shalt.err (!%p5107_p4)
}
  0x5f   :  { %134 = dma.hbm_to_vmem [thread:$0]  %s5718_s8, 16, %s132_s10, [#allocation6]  }
  0x60   :  { %s5119_s18 = scalar_lea.vmem %s156_s15, 16  ;;  %s5123_s22 = scalar_lea.vmem %s156_s15, 32 }
  0x61   :  { %p5120_p5 = scmp.ne.s32.totalorder %s156_s15, %s5119_s18  ;;  %p5124_p6 = scmp.lt.s32.totalorder %s156_s15, %s156_s15 }
  0x62   :  { %p5125_p7 = scmp.lt.s32.totalorder %s5123_s22, %s5119_s18 }
  0x64   :  { %p5126_p8 = por %p5125_p7, %p5124_p6 }
  0x66   :  { %p5127_p9 = pnand %p5126_p8, %p5120_p5 }
  0x68   :  { %5130 = shalt.err (!%p5127_p9)
}
  0x69   :  { %158 = dma.hbm_to_vmem [thread:$0]  %s5738_s30, 16, %s156_s15, [#allocation9]  }
  0x6a   :  { %s5640_s23 = smov [#allocation11]   ;;  %s5641_s28 = smov [#allocation14]  }
  0x6b   :  { %s175_s26 = sshll.u32 %s5640_s23, 4  ;;  %s199_s1 = sshll.u32 %s5641_s28, 4  ;;  %s176_s26 = int_to_ptr.vmem [resolvable:$true] %s175_s26  ;;  %s200_s1 = int_to_ptr.vmem [resolvable:$true] %s199_s1 }
  0x6c   :  { %s5139_s2 = scalar_lea.vmem %s176_s26, 16  ;;  %s5143_s7 = scalar_lea.vmem %s176_s26, 32 }
  0x6d   :  { %p5140_p10 = scmp.ne.s32.totalorder %s176_s26, %s5139_s2  ;;  %p5144_p11 = scmp.lt.s32.totalorder %s176_s26, %s176_s26 }
  0x6e   :  { %p5145_p12 = scmp.lt.s32.totalorder %s5143_s7, %s5139_s2 }
  0x70   :  { %p5146_p13 = por %p5145_p12, %p5144_p11 }
  0x72   :  { %p5147_p0 = pnand %p5146_p13, %p5140_p10 }
  0x74   :  { %5150 = shalt.err (!%p5147_p0)
}
  0x75   :  { %178 = dma.hbm_to_vmem [thread:$0]  %s5748_s12, 16, %s176_s26, [#allocation12]  }
  0x76   :  { %s5159_s8 = scalar_lea.vmem %s200_s1, 16  ;;  %s5163_s10 = scalar_lea.vmem %s200_s1, 32 }
  0x77   :  { %p5160_p1 = scmp.ne.s32.totalorder %s200_s1, %s5159_s8  ;;  %p5164_p2 = scmp.lt.s32.totalorder %s200_s1, %s200_s1 }
  0x78   :  { %p5165_p3 = scmp.lt.s32.totalorder %s5163_s10, %s5159_s8 }
  0x7a   :  { %p5166_p4 = por %p5165_p3, %p5164_p2 }
  0x7c   :  { %p5167_p5 = pnand %p5166_p4, %p5160_p1 }
  0x7e   :  { %5170 = shalt.err (!%p5167_p5)
}
  0x7f   :  { %202 = dma.hbm_to_vmem [thread:$0]  %s5768_s25, 16, %s200_s1, [#allocation15]  }
  0x80   :  { %s5642_s30 = smov [#allocation17]   ;;  %s5643_s15 = smov [#allocation20]  }
  0x81   :  { %s225_s11 = sshll.u32 %s5642_s30, 4  ;;  %s246_s0 = sshll.u32 %s5643_s15, 4  ;;  %s226_s11 = int_to_ptr.vmem [resolvable:$true] %s225_s11  ;;  %s247_s0 = int_to_ptr.vmem [resolvable:$true] %s246_s0 }
  0x82   :  { %s5179_s16 = scalar_lea.vmem %s226_s11, 16  ;;  %s5183_s18 = scalar_lea.vmem %s226_s11, 32 }
  0x83   :  { %p5180_p6 = scmp.ne.s32.totalorder %s226_s11, %s5179_s16  ;;  %p5184_p7 = scmp.lt.s32.totalorder %s226_s11, %s226_s11 }
  0x84   :  { %p5185_p8 = scmp.lt.s32.totalorder %s5183_s18, %s5179_s16 }
  0x86   :  { %p5186_p9 = por %p5185_p8, %p5184_p7 }
  0x88   :  { %p5187_p10 = pnand %p5186_p9, %p5180_p6 }
  0x8a   :  { %5190 = shalt.err (!%p5187_p10)
}
  0x8b   :  { %228 = dma.hbm_to_vmem [thread:$0]  %s5793_s29, 16, %s226_s11, [#allocation18]  }
  0x8c   :  { %s5199_s12 = scalar_lea.vmem %s247_s0, 512  ;;  %p5204_p12 = scmp.lt.s32.totalorder %s247_s0, %s247_s0 }
  0x8d   :  { %p5200_p11 = scmp.ne.s32.totalorder %s247_s0, %s5199_s12  ;;  %p5205_p13 = scmp.lt.s32.totalorder %s5199_s12, %s5199_s12 }
  0x8f   :  { %p5206_p0 = por %p5205_p13, %p5204_p12 }
  0x91   :  { %p5207_p1 = pnand %p5206_p0, %p5200_p11 }
  0x93   :  { %5210 = shalt.err (!%p5207_p1)
}
  0x94   :  { %s5644_s25 = smov 128   ;;  %s5645_s22 = smov 8  }
  0x95   :  { %252 = dma.hbm_to_vmem [thread:$0]  %s5808_s21, 512, %s247_s0, [#allocation21], %s5644_s25, %s5644_s25, %s5645_s22  }
  0x96   :  { %s5646_s23 = smov [#allocation23]   ;;  %s5647_s28 = smov [#allocation26]  }
  0x97   :  { %s269_s26 = sshll.u32 %s5646_s23, 4  ;;  %s295_s1 = sshll.u32 %s5647_s28, 4  ;;  %s270_s26 = int_to_ptr.vmem [resolvable:$true] %s269_s26  ;;  %s296_s1 = int_to_ptr.vmem [resolvable:$true] %s295_s1 }
  0x98   :  { %s5219_s29 = scalar_lea.vmem %s270_s26, 16  ;;  %s5223_s2 = scalar_lea.vmem %s270_s26, 32 }
  0x99   :  { %p5220_p2 = scmp.ne.s32.totalorder %s270_s26, %s5219_s29  ;;  %p5224_p3 = scmp.lt.s32.totalorder %s270_s26, %s270_s26 }
  0x9a   :  { %p5225_p4 = scmp.lt.s32.totalorder %s5223_s2, %s5219_s29 }
  0x9c   :  { %p5226_p5 = por %p5225_p4, %p5224_p3 }
  0x9e   :  { %p5227_p6 = pnand %p5226_p5, %p5220_p2 }
  0xa0   :  { %5230 = shalt.err (!%p5227_p6)
}
  0xa1   :  { %272 = dma.hbm_to_vmem [thread:$0]  %s5818_s14, 16, %s270_s26, [#allocation24]  }
  0xa2   :  { %s5239_s7 = scalar_lea.vmem %s296_s1, 16  ;;  %s5243_s8 = scalar_lea.vmem %s296_s1, 32 }
  0xa3   :  { %p5240_p7 = scmp.ne.s32.totalorder %s296_s1, %s5239_s7  ;;  %p5244_p8 = scmp.lt.s32.totalorder %s296_s1, %s296_s1 }
  0xa4   :  { %p5245_p9 = scmp.lt.s32.totalorder %s5243_s8, %s5239_s7 }
  0xa6   :  { %p5246_p10 = por %p5245_p9, %p5244_p8 }
  0xa8   :  { %p5247_p11 = pnand %p5246_p10, %p5240_p7 }
  0xaa   :  { %5250 = shalt.err (!%p5247_p11)
}
  0xab   :  { %298 = dma.hbm_to_vmem [thread:$0]  %s5838_s5, 16, %s296_s1, [#allocation27]  }
  0xac   :  { %s5648_s21 = smov [#allocation29]   ;;  %s5649_s30 = smov [#allocation32]  }
  0xad   :  { %s315_s10 = sshll.u32 %s5648_s21, 4  ;;  %s336_s11 = sshll.u32 %s5649_s30, 4  ;;  %s316_s10 = int_to_ptr.vmem [resolvable:$true] %s315_s10  ;;  %s337_s11 = int_to_ptr.vmem [resolvable:$true] %s336_s11 }
  0xae   :  { %s5259_s15 = scalar_lea.vmem %s316_s10, 16  ;;  %s5263_s0 = scalar_lea.vmem %s316_s10, 32 }
  0xaf   :  { %p5260_p12 = scmp.ne.s32.totalorder %s316_s10, %s5259_s15  ;;  %p5264_p13 = scmp.lt.s32.totalorder %s316_s10, %s316_s10 }
  0xb0   :  { %p5265_p0 = scmp.lt.s32.totalorder %s5263_s0, %s5259_s15 }
  0xb2   :  { %p5266_p1 = por %p5265_p0, %p5264_p13 }
  0xb4   :  { %p5267_p2 = pnand %p5266_p1, %p5260_p12 }
  0xb6   :  { %5270 = shalt.err (!%p5267_p2)
}
  0xb7   :  { %318 = dma.hbm_to_vmem [thread:$0]  %s5848_s17, 16, %s316_s10, [#allocation30]  }
  0xb8   :  { %s5279_s14 = scalar_lea.vmem %s337_s11, 512  ;;  %p5284_p4 = scmp.lt.s32.totalorder %s337_s11, %s337_s11 }
  0xb9   :  { %p5280_p3 = scmp.ne.s32.totalorder %s337_s11, %s5279_s14  ;;  %p5285_p5 = scmp.lt.s32.totalorder %s5279_s14, %s5279_s14 }
  0xbb   :  { %p5286_p6 = por %p5285_p5, %p5284_p4 }
  0xbd   :  { %p5287_p7 = pnand %p5286_p6, %p5280_p3 }
  0xbf   :  { %5290 = shalt.err (!%p5287_p7)
}
  0xc0   :  { %342 = dma.hbm_to_vmem [thread:$0]  %s5858_s9, 512, %s337_s11, [#allocation33], %s5644_s25, %s5644_s25, %s5645_s22  }
  0xc1   :  { %s5650_s5 = smov [#allocation35]   ;;  %s5651_s18 = smov [#allocation2]  }
  0xc2   :  { %s359_s16 = sshll.u32 %s5650_s5, 4  ;;  %s121_s12 = sshll.u32 %s5651_s18, 4  ;;  %s360_s16 = int_to_ptr.vmem [resolvable:$true] %s359_s16  ;;  %s122_s12 = int_to_ptr.vmem [resolvable:$true] %s121_s12 }
  0xc3   :  { %s5299_s23 = scalar_lea.vmem %s360_s16, 16  ;;  %s5303_s17 = scalar_lea.vmem %s360_s16, 32 }
  0xc4   :  { %p5300_p8 = scmp.ne.s32.totalorder %s360_s16, %s5299_s23  ;;  %p5304_p9 = scmp.lt.s32.totalorder %s360_s16, %s360_s16 }
  0xc5   :  { %p5305_p10 = scmp.lt.s32.totalorder %s5303_s17, %s5299_s23 }
  0xc7   :  { %p5306_p11 = por %p5305_p10, %p5304_p9 }
  0xc9   :  { %p5307_p12 = pnand %p5306_p11, %p5300_p8 }
  0xcb   :  { %5310 = shalt.err (!%p5307_p12)
}
  0xcc   :  { %362 = dma.hbm_to_vmem [thread:$0]  %s5868_s20, 16, %s360_s16, [#allocation36]  }
  0xcd   :  { %s5319_s26 = scalar_lea.vmem %s122_s12, 128  ;;  %p5324_p0 = scmp.lt.s32.totalorder %s122_s12, %s122_s12 }
  0xce   :  { %p5320_p13 = scmp.ne.s32.totalorder %s122_s12, %s5319_s26  ;;  %p5325_p1 = scmp.lt.s32.totalorder %s5319_s26, %s5319_s26 }
  0xd0   :  { %p5326_p2 = por %p5325_p1, %p5324_p0 }
  0xd2   :  { %p5327_p3 = pnand %p5326_p2, %p5320_p13 }
  0xd4   :  { %5330 = shalt.err (!%p5327_p3)
}
  0xd5   :  { %124 = dma.hbm_to_vmem [thread:$0]  %s5713_s3, 128, %s122_s12, [#allocation3]  }
  0xd6   :  { %s5652_s9 = smov [#allocation7]   ;;  %s5653_s1 = smov [#allocation10]  }
  0xd7   :  { %s143_s28 = sshll.u32 %s5652_s9, 4  ;;  %s165_s29 = sshll.u32 %s5653_s1, 4  ;;  %s144_s28 = int_to_ptr.vmem [resolvable:$true] %s143_s28  ;;  %s166_s29 = int_to_ptr.vmem [resolvable:$true] %s165_s29 }
  0xd8   :  { %s5339_s2 = scalar_lea.vmem %s144_s28, 128  ;;  %p5344_p5 = scmp.lt.s32.totalorder %s144_s28, %s144_s28 }
  0xd9   :  { %p5340_p4 = scmp.ne.s32.totalorder %s144_s28, %s5339_s2  ;;  %p5345_p6 = scmp.lt.s32.totalorder %s5339_s2, %s5339_s2 }
  0xdb   :  { %p5346_p7 = por %p5345_p6, %p5344_p5 }
  0xdd   :  { %p5347_p8 = pnand %p5346_p7, %p5340_p4 }
  0xdf   :  { %5350 = shalt.err (!%p5347_p8)
}
  0xe0   :  { %146 = dma.hbm_to_vmem [thread:$0]  %s5728_s19, 128, %s144_s28, [#allocation6]  }
  0xe1   :  { %s5359_s20 = scalar_lea.vmem %s166_s29, 16  ;;  %s5363_s7 = scalar_lea.vmem %s166_s29, 32 }
  0xe2   :  { %p5360_p9 = scmp.ne.s32.totalorder %s166_s29, %s5359_s20  ;;  %p5364_p10 = scmp.lt.s32.totalorder %s166_s29, %s166_s29 }
  0xe3   :  { %p5365_p11 = scmp.lt.s32.totalorder %s5363_s7, %s5359_s20 }
  0xe5   :  { %p5366_p12 = por %p5365_p11, %p5364_p10 }
  0xe7   :  { %p5367_p13 = pnand %p5366_p12, %p5360_p9 }
  0xe9   :  { %5370 = shalt.err (!%p5367_p13)
}
  0xea   :  { %168 = dma.hbm_to_vmem [thread:$0]  %s5743_s6, 16, %s166_s29, [#allocation9]  }
  0xeb   :  { %s5654_s3 = smov [#allocation13]   ;;  %s5655_s21 = smov [#allocation16]  }
  0xec   :  { %s189_s8 = sshll.u32 %s5654_s3, 4  ;;  %s215_s10 = sshll.u32 %s5655_s21, 4  ;;  %s190_s8 = int_to_ptr.vmem [resolvable:$true] %s189_s8  ;;  %s216_s10 = int_to_ptr.vmem [resolvable:$true] %s215_s10 }
  0xed   :  { %s5379_s30 = scalar_lea.vmem %s190_s8, 16  ;;  %s5383_s11 = scalar_lea.vmem %s190_s8, 32 }
  0xee   :  { %p5380_p0 = scmp.ne.s32.totalorder %s190_s8, %s5379_s30  ;;  %p5384_p1 = scmp.lt.s32.totalorder %s190_s8, %s190_s8 }
  0xef   :  { %p5385_p2 = scmp.lt.s32.totalorder %s5383_s11, %s5379_s30 }
  0xf1   :  { %p5386_p3 = por %p5385_p2, %p5384_p1 }
  0xf3   :  { %p5387_p4 = pnand %p5386_p3, %p5380_p0 }
  0xf5   :  { %5390 = shalt.err (!%p5387_p4)
}
  0xf6   :  { %192 = dma.hbm_to_vmem [thread:$0]  %s5763_s4, 16, %s190_s8, [#allocation12]  }
  0xf7   :  { %s5399_s19 = scalar_lea.vmem %s216_s10, 16  ;;  %s5403_s15 = scalar_lea.vmem %s216_s10, 32 }
  0xf8   :  { %p5400_p5 = scmp.ne.s32.totalorder %s216_s10, %s5399_s19  ;;  %p5404_p6 = scmp.lt.s32.totalorder %s216_s10, %s216_s10 }
  0xf9   :  { %p5405_p7 = scmp.lt.s32.totalorder %s5403_s15, %s5399_s19 }
  0xfb   :  { %p5406_p8 = por %p5405_p7, %p5404_p6 }
  0xfd   :  { %p5407_p9 = pnand %p5406_p8, %p5400_p5 }
  0xff   :  { %5410 = shalt.err (!%p5407_p9)
}
 0x100   :  { %s6464_s6 = sld [smem:[#allocation66_spill]]  ;;  %s5656_s0 = smov [#allocation19]  }
 0x101   :  { %s235_s14 = sshll.u32 %s5656_s0, 4  ;;  %s5657_s5 = smov [#allocation22]   ;;  %s236_s14 = int_to_ptr.vmem [resolvable:$true] %s235_s14 }
 0x102   :  { %s259_s16 = sshll.u32 %s5657_s5, 4  ;;  %s5419_s18 = scalar_lea.vmem %s236_s14, 16  ;;  %s260_s16 = int_to_ptr.vmem [resolvable:$true] %s259_s16 }
 0x103   :  { %p5420_p10 = scmp.ne.s32.totalorder %s236_s14, %s5419_s18  ;;  %s5423_s12 = scalar_lea.vmem %s236_s14, 32 }
 0x104   :  { %p5424_p11 = scmp.lt.s32.totalorder %s236_s14, %s236_s14  ;;  %p5425_p12 = scmp.lt.s32.totalorder %s5423_s12, %s5419_s18 }
 0x106   :  { %218 = dma.hbm_to_vmem [thread:$0]  %s6464_s6, 16, %s216_s10, [#allocation15]  }
 0x107   :  { %p5426_p13 = por %p5425_p12, %p5424_p11 }
 0x109   :  { %p5427_p0 = pnand %p5426_p13, %p5420_p10 }
 0x10b   :  { %5430 = shalt.err (!%p5427_p0)
}
 0x10c   :  { %s6465_s4 = sld [smem:[#allocation67_spill]]  ;;  %s5439_s23 = scalar_lea.vmem %s260_s16, 16 }
 0x10d   :  { %p5440_p1 = scmp.ne.s32.totalorder %s260_s16, %s5439_s23  ;;  %s5443_s17 = scalar_lea.vmem %s260_s16, 32 }
 0x10e   :  { %p5444_p2 = scmp.lt.s32.totalorder %s260_s16, %s260_s16  ;;  %p5445_p3 = scmp.lt.s32.totalorder %s5443_s17, %s5439_s23 }
 0x110   :  { %p5446_p4 = por %p5445_p3, %p5444_p2 }
 0x112   :  { %238 = dma.hbm_to_vmem [thread:$0]  %s6465_s4, 16, %s236_s14, [#allocation18]  }
 0x113   :  { %p5447_p5 = pnand %p5446_p4, %p5440_p1 }
 0x115   :  { %5450 = shalt.err (!%p5447_p5)
}
 0x116   :  { %s6466_s26 = sld [smem:[#allocation69_spill]]  ;;  %s5658_s9 = smov [#allocation25]  }
 0x117   :  { %s282_s28 = sshll.u32 %s5658_s9, 4  ;;  %s5659_s1 = smov [#allocation28]   ;;  %s283_s28 = int_to_ptr.vmem [resolvable:$true] %s282_s28 }
 0x118   :  { %s305_s29 = sshll.u32 %s5659_s1, 4  ;;  %s5459_s2 = scalar_lea.vmem %s283_s28, 512  ;;  %s306_s29 = int_to_ptr.vmem [resolvable:$true] %s305_s29 }
 0x119   :  { %p5460_p6 = scmp.ne.s32.totalorder %s283_s28, %s5459_s2  ;;  %p5464_p7 = scmp.lt.s32.totalorder %s283_s28, %s283_s28 }
 0x11a   :  { %p5465_p8 = scmp.lt.s32.totalorder %s5459_s2, %s5459_s2 }
 0x11c   :  { %262 = dma.hbm_to_vmem [thread:$0]  %s6466_s26, 16, %s260_s16, [#allocation21]  }
 0x11d   :  { %p5466_p9 = por %p5465_p8, %p5464_p7 }
 0x11f   :  { %p5467_p10 = pnand %p5466_p9, %p5460_p6 }
 0x121   :  { %5470 = shalt.err (!%p5467_p10)
}
 0x122   :  { %s6467_s20 = sld [smem:[#allocation72_spill]]  ;;  %s5479_s7 = scalar_lea.vmem %s306_s29, 16 }
 0x123   :  { %p5480_p11 = scmp.ne.s32.totalorder %s306_s29, %s5479_s7  ;;  %s5483_s3 = scalar_lea.vmem %s306_s29, 32 }
 0x124   :  { %p5484_p12 = scmp.lt.s32.totalorder %s306_s29, %s306_s29  ;;  %p5485_p13 = scmp.lt.s32.totalorder %s5483_s3, %s5479_s7 }
 0x126   :  { %p5486_p0 = por %p5485_p13, %p5484_p12 }
 0x128   :  { %288 = dma.hbm_to_vmem [thread:$0]  %s6467_s20, 512, %s283_s28, [#allocation24], %s5644_s25, %s5644_s25, %s5645_s22  }
 0x129   :  { %p5487_p1 = pnand %p5486_p0, %p5480_p11 }
 0x12b   :  { %5490 = shalt.err (!%p5487_p1)
}
 0x12c   :  { %s6468_s8 = sld [smem:[#allocation73_spill]]  ;;  %s5660_s21 = smov [#allocation31]  }
 0x12d   :  { %s324_s10 = sshll.u32 %s5660_s21, 4  ;;  %s5661_s30 = smov [#allocation34]   ;;  %s325_s10 = int_to_ptr.vmem [resolvable:$true] %s324_s10 }
 0x12e   :  { %s349_s11 = sshll.u32 %s5661_s30, 4  ;;  %s5499_s19 = scalar_lea.vmem %s325_s10, 512  ;;  %s350_s11 = int_to_ptr.vmem [resolvable:$true] %s349_s11 }
 0x12f   :  { %p5500_p2 = scmp.ne.s32.totalorder %s325_s10, %s5499_s19  ;;  %p5504_p3 = scmp.lt.s32.totalorder %s325_s10, %s325_s10 }
 0x130   :  { %p5505_p4 = scmp.lt.s32.totalorder %s5499_s19, %s5499_s19 }
 0x132   :  { %308 = dma.hbm_to_vmem [thread:$0]  %s6468_s8, 16, %s306_s29, [#allocation27]  }
 0x133   :  { %p5506_p5 = por %p5505_p4, %p5504_p3 }
 0x135   :  { %p5507_p6 = pnand %p5506_p5, %p5500_p2 }
 0x137   :  { %5510 = shalt.err (!%p5507_p6)
}
 0x138   :  { %s6469_s15 = sld [smem:[#allocation74_spill]]  ;;  %s5519_s6 = scalar_lea.vmem %s350_s11, 16 }
 0x139   :  { %p5520_p7 = scmp.ne.s32.totalorder %s350_s11, %s5519_s6  ;;  %s5523_s0 = scalar_lea.vmem %s350_s11, 32 }
 0x13a   :  { %p5524_p8 = scmp.lt.s32.totalorder %s350_s11, %s350_s11  ;;  %p5525_p9 = scmp.lt.s32.totalorder %s5523_s0, %s5519_s6 }
 0x13c   :  { %p5526_p10 = por %p5525_p9, %p5524_p8 }
 0x13e   :  { %330 = dma.hbm_to_vmem [thread:$0]  %s6469_s15, 512, %s325_s10, [#allocation30], %s5644_s25, %s5644_s25, %s5645_s22  }
 0x13f   :  { %p5527_p11 = pnand %p5526_p10, %p5520_p7 }
 0x141   :  { %5530 = shalt.err (!%p5527_p11)
}
 0x142   :  { %s6470_s14 = sld [smem:[#allocation75_spill]]  ;;  %s5662_s5 = smov [#allocation37]  }
 0x143   :  { %s371_s16 = sshll.u32 %s5662_s5, 4  ;;  %s372_s16 = int_to_ptr.vmem [resolvable:$true] %s371_s16 }
 0x144   :  { %s5539_s18 = scalar_lea.vmem %s372_s16, 16  ;;  %s5543_s12 = scalar_lea.vmem %s372_s16, 32 }
 0x145   :  { %p5540_p12 = scmp.ne.s32.totalorder %s372_s16, %s5539_s18  ;;  %p5544_p13 = scmp.lt.s32.totalorder %s372_s16, %s372_s16 }
 0x146   :  { %p5545_p0 = scmp.lt.s32.totalorder %s5543_s12, %s5539_s18 }
 0x148   :  { %352 = dma.hbm_to_vmem [thread:$0]  %s6470_s14, 16, %s350_s11, [#allocation33]  }
 0x149   :  { %p5546_p1 = por %p5545_p0, %p5544_p13 }
 0x14b   :  { %p5547_p2 = pnand %p5546_p1, %p5540_p12 }
 0x14d   :  { %5550 = shalt.err (!%p5547_p2)
}
 0x14e   :  { %374 = dma.hbm_to_vmem [thread:$0]  %s5878_s24, 16, %s372_s16, [#allocation36]  }
 0x14f   :  { %5571 = dma.done.wait [#allocation3], 128  }
 0x150   :  { %5572 = vsyncadd [#allocation3], 4294967168 }
 0x151   :  { %5573 = dma.done.wait [#allocation6], 144  }
 0x152   :  { %5574 = vsyncadd [#allocation6], 4294967152 }
 0x153   :  { %5575 = dma.done.wait [#allocation9], 32  }
 0x154   :  { %5576 = vsyncadd [#allocation9], 4294967264 }
 0x155   :  { %5577 = dma.done.wait [#allocation12], 32  }
 0x156   :  { %5578 = vsyncadd [#allocation12], 4294967264 }
 0x157   :  { %5579 = dma.done.wait [#allocation15], 32  }
 0x158   :  { %5580 = vsyncadd [#allocation15], 4294967264 }
 0x159   :  { %5581 = dma.done.wait [#allocation18], 32  }
 0x15a   :  { %5582 = vsyncadd [#allocation18], 4294967264 }
 0x15b   :  { %5583 = dma.done.wait [#allocation21], 528  }
 0x15c   :  { %5584 = vsyncadd [#allocation21], 4294966768 }
 0x15d   :  { %5585 = dma.done.wait [#allocation24], 528  }
 0x15e   :  { %5586 = vsyncadd [#allocation24], 4294966768 }
 0x15f   :  { %5587 = dma.done.wait [#allocation27], 32  }
 0x160   :  { %5588 = vsyncadd [#allocation27], 4294967264 }
 0x161   :  { %5589 = dma.done.wait [#allocation30], 528  }
 0x162   :  { %5590 = vsyncadd [#allocation30], 4294966768 }
 0x163   :  { %5591 = dma.done.wait [#allocation33], 528  }
 0x164   :  { %5592 = vsyncadd [#allocation33], 4294966768 }
 0x165   :  { %5593 = dma.done.wait [#allocation36], 32  }
 0x166   :  { %5594 = vsyncadd [#allocation36], 4294967264  ;;  %s6471_s24 = sld [smem:[#allocation52_spill]]  ;;  %vm484_vm0 = vcmask 64512   ;;  %v476_v0 = vld [vmem:[#allocation2] sm:$0xff]  ;;  %vm580_vm1 = vcmask 130048  }
 0x167   :  { %s6472_s25 = sld [smem:[#allocation54_spill]]  ;;  %4531 = vmatprep.subr.mxu0 %v476_v0  ;;  %v4213_v7 = vld [vmem:[#allocation5] ss:$0 sm:$0xff]  ;;  %v572_v24 = vld [vmem:[#allocation7] sm:$0x3f]  ;;  %vm788_vm2 = vcmask 1045504  }
 0x168   :  { %4532 = vmatpush3.msra.mxu0 %v476_v0  ;;  %s6473_s22 = sld [smem:[#allocation55_spill]]  ;;  %vm775_vm3 = vcmask 48128   ;;  %vm877_vm4 = vcmask 261120   ;;  %v4234_v34 = vld [vmem:[#allocation10] ss:$0 sm:$0xff]  ;;  %s5664_s28 = smov 32  }
 0x169   :  { %s6474_s4 = sld [smem:[#allocation59_spill]]  ;;  %v4233_v56 = vld [vmem:[#allocation8] ss:$0 sm:$0xff]  ;;  %s5665_s2 = smov 64   ;;  %vm5668_vm9 = vmmov 0   ;;  %vm2925_vm10 = vcmask 254976  }
 0x16a   :  { %s6475_s23 = sld [smem:[#allocation53_spill]]  ;;  %s5666_s20 = smov 96   ;;  %vm2929_vm11 = vcmask 15360   ;;  %vm2936_vm12 = vcmask 1041408   ;;  %vm3023_vm15 = vcmask 7168  }
 0x16b   :  { %s6476_s17 = sld [smem:[#allocation56_spill]]  ;;  %s5669_s14 = smov [#allocation38]  }
 0x16c   :  { %v444_v1 = vld [vmem:[%s6471_s24] sm:$0xff]  ;;  %v445_v2 = vld [vmem:[%s6471_s24 + $0x8] sm:$0xff]  ;;  %s6477_s9 = sld [smem:[#allocation60_spill]] }
 0x16d   :  { %4533 = vmatprep.mubr.msk.f32.mxu0 %vm484_vm0, %v444_v1  ;;  %v5923_v3 = vld [vmem:[%s6472_s25] sm:$0xff]   ;;  %v5927_v5 = vld [vmem:[%s6472_s25 + $0x8] sm:$0xff]   ;;  %s6478_s1 = sld [smem:[#allocation62_spill]] }
 0x16e   :  { %4534 = vmatmul.mubr.msk.f32.vlgmr.msra.gmra.mxu0 %vm484_vm0, %v445_v2  ;;  %v4325_v4 = vunpack.c.l.bf16 %v5923_v3  ;;  %v4329_v6 = vunpack.c.l.bf16 %v5927_v5  ;;  %v4332_v13 = vld [vmem:[%s6473_s22] sm:$0xff]   ;;  %v4326_v14 = vunpack.c.h.bf16 %v5923_v3  ;;  %v4330_v16 = vunpack.c.h.bf16 %v5927_v5  ;;  %v4348_v18 = vld [vmem:[%s6473_s22 + $0x8] sm:$0xff]   ;;  %s6479_s29 = sld [smem:[#allocation61_spill]]  ;;  %v4268_v3 = vld [vmem:[#allocation16] ss:$0 sm:$0xff] }
 0x16f   :  { %v5949_v17 = vunpack.c.l.bf16 %v4332_v13  ;;  %v5958_v19 = vunpack.c.h.bf16 %v4332_v13  ;;  %v571_v20 = vld [vmem:[%s6474_s4 + $0x18] sm:$0xff]  ;;  %v5965_v21 = vunpack.c.l.bf16 %v4348_v18  ;;  %v570_v22 = vld [vmem:[%s6474_s4 + $0x10] sm:$0xff]  ;;  %v5974_v23 = vunpack.c.h.bf16 %v4348_v18  ;;  %v569_v25 = vld [vmem:[%s6474_s4 + $0x8] sm:$0xff]  ;;  %s6480_s7 = sld [smem:[#allocation64_spill]] }
 0x170   :  { %4540 = vmatprep.mubr.msk.f32.mxu0 %vm580_vm1, %v4325_v4  ;;  %4543 = vmatprep.mubr.msk.f32.mxu1 %vm580_vm1, %v4329_v6  ;;  %v446_v26 = vld [vmem:[%s6475_s23] sm:$0xff]  ;;  %v447_v27 = vld [vmem:[%s6475_s23 + $0x8] sm:$0xff]  ;;  %v448_v29 = vld [vmem:[%s6475_s23 + $0x10] sm:$0xff]  ;;  %s6481_s3 = sld [smem:[#allocation63_spill]] }
 0x171   :  { %v568_v28 = vld [vmem:[%s6474_s4] sm:$0xff]  ;;  %v449_v30 = vld [vmem:[%s6475_s23 + $0x18] sm:$0xff]  ;;  %s6482_s8 = sld [smem:[#allocation65_spill]] }
 0x172   :  { %v4340_v18 = vld [vmem:[%s6476_s17] sm:$0xff]   ;;  %s6483_s10 = sld [smem:[#allocation68_spill]] }
 0x173   :  { %s6484_s30 = sld [smem:[#allocation71_spill]] }
 0x174   :  { %s6485_s11 = sld [smem:[#allocation70_spill]] }
 0x175   :  { %s6486_s19 = sld [smem:[#allocation58_spill]] }
 0x176   :  { %s6487_s15 = sld [smem:[#allocation57_spill]] }
 0x22e   :  { %v4535_v8 = vpop.f32.mrf.mxu0 }
 0x22f   :  { %v563_v9 = vadd.f32 %v4535_v8, %v4213_v7 }
 0x230   :  { %v557_v10 = vpop.f32.mrf.mxu0 }
 0x231   :  { %4961 = vtanh.f32 %v563_v9  ;;  %v558_v11 = vadd.f32 %v4213_v7, %v557_v10 }
 0x233   :  { %4963 = vtanh.f32 %v558_v11 }
 0x23e   :  { %v5936_v12 = vpop.eup %4961 }
 0x23f   :  { %4536 = vmatprep.subr.mxu0 %v5936_v12  ;;  %4874 = vmatprep.subr.mxu1 %v5936_v12 }
 0x240   :  { %v5942_v15 = vpop.eup %4963  ;;  %4537 = vmatpush3.msra.mxu0 %v5936_v12  ;;  %4876 = vmatpush3.msra.mxu1 %v5936_v12 }
 0x241   :  { %4538 = vmatprep.subr.mxu0 %v5942_v15  ;;  %4875 = vmatprep.subr.mxu1 %v5942_v15 }
 0x242   :  { %4539 = vmatpush3.msra.mxu0 %v5942_v15  ;;  %4877 = vmatpush3.msra.mxu1 %v5942_v15 }
 0x243   :  { %4541 = vmatmul.mubr.msk.f32.vlgmr.msra.gmra.mxu0 %vm580_vm1, %v4326_v14  ;;  %4546 = vmatprep.subr.mxu0 %v5936_v12 }
 0x244   :  { %4547 = vmatpush3.msra.mxu0 %v5936_v12  ;;  %4544 = vmatmul.mubr.msk.f32.vlgmr.msra.gmra.mxu1 %vm580_vm1, %v4330_v16 }
 0x245   :  { %4548 = vmatprep.subr.mxu0 %v5942_v15  ;;  %4550 = vmatprep.mubr.msk.f32.mxu0 %vm580_vm1, %v5949_v17 }
 0x246   :  { %4549 = vmatpush3.msra.mxu0 %v5942_v15  ;;  %4556 = vmatprep.subr.msk.mxu1 %vm788_vm2, %v572_v24 }
 0x247   :  { %4551 = vmatmul.mubr.msk.f32.vlgmr.msra.gmra.mxu0 %vm580_vm1, %v5958_v19  ;;  %4564 = vmatprep.subr.mxu0 %v571_v20 }
 0x248   :  { %4553 = vmatprep.mubr.msk.f32.mxu0 %vm580_vm1, %v5965_v21  ;;  %4565 = vmatpush3.msra.mxu0 %v571_v20  ;;  %v6013_v20 = vunpack.c.l.bf16 %v4340_v18 }
 0x249   :  { %4566 = vmatprep.subr.mxu0 %v570_v22  ;;  %4557 = vmatpush3.msk.msra.mxu1 %vm788_vm2, %v572_v24 }
 0x24a   :  { %4567 = vmatpush3.msra.mxu0 %v570_v22  ;;  %4558 = vmatprep.mubr.msk.f32.mxu1 %vm775_vm3, %v446_v26 }
 0x24b   :  { %4554 = vmatmul.mubr.msk.f32.gmra.mxu0 %vm580_vm1, %v5974_v23  ;;  %4568 = vmatprep.subr.mxu0 %v569_v25 }
 0x24c   :  { %4569 = vmatpush3.msra.mxu0 %v569_v25  ;;  %4559 = vmatmul.mubr.msk.f32.vlgmr.msra.gmra.mxu1 %vm775_vm3, %v447_v27 }
 0x24d   :  { %4570 = vmatprep.subr.mxu0 %v568_v28  ;;  %4561 = vmatprep.mubr.msk.f32.mxu1 %vm775_vm3, %v448_v29 }
 0x24e   :  { %4571 = vmatpush3.msra.mxu0 %v568_v28 }
 0x250   :  { %4562 = vmatmul.mubr.msk.f32.gmra.mxu1 %vm775_vm3, %v449_v30 }
 0x251   :  { %4586 = vmatprep.mubr.msk.f32.mxu1 %vm877_vm4, %v6013_v20 }
 0x303   :  { %v4542_v31 = vpop.f32.mrf.mxu0 }
 0x304   :  { %v4545_v32 = vpop.f32.mrf.mxu1 }
 0x305   :  { %v659_v33 = vpop.f32.mrf.mxu0 }
 0x306   :  { %4572 = vmatprep.mubr.msk.f32.mxu0 %vm877_vm4, %v659_v33  ;;  %v669_v35 = vpop.f32.mrf.mxu1 }
 0x307   :  { %4573 = vmatmul.mubr.msk.f32.vlgmr.msra.gmra.mxu0 %vm877_vm4, %v4542_v31  ;;  %v4552_v36 = vpop.f32.mrf.mxu0 }
 0x308   :  { %4575 = vmatprep.mubr.msk.f32.mxu0 %vm877_vm4, %v669_v35  ;;  %v1008_v37 = vmul.f32 %v4552_v36, %v4234_v34 }
 0x309   :  { %v756_v38 = vpop.f32.mrf.mxu0 }
 0x30a   :  { %v1007_v39 = vmul.f32 %v4234_v34, %v756_v38  ;;  %v1014_v40 = vsel %vm877_vm4, %v1008_v37, 0.0 }
 0x30b   :  { %4576 = vmatmul.mubr.msk.f32.gmra.mxu0 %vm877_vm4, %v4545_v32  ;;  %1015 = vadd.xlane.f32.xlu1 %v1014_v40  ;;  %v4555_v42 = vpop.f32.mrf.mxu0 }
 0x30c   :  { %v1011_v41 = vsel %vm877_vm4, %v1007_v39, 0.0  ;;  %4593 = vmatprep.mubr.msk.f32.mxu0 %vm580_vm1, %v5949_v17  ;;  %v4560_v43 = vpop.f32.mrf.mxu1  ;;  %v1010_v9 = vmul.f32 %v4555_v42, %v4234_v34 }
 0x30d   :  { %1012 = vadd.xlane.f32.xlu0 %v1011_v41  ;;  %v766_v44 = vpop.f32.mrf.mxu0 }
 0x30e   :  { %v858_v45 = vpop.f32.mrf.mxu1  ;;  %v1009_v1 = vmul.f32 %v4234_v34, %v766_v44  ;;  %v1020_v13 = vsel %vm877_vm4, %v1010_v9, 0.0 }
 0x310   :  { %v4563_v48 = vpop.f32.mrf.mxu1  ;;  %v1017_v11 = vsel %vm877_vm4, %v1009_v1, 0.0  ;;  %v573_v1 = vld [vmem:[%s6477_s9] sm:$0xff] }
 0x312   :  { %v868_v53 = vpop.f32.mrf.mxu1 }
 0x394   :  { %v1016_v24 = vpop.xlane.xlu1 %1015 }
 0x396   :  { %v1013_v22 = vpop.xlane.xlu0 %1012 }
 0x3c7   :  { %v4574_v46 = vpop.f32.mrf.mxu0 }
 0x3c8   :  { %v962_v47 = vadd.f32 %v4574_v46, %v4560_v43 }
 0x3c9   :  { %v956_v49 = vpop.f32.mrf.mxu0 }
 0x3ca   :  { %4965 = vtanh.f32 %v962_v47  ;;  %v957_v50 = vadd.f32 %v956_v49, %v858_v45 }
 0x3cb   :  { %v4577_v51 = vpop.f32.mrf.mxu0 }
 0x3cc   :  { %4967 = vtanh.f32 %v957_v50  ;;  %v972_v52 = vadd.f32 %v4577_v51, %v4563_v48 }
 0x3cd   :  { %v966_v54 = vpop.f32.mrf.mxu0 }
 0x3ce   :  { %4969 = vtanh.f32 %v972_v52  ;;  %v967_v55 = vadd.f32 %v966_v54, %v868_v53 }
 0x3d0   :  { %4971 = vtanh.f32 %v967_v55 }
 0x3d7   :  { %v5994_v57 = vpop.eup %4965 }
 0x3d8   :  { %v986_v58 = vmul.f32 %v5994_v57, %v4233_v56 }
 0x3d9   :  { %v5997_v59 = vpop.eup %4967 }
 0x3da   :  { %v992_v60 = vsel %vm877_vm4, %v986_v58, 0.0  ;;  %v985_v61 = vmul.f32 %v5997_v59, %v4233_v56 }
 0x3db   :  { %v6001_v62 = vpop.eup %4969  ;;  %993 = vadd.xlane.f32.xlu0 %v992_v60  ;;  %v576_v60 = vld [vmem:[%s6477_s9 + $0x18] sm:$0xff] }
 0x3dc   :  { %v988_v63 = vmul.f32 %v6001_v62, %v4233_v56  ;;  %v989_v7 = vsel %vm877_vm4, %v985_v61, 0.0  ;;  %v575_v61 = vld [vmem:[%s6477_s9 + $0x10] sm:$0xff] }
 0x3dd   :  { %v6004_v0 = vpop.eup %4971 }
 0x3de   :  { %v998_v2 = vsel %vm877_vm4, %v988_v63, 0.0  ;;  %v987_v8 = vmul.f32 %v6004_v0, %v4233_v56  ;;  %v6017_v56 = vunpack.c.h.bf16 %v4340_v18  ;;  %v574_v63 = vld [vmem:[%s6477_s9 + $0x8] sm:$0xff] }
 0x3df   :  { %999 = vadd.xlane.f32.xlu1 %v998_v2  ;;  %990 = vadd.xlane.f32.xlu0 %v989_v7 }
 0x3e0   :  { %v995_v10 = vsel %vm877_vm4, %v987_v8, 0.0 }
 0x3e3   :  { %996 = vadd.xlane.f32.xlu1 %v995_v10  ;;  %1018 = vadd.xlane.f32.xlu0 %v1017_v11 }
 0x3e7   :  { %1021 = vadd.xlane.f32.xlu1 %v1020_v13 }
 0x464   :  { %v994_v25 = vpop.xlane.xlu0 %993 }
 0x465   :  { %v1024_v32 = vadd.f32 %v1016_v24, %v994_v25 }
 0x468   :  { %v1000_v26 = vpop.xlane.xlu1 %999  ;;  %v991_v27 = vpop.xlane.xlu0 %990 }
 0x469   :  { %v1023_v30 = vadd.f32 %v1013_v22, %v991_v27 }
 0x46b   :  { %v1027_v35 = vmax.f32 %v1023_v30, %v1024_v32 }
 0x46c   :  { %v997_v28 = vpop.xlane.xlu1 %996  ;;  %v1019_v29 = vpop.xlane.xlu0 %1018 }
 0x46d   :  { %v1025_v33 = vadd.f32 %v1019_v29, %v997_v28 }
 0x470   :  { %v1022_v31 = vpop.xlane.xlu1 %1021 }
 0x471   :  { %v1026_v34 = vadd.f32 %v1022_v31, %v1000_v26 }
 0x473   :  { %v1028_v36 = vmax.f32 %v1025_v33, %v1026_v34 }
 0x475   :  { %v1029_v37 = vmax.f32 %v1027_v35, %v1028_v36 }
 0x477   :  { %v1030_v38 = vrot.slane %v1029_v37, 4 }
 0x479   :  { %v1031_v39 = vmax.f32 %v1029_v37, %v1030_v38 }
 0x47b   :  { %v1032_v40 = vrot.slane %v1031_v39, 2 }
 0x47d   :  { %v1033_v41 = vmax.f32 %v1031_v39, %v1032_v40 }
 0x47f   :  { %v1034_v42 = vrot.slane %v1033_v41, 1 }
 0x481   :  { %v1035_v43 = vmax.f32 %v1033_v41, %v1034_v42  ;;  %v1435_v42 = vld [vmem:[%s6478_s1 + $0x18] sm:$0xff] }
 0x483   :  { %4878 = vpush %v1035_v43  ;;  %v1434_v43 = vld [vmem:[%s6478_s1 + $0x10] sm:$0xff] }
 0x4b4   :  { %s4879_s26 = spop %4878 }
 0x4b5   :  { %v1037_v44 = vstv %s4879_s26 }
 0x4b6   :  { %v1041_v45 = vsub.f32 %v1026_v34, %v1037_v44  ;;  %v1040_v46 = vsub.f32 %v1025_v33, %v1037_v44  ;;  %v1039_v47 = vsub.f32 %v1024_v32, %v1037_v44  ;;  %v1038_v49 = vsub.f32 %v1023_v30, %v1037_v44  ;;  %v1433_v44 = vld [vmem:[%s6478_s1 + $0x8] sm:$0xff] }
 0x4b8   :  { %v1048_v48 = vmul.f32 1.442695, %v1041_v45  ;;  %v1046_v50 = vmul.f32 1.442695, %v1040_v46  ;;  %v1044_v51 = vmul.f32 1.442695, %v1039_v47 }
 0x4b9   :  { %v1042_v52 = vmul.f32 1.442695, %v1038_v49  ;;  %v1432_v45 = vld [vmem:[%s6478_s1] sm:$0xff]  ;;  %v1431_v46 = vld [vmem:[%s6479_s29 + $0x18] sm:$0xff]  ;;  %v1429_v47 = vld [vmem:[%s6479_s29 + $0x8] sm:$0xff] }
 0x4ba   :  { %4973 = vpow2.f32 %v1048_v48  ;;  %v1428_v48 = vld [vmem:[%s6479_s29] sm:$0xff]  ;;  %v4245_v49 = vld [vmem:[#allocation11] ss:$0 sm:$0xff] }
 0x4bb   :  { %4975 = vpow2.f32 %v1046_v50 }
 0x4bc   :  { %4977 = vpow2.f32 %v1044_v51 }
 0x4bd   :  { %4979 = vpow2.f32 %v1042_v52 }
 0x4c7   :  { %v4974_v53 = vpop.eup %4973 }
 0x4c8   :  { %4578 = vmatprep.subr.mxu1 %v4974_v53  ;;  %v4976_v54 = vpop.eup %4975 }
 0x4c9   :  { %4579 = vmatpush3.msra.mxu1 %v4974_v53  ;;  %v4978_v55 = vpop.eup %4977 }
 0x4ca   :  { %4580 = vmatprep.subr.mxu1 %v4976_v54  ;;  %v4980_v58 = vpop.eup %4979 }
 0x4cb   :  { %4581 = vmatpush3.msra.mxu1 %v4976_v54 }
 0x4cc   :  { %4582 = vmatprep.subr.mxu1 %v4978_v55 }
 0x4cd   :  { %4583 = vmatpush3.msra.mxu1 %v4978_v55 }
 0x4ce   :  { %4584 = vmatprep.subr.mxu1 %v4980_v58 }
 0x4cf   :  { %4585 = vmatpush3.msra.mxu1 %v4980_v58 }
 0x4d0   :  { %4587 = vmatmul.mubr.msk.f32.vlgmr.msra.gmra.mxu1 %vm877_vm4, %v6017_v56  ;;  %4599 = vmatprep.subr.mxu1 %v576_v60 }
 0x4d1   :  { %4600 = vmatpush3.msra.mxu1 %v576_v60  ;;  %4607 = vmatprep.mubr.msk.f32.mxu1 %vm877_vm4, %v5997_v59 }
 0x4d2   :  { %4601 = vmatprep.subr.mxu1 %v575_v61 }
 0x4d3   :  { %4602 = vmatpush3.msra.mxu1 %v575_v61 }
 0x4d4   :  { %4603 = vmatprep.subr.mxu1 %v574_v63 }
 0x4d5   :  { %4604 = vmatpush3.msra.mxu1 %v574_v63  ;;  %v4248_v63 = vld [vmem:[#allocation13] ss:$0 sm:$0xff] }
 0x4d6   :  { %4605 = vmatprep.subr.mxu1 %v573_v1 }
 0x4d7   :  { %4606 = vmatpush3.msra.mxu1 %v573_v1 }
 0x4d8   :  { %4608 = vmatmul.mubr.msk.f32.vlgmr.msra.gmra.mxu1 %vm877_vm4, %v5994_v57  ;;  %v5663_v57 = vmov 0   ;;  %4624 = vmatprep.subr.mxu1 %v1431_v46 }
 0x4d9   :  { %4610 = vmatprep.mubr.msk.f32.mxu1 %vm877_vm4, %v6004_v0  ;;  %4960 = vset.pattern.permute.xlu1 %v5663_v57 }
 0x4da   :  { %4959 = vset.pattern.permute.xlu0 %v5663_v57  ;;  %4625 = vmatpush3.msra.mxu1 %v1431_v46 }
 0x4dc   :  { %4611 = vmatmul.mubr.msk.f32.gmra.mxu1 %vm877_vm4, %v6001_v62 }
 0x590   :  { %v4588_v2 = vpop.f32.mrf.mxu1 }
 0x591   :  { %4589 = vmatprep.subr.mxu0 %v4588_v2 }
 0x592   :  { %v1122_v59 = vpop.f32.mrf.mxu1  ;;  %4590 = vmatpush3.msra.mxu0 %v4588_v2 }
 0x593   :  { %4591 = vmatprep.subr.mxu0 %v1122_v59 }
 0x594   :  { %4592 = vmatpush3.msra.mxu0 %v1122_v59 }
 0x595   :  { %4594 = vmatmul.mubr.msk.f32.vlgmr.msra.gmra.mxu0 %vm580_vm1, %v5958_v19 }
 0x596   :  { %4596 = vmatprep.mubr.msk.f32.mxu0 %vm580_vm1, %v5965_v21 }
 0x598   :  { %v4609_v30 = vpop.f32.mrf.mxu1 }
 0x599   :  { %4597 = vmatmul.mubr.msk.f32.gmra.mxu0 %vm580_vm1, %v5974_v23 }
 0x59a   :  { %4621 = vmatprep.mubr.msk.f32.mxu0 %vm877_vm4, %v6013_v20  ;;  %v1302_v31 = vpop.f32.mrf.mxu1 }
 0x59c   :  { %v4612_v32 = vpop.f32.mrf.mxu1 }
 0x59e   :  { %v1312_v36 = vpop.f32.mrf.mxu1 }
 0x655   :  { %v4595_v62 = vpop.f32.mrf.mxu0 }
 0x656   :  { %v1203_v0 = vadd.f32 1e-16, %v4595_v62 }
 0x657   :  { %v1197_v7 = vpop.f32.mrf.mxu0 }
 0x658   :  { %4981 = vrcp.f32 %v1203_v0  ;;  %v1198_v11 = vadd.f32 1e-16, %v1197_v7 }
 0x659   :  { %v4598_v8 = vpop.f32.mrf.mxu0 }
 0x65a   :  { %v1213_v9 = vadd.f32 1e-16, %v4598_v8 }
 0x65b   :  { %v1207_v10 = vpop.f32.mrf.mxu0 }
 0x65c   :  { %4983 = vrcp.f32 %v1213_v9  ;;  %v1208_v13 = vadd.f32 1e-16, %v1207_v10 }
 0x65e   :  { %4985 = vrcp.f32 %v1208_v13 }
 0x65f   :  { %4987 = vrcp.f32 %v1198_v11 }
 0x665   :  { %v4982_v18 = vpop.eup %4981 }
 0x666   :  { %v1221_v22 = vmul.f32 %v4982_v18, %v4978_v55 }
 0x668   :  { %1328 = vperm.xlu1 %4960, %v1221_v22  }
 0x669   :  { %v4984_v24 = vpop.eup %4983 }
 0x66a   :  { %v1223_v25 = vmul.f32 %v4984_v24, %v4974_v53  ;;  %v4251_v53 = vld [vmem:[#allocation14] ss:$0 sm:$0xff] }
 0x66b   :  { %v4986_v26 = vpop.eup %4985 }
 0x66c   :  { %1338 = vperm.xlu0 %4959, %v1223_v25   ;;  %v1222_v27 = vmul.f32 %v4986_v26, %v4976_v54  ;;  %v4988_v28 = vpop.eup %4987 }
 0x66d   :  { %v1220_v29 = vmul.f32 %v4988_v28, %v4980_v58 }
 0x66e   :  { %1333 = vperm.xlu1 %4960, %v1222_v27  }
 0x670   :  { %1662 = vrot.lane.b32.xlu0 %v5942_v15, %s5664_s28 }
 0x672   :  { %1323 = vperm.xlu1 %4960, %v1220_v29  }
 0x674   :  { %1664 = vrot.lane.b32.xlu0 %v5936_v12, %s5664_s28 }
 0x6e3   :  { %v1329_v33 = vpop.permute.xlu1 %1328 }
 0x6e4   :  { %v1342_v39 = vmul.f32 %v4609_v30, %v1329_v33 }
 0x6e7   :  { %v1339_v34 = vpop.permute.xlu0 %1338 }
 0x6e8   :  { %v1344_v35 = vmul.f32 %v4612_v32, %v1339_v34 }
 0x6e9   :  { %v1334_v37 = vpop.permute.xlu1 %1333 }
 0x6ea   :  { %v1343_v38 = vmul.f32 %v1334_v37, %v1312_v36  ;;  %4613 = vmatprep.subr.mxu0 %v1344_v35 }
 0x6eb   :  { %4614 = vmatpush3.msra.mxu0 %v1344_v35  ;;  %v1663_v34 = vpop.permute.xlu0 %1662 }
 0x6ec   :  { %4615 = vmatprep.subr.mxu0 %v1343_v38 }
 0x6ed   :  { %4616 = vmatpush3.msra.mxu0 %v1343_v38  ;;  %v1324_v40 = vpop.permute.xlu1 %1323 }
 0x6ee   :  { %v1341_v41 = vmul.f32 %v1324_v40, %v1302_v31  ;;  %4617 = vmatprep.subr.mxu0 %v1342_v39 }
 0x6ef   :  { %4618 = vmatpush3.msra.mxu0 %v1342_v39 }
 0x6f0   :  { %4619 = vmatprep.subr.mxu0 %v1341_v41 }
 0x6f1   :  { %4620 = vmatpush3.msra.mxu0 %v1341_v41  ;;  %v1665_v41 = vpop.permute.xlu0 %1664 }
 0x6f2   :  { %4622 = vmatmul.mubr.msk.f32.vlgmr.msra.gmra.mxu0 %vm877_vm4, %v6017_v56  ;;  %4635 = vmatprep.subr.mxu0 %v1435_v42 }
 0x6f3   :  { %4636 = vmatpush3.msra.mxu0 %v1435_v42  ;;  %4643 = vmatprep.mubr.msk.f32.mxu0 %vm877_vm4, %v5942_v15  ;;  %v1430_v15 = vld [vmem:[%s6479_s29 + $0x10] sm:$0xff] }
 0x6f4   :  { %4637 = vmatprep.subr.mxu0 %v1434_v43  ;;  %4626 = vmatprep.subr.mxu1 %v1430_v15 }
 0x6f5   :  { %4638 = vmatpush3.msra.mxu0 %v1434_v43  ;;  %4627 = vmatpush3.msra.mxu1 %v1430_v15 }
 0x6f6   :  { %4639 = vmatprep.subr.mxu0 %v1433_v44  ;;  %4628 = vmatprep.subr.mxu1 %v1429_v47 }
 0x6f7   :  { %4640 = vmatpush3.msra.mxu0 %v1433_v44  ;;  %4629 = vmatpush3.msra.mxu1 %v1429_v47 }
 0x6f8   :  { %4641 = vmatprep.subr.mxu0 %v1432_v45  ;;  %4630 = vmatprep.subr.mxu1 %v1428_v48 }
 0x6f9   :  { %4642 = vmatpush3.msra.mxu0 %v1432_v45  ;;  %4631 = vmatpush3.msra.mxu1 %v1428_v48 }
 0x6fa   :  { %4644 = vmatmul.mubr.msk.f32.vlgmr.msra.gmra.mxu0 %vm877_vm4, %v5936_v12 }
 0x6fb   :  { %4661 = vmatprep.mubr.msk.f32.mxu0 %vm580_vm1, %v4325_v4 }
 0x7b2   :  { %v4623_v50 = vpop.f32.mrf.mxu0 }
 0x7b3   :  { %v1423_v51 = vadd.f32 %v4623_v50, %v4245_v49 }
 0x7b4   :  { %v1417_v12 = vpop.f32.mrf.mxu0 }
 0x7b5   :  { %v1418_v52 = vadd.f32 %v4245_v49, %v1417_v12 }
 0x7b7   :  { %4989 = vtanh.f32 %v1418_v52 }
 0x7b8   :  { %4991 = vtanh.f32 %v1423_v51 }
 0x7ba   :  { %v4645_v4 = vpop.f32.mrf.mxu0 }
 0x7bb   :  { %v1611_v58 = vadd.f32 %v4645_v4, %v4251_v53 }
 0x7bc   :  { %v1605_v54 = vpop.f32.mrf.mxu0 }
 0x7bd   :  { %v1606_v55 = vadd.f32 %v4251_v53, %v1605_v54 }
 0x7bf   :  { %1630 = vrot.lane.b32.xlu1 %v1606_v55, %s5665_s2 }
 0x7c3   :  { %1632 = vrot.lane.b32.xlu1 %v1611_v58, %s5665_s2 }
 0x7c4   :  { %v4990_v60 = vpop.eup %4989 }
 0x7c5   :  { %v4992_v61 = vpop.eup %4991  ;;  %4632 = vmatprep.mubr.msk.f32.mxu1 %vm877_vm4, %v4990_v60 }
 0x7c6   :  { %4633 = vmatmul.mubr.msk.f32.vlgmr.msra.gmra.mxu1 %vm877_vm4, %v4992_v61 }
 0x831   :  { %v1631_v18 = vpop.permute.xlu1 %1630 }
 0x835   :  { %v1633_v26 = vpop.permute.xlu1 %1632 }
 0x886   :  { %v4634_v1 = vpop.f32.mrf.mxu1 }
 0x887   :  { %v1524_v2 = vadd.f32 %v4634_v1, %v4248_v63  ;;  %v4256_v1 = vld [vmem:[%s6481_s3] ss:$0 sm:$0xff] }
 0x888   :  { %v1518_v59 = vpop.f32.mrf.mxu1 }
 0x889   :  { %v1615_v57 = vadd.f32 %v1611_v58, %v1524_v2  ;;  %v1519_v62 = vadd.f32 %v4248_v63, %v1518_v59  ;;  %v4257_v63 = vld [vmem:[%s6480_s7] ss:$0 sm:$0xff]  ;;  %v1739_v59 = vld [vmem:[%s6482_s8 + $0x10] sm:$0xff] }
 0x88b   :  { %v4255_v0 = vmul.f32 -1.442695, %v1615_v57  ;;  %v1614_v7 = vadd.f32 %v1606_v55, %v1519_v62 }
 0x88d   :  { %4993 = vpow2.f32 %v4255_v0  ;;  %v4254_v8 = vmul.f32 -1.442695, %v1614_v7 }
 0x88f   :  { %4995 = vpow2.f32 %v4254_v8 }
 0x89a   :  { %v4994_v9 = vpop.eup %4993 }
 0x89b   :  { %v1623_v11 = vadd.f32 1.0, %v4994_v9 }
 0x89c   :  { %v4996_v10 = vpop.eup %4995 }
 0x89d   :  { %v1622_v13 = vadd.f32 1.0, %v4996_v10 }
 0x89f   :  { %4997 = vrcp.f32 %v1622_v13 }
 0x8a0   :  { %4999 = vrcp.f32 %v1623_v11 }
 0x8ac   :  { %v4998_v22 = vpop.eup %4997 }
 0x8ad   :  { %v1636_v24 = vmul.f32 %v4998_v22, %v1631_v18  ;;  %v5000_v25 = vpop.eup %4999  ;;  %v1650_v35 = vsub.f32 1.0, %v4998_v22  ;;  %v1668_v37 = vmul.f32 %v4998_v22, %v1663_v34 }
 0x8ae   :  { %v1637_v27 = vmul.f32 %v5000_v25, %v1633_v26  ;;  %v1651_v40 = vsub.f32 1.0, %v5000_v25  ;;  %v1669_v43 = vmul.f32 %v5000_v25, %v1665_v41 }
 0x8af   :  { %1640 = vrot.lane.b32.xlu1 %v1636_v24, %s5665_s2 }
 0x8b3   :  { %1642 = vrot.lane.b32.xlu1 %v1637_v27, %s5665_s2 }
 0x921   :  { %v1641_v28 = vpop.permute.xlu1 %1640 }
 0x922   :  { %v1646_v29 = vadd.f32 %v1641_v28, %v1519_v62  ;;  %v1738_v28 = vld [vmem:[%s6482_s8 + $0x8] sm:$0xff] }
 0x924   :  { %5001 = vtanh.f32 %v1646_v29  ;;  %v1737_v29 = vld [vmem:[%s6482_s8] sm:$0xff] }
 0x925   :  { %v1643_v30 = vpop.permute.xlu1 %1642 }
 0x926   :  { %v1647_v31 = vadd.f32 %v1643_v30, %v1524_v2  ;;  %v1740_v2 = vld [vmem:[%s6482_s8 + $0x18] sm:$0xff] }
 0x927   :  { %4646 = vmatprep.subr.mxu1 %v1740_v2 }
 0x928   :  { %5003 = vtanh.f32 %v1647_v31  ;;  %4647 = vmatpush3.msra.mxu1 %v1740_v2 }
 0x929   :  { %4648 = vmatprep.subr.mxu1 %v1739_v59 }
 0x92a   :  { %4649 = vmatpush3.msra.mxu1 %v1739_v59 }
 0x92b   :  { %4650 = vmatprep.subr.mxu1 %v1738_v28 }
 0x92c   :  { %4651 = vmatpush3.msra.mxu1 %v1738_v28 }
 0x92d   :  { %4652 = vmatprep.subr.mxu1 %v1737_v29 }
 0x92e   :  { %4653 = vmatpush3.msra.mxu1 %v1737_v29 }
 0x931   :  { %v5002_v32 = vpop.eup %5001 }
 0x932   :  { %1654 = vrot.lane.b32.xlu1 %v5002_v32, %s5666_s20 }
 0x935   :  { %v5004_v33 = vpop.eup %5003 }
 0x936   :  { %1656 = vrot.lane.b32.xlu1 %v5004_v33, %s5666_s20 }
 0x9a4   :  { %v1655_v36 = vpop.permute.xlu1 %1654 }
 0x9a5   :  { %v1660_v38 = vmul.f32 %v1655_v36, %v1650_v35 }
 0x9a7   :  { %v1670_v39 = vadd.f32 %v1668_v37, %v1660_v38 }
 0x9a8   :  { %v1657_v42 = vpop.permute.xlu1 %1656 }
 0x9a9   :  { %v1661_v44 = vmul.f32 %v1657_v42, %v1651_v40  ;;  %1674 = vrot.lane.b32.xlu1 %v1670_v39, %s5666_s20 }
 0x9ab   :  { %v1671_v45 = vadd.f32 %v1669_v43, %v1661_v44 }
 0x9ad   :  { %1676 = vrot.lane.b32.xlu0 %v1671_v45, %s5666_s20 }
 0xa1b   :  { %v1675_v46 = vpop.permute.xlu1 %1674 }
 0xa1c   :  { %v1680_v15 = vsel %vm877_vm4, %v1675_v46, 0.0 }
 0xa1d   :  { %1681 = vadd.xlane.f32.xlu1 %v1680_v15 }
 0xa1f   :  { %v1677_v47 = vpop.permute.xlu0 %1676 }
 0xa20   :  { %v1683_v48 = vsel %vm877_vm4, %v1677_v47, 0.0 }
 0xa21   :  { %1684 = vadd.xlane.f32.xlu0 %v1683_v48 }
 0xaa6   :  { %v1682_v49 = vpop.xlane.xlu1 %1681 }
 0xaa7   :  { %v1687_v50 = vmul.f32 0.03125, %v1682_v49 }
 0xaa9   :  { %v1689_v51 = vsub.f32 %v1670_v39, %v1687_v50 }
 0xaaa   :  { %v1685_v12 = vpop.xlane.xlu0 %1684 }
 0xaab   :  { %v1688_v52 = vmul.f32 0.03125, %v1685_v12  ;;  %v1691_v4 = vmul.f32 %v1689_v51, %v1689_v51 }
 0xaad   :  { %v1690_v53 = vsub.f32 %v1671_v45, %v1688_v52  ;;  %1695 = vrot.lane.b32.xlu0 %v1691_v4, %s5666_s20 }
 0xaaf   :  { %v1692_v54 = vmul.f32 %v1690_v53, %v1690_v53 }
 0xab1   :  { %1697 = vrot.lane.b32.xlu1 %v1692_v54, %s5666_s20 }
 0xb1f   :  { %v1696_v55 = vpop.permute.xlu0 %1695 }
 0xb20   :  { %v1701_v58 = vsel %vm877_vm4, %v1696_v55, 0.0 }
 0xb21   :  { %1702 = vadd.xlane.f32.xlu1 %v1701_v58 }
 0xb23   :  { %v1698_v60 = vpop.permute.xlu1 %1697 }
 0xb24   :  { %v1704_v61 = vsel %vm877_vm4, %v1698_v60, 0.0 }
 0xb25   :  { %1705 = vadd.xlane.f32.xlu0 %v1704_v61 }
 0xb32   :  { %1730 = vrot.lane.b32.xlu1 %v4257_v63, %s5664_s28 }
 0xb3b   :  { %1720 = vrot.lane.b32.xlu0 %v4256_v1, %s5664_s28 }
 0xbaa   :  { %v1703_v57 = vpop.xlane.xlu1 %1702 }
 0xbab   :  { %v1707_v62 = vmul.f32 0.03125, %v1703_v57 }
 0xbad   :  { %v1709_v0 = vadd.f32 1e-05, %v1707_v62 }
 0xbae   :  { %v1706_v7 = vpop.xlane.xlu0 %1705  ;;  %v1731_v18 = vpop.permute.xlu1 %1730 }
 0xbaf   :  { %5005 = vrsqrt.f32 %v1709_v0  ;;  %v1708_v8 = vmul.f32 0.03125, %v1706_v7 }
 0xbb1   :  { %v1710_v9 = vadd.f32 1e-05, %v1708_v8 }
 0xbb2   :  { %v1721_v11 = vpop.permute.xlu0 %1720 }
 0xbb3   :  { %5007 = vrsqrt.f32 %v1710_v9 }
 0xbbc   :  { %v5006_v10 = vpop.eup %5005 }
 0xbbd   :  { %v1713_v13 = vmul.f32 %v5006_v10, %v1689_v51 }
 0xbbf   :  { %v1723_v22 = vmul.f32 %v1721_v11, %v1713_v13 }
 0xbc0   :  { %v5008_v24 = vpop.eup %5007 }
 0xbc1   :  { %v1714_v25 = vmul.f32 %v5008_v24, %v1690_v53  ;;  %v1733_v26 = vadd.f32 %v1731_v18, %v1723_v22 }
 0xbc3   :  { %v1724_v27 = vmul.f32 %v1721_v11, %v1714_v25  ;;  %5009 = vtanh.f32 %v1733_v26 }
 0xbc5   :  { %v1734_v30 = vadd.f32 %v1731_v18, %v1724_v27 }
 0xbc7   :  { %5011 = vtanh.f32 %v1734_v30 }
 0xbd0   :  { %v6086_v31 = vpop.eup %5009 }
 0xbd1   :  { %1746 = vrot.lane.b32.xlu1 %v6086_v31, %s5666_s20 }
 0xbd4   :  { %v6090_v32 = vpop.eup %5011 }
 0xbd5   :  { %1748 = vrot.lane.b32.xlu0 %v6090_v32, %s5666_s20 }
 0xc43   :  { %v6094_v33 = vpop.permute.xlu1 %1746 }
 0xc44   :  { %4654 = vmatprep.mubr.msk.f32.mxu1 %vm877_vm4, %v6094_v33 }
 0xc47   :  { %v6098_v34 = vpop.permute.xlu0 %1748 }
 0xc48   :  { %4655 = vmatmul.mubr.msk.f32.vlgmr.msra.gmra.mxu1 %vm877_vm4, %v6098_v34 }
 0xc49   :  { %4671 = vmatprep.mubr.msk.f32.mxu1 %vm580_vm1, %v5949_v17 }
 0xd08   :  { %v4656_v35 = vpop.f32.mrf.mxu1 }
 0xd09   :  { %4657 = vmatprep.subr.mxu0 %v4656_v35  ;;  %4667 = vmatprep.subr.mxu1 %v4656_v35 }
 0xd0a   :  { %v1820_v36 = vpop.f32.mrf.mxu1  ;;  %4658 = vmatpush3.msra.mxu0 %v4656_v35  ;;  %4668 = vmatpush3.msra.mxu1 %v4656_v35 }
 0xd0b   :  { %4659 = vmatprep.subr.mxu0 %v1820_v36  ;;  %4669 = vmatprep.subr.mxu1 %v1820_v36 }
 0xd0c   :  { %4660 = vmatpush3.msra.mxu0 %v1820_v36  ;;  %4670 = vmatpush3.msra.mxu1 %v1820_v36 }
 0xd0d   :  { %4662 = vmatmul.mubr.msk.f32.vlgmr.msra.gmra.mxu0 %vm580_vm1, %v4326_v14  ;;  %4672 = vmatmul.mubr.msk.f32.vlgmr.msra.gmra.mxu1 %vm580_vm1, %v5958_v19  ;;  %v4269_v14 = vld [vmem:[#allocation17] ss:$0 sm:$0xff] }
 0xd0e   :  { %4664 = vmatprep.mubr.msk.f32.mxu0 %vm580_vm1, %v4329_v6  ;;  %4674 = vmatprep.mubr.msk.f32.mxu1 %vm580_vm1, %v5965_v21 }
 0xd11   :  { %4665 = vmatmul.mubr.msk.f32.gmra.mxu0 %vm580_vm1, %v4330_v16  ;;  %4675 = vmatmul.mubr.msk.f32.gmra.mxu1 %vm580_vm1, %v5974_v23 }
 0xd12   :  { %4685 = vmatprep.mubr.msk.f32.mxu0 %vm877_vm4, %v6013_v20  ;;  %4706 = vmatprep.mubr.msk.f32.mxu1 %vm877_vm4, %v6013_v20 }
 0xdcd   :  { %v6123_v37 = vpop.f32.mrf.mxu0  ;;  %v4673_v6 = vpop.f32.mrf.mxu1 }
 0xdce   :  { %v2006_v38 = vmul.f32 %v6123_v37, %v4268_v3  ;;  %v2028_v39 = vmul.f32 %v4673_v6, %v4269_v14 }
 0xdcf   :  { %v6126_v5 = vpop.f32.mrf.mxu0  ;;  %v1980_v16 = vpop.f32.mrf.mxu1 }
 0xdd0   :  { %v2005_v40 = vmul.f32 %v4268_v3, %v6126_v5  ;;  %v2027_v41 = vmul.f32 %v4269_v14, %v1980_v16  ;;  %v2034_v42 = vsel %vm877_vm4, %v2028_v39, 0.0  ;;  %v2012_v43 = vsel %vm877_vm4, %v2006_v38, 0.0 }
 0xdd1   :  { %2035 = vadd.xlane.f32.xlu1 %v2034_v42  ;;  %2013 = vadd.xlane.f32.xlu0 %v2012_v43  ;;  %v6131_v20 = vpop.f32.mrf.mxu0  ;;  %v4676_v44 = vpop.f32.mrf.mxu1 }
 0xdd2   :  { %v2008_v46 = vmul.f32 %v6131_v20, %v4268_v3  ;;  %v2031_v15 = vsel %vm877_vm4, %v2027_v41, 0.0  ;;  %v2009_v47 = vsel %vm877_vm4, %v2005_v40, 0.0  ;;  %v2030_v50 = vmul.f32 %v4676_v44, %v4269_v14 }
 0xdd3   :  { %v6133_v45 = vpop.f32.mrf.mxu0  ;;  %v1990_v49 = vpop.f32.mrf.mxu1 }
 0xdd4   :  { %v2007_v48 = vmul.f32 %v4268_v3, %v6133_v45  ;;  %v2029_v51 = vmul.f32 %v4269_v14, %v1990_v49  ;;  %v2018_v12 = vsel %vm877_vm4, %v2008_v46, 0.0  ;;  %v2040_v4 = vsel %vm877_vm4, %v2030_v50, 0.0 }
 0xdd5   :  { %2032 = vadd.xlane.f32.xlu0 %v2031_v15  ;;  %2010 = vadd.xlane.f32.xlu1 %v2009_v47 }
 0xdd6   :  { %v2015_v52 = vsel %vm877_vm4, %v2007_v48, 0.0  ;;  %v2037_v53 = vsel %vm877_vm4, %v2029_v51, 0.0 }
 0xdd9   :  { %2019 = vadd.xlane.f32.xlu1 %v2018_v12  ;;  %2016 = vadd.xlane.f32.xlu0 %v2015_v52 }
 0xddd   :  { %2041 = vadd.xlane.f32.xlu1 %v2040_v4  ;;  %2038 = vadd.xlane.f32.xlu0 %v2037_v53 }
 0xe5a   :  { %v2036_v54 = vpop.xlane.xlu1 %2035  ;;  %v2014_v55 = vpop.xlane.xlu0 %2013 }
 0xe5b   :  { %v2044_v2 = vadd.f32 %v2036_v54, %v2014_v55 }
 0xe5d   :  { %v2052_v0 = vmul.f32 0.01, %v2044_v2  ;;  %vm2048_vm6 = vcmp.gt.f32.partialorder %v2044_v2, 0.0 }
 0xe5e   :  { %v2033_v58 = vpop.xlane.xlu0 %2032  ;;  %v2011_v60 = vpop.xlane.xlu1 %2010 }
 0xe5f   :  { %v2043_v61 = vadd.f32 %v2033_v58, %v2011_v60  ;;  %v2056_v13 = vsel %vm2048_vm6, %v2044_v2, %v2052_v0 }
 0xe61   :  { %v2051_v59 = vmul.f32 0.01, %v2043_v61  ;;  %vm2047_vm5 = vcmp.gt.f32.partialorder %v2043_v61, 0.0 }
 0xe62   :  { %v2020_v63 = vpop.xlane.xlu1 %2019  ;;  %v2017_v1 = vpop.xlane.xlu0 %2016 }
 0xe63   :  { %v2055_v9 = vsel %vm2047_vm5, %v2043_v61, %v2051_v59 }
 0xe64   :  { %v2059_v24 = vmax.f32 %v2055_v9, %v2056_v13 }
 0xe66   :  { %v2042_v57 = vpop.xlane.xlu1 %2041  ;;  %v2039_v62 = vpop.xlane.xlu0 %2038 }
 0xe67   :  { %v2046_v7 = vadd.f32 %v2042_v57, %v2020_v63  ;;  %v2045_v8 = vadd.f32 %v2039_v62, %v2017_v1 }
 0xe69   :  { %vm2050_vm7 = vcmp.gt.f32.partialorder %v2046_v7, 0.0  ;;  %v2054_v10 = vmul.f32 0.01, %v2046_v7  ;;  %vm2049_vm8 = vcmp.gt.f32.partialorder %v2045_v8, 0.0  ;;  %v2053_v11 = vmul.f32 0.01, %v2045_v8 }
 0xe6b   :  { %v2058_v18 = vsel %vm2050_vm7, %v2046_v7, %v2054_v10  ;;  %v2057_v22 = vsel %vm2049_vm8, %v2045_v8, %v2053_v11  ;;  %v2364_v8 = vld [vmem:[#allocation20 + $0x18] sm:$0xff] }
 0xe6c   :  { %v2060_v25 = vmax.f32 %v2057_v22, %v2058_v18  ;;  %v4276_v10 = vld [vmem:[#allocation19] ss:$0 sm:$0xff] }
 0xe6e   :  { %v2061_v26 = vmax.f32 %v2059_v24, %v2060_v25 }
 0xe70   :  { %v2062_v27 = vrot.slane %v2061_v26, 4 }
 0xe72   :  { %v2063_v28 = vmax.f32 %v2061_v26, %v2062_v27 }
 0xe74   :  { %v2064_v29 = vrot.slane %v2063_v28, 2 }
 0xe76   :  { %v2065_v30 = vmax.f32 %v2063_v28, %v2064_v29 }
 0xe78   :  { %v2066_v35 = vrot.slane %v2065_v30, 1 }
 0xe7a   :  { %v2067_v36 = vmax.f32 %v2065_v30, %v2066_v35  ;;  %v4279_v30 = vld [vmem:[#allocation22] ss:$0 sm:$0xff] }
 0xe7c   :  { %4880 = vpush %v2067_v36 }
 0xead   :  { %s4881_s21 = spop %4880 }
 0xeae   :  { %v2069_v3 = vstv %s4881_s21 }
 0xeaf   :  { %v2073_v14 = vsub.f32 %v2058_v18, %v2069_v3  ;;  %v2072_v6 = vsub.f32 %v2057_v22, %v2069_v3  ;;  %v2071_v38 = vsub.f32 %v2056_v13, %v2069_v3  ;;  %v2070_v16 = vsub.f32 %v2055_v9, %v2069_v3  ;;  %v2358_v9 = vld [vmem:[%s6483_s10 + $0x8] sm:$0xff] }
 0xeb1   :  { %v2080_v39 = vmul.f32 1.442695, %v2073_v14  ;;  %v2078_v40 = vmul.f32 1.442695, %v2072_v6  ;;  %v2076_v41 = vmul.f32 1.442695, %v2071_v38 }
 0xeb2   :  { %v2074_v42 = vmul.f32 1.442695, %v2070_v16 }
 0xeb3   :  { %5013 = vpow2.f32 %v2080_v39 }
 0xeb4   :  { %5015 = vpow2.f32 %v2078_v40 }
 0xeb5   :  { %5017 = vpow2.f32 %v2076_v41 }
 0xeb6   :  { %5019 = vpow2.f32 %v2074_v42 }
 0xec0   :  { %v5014_v43 = vpop.eup %5013 }
 0xec1   :  { %4677 = vmatprep.subr.mxu0 %v5014_v43  ;;  %v5016_v44 = vpop.eup %5015 }
 0xec2   :  { %4678 = vmatpush3.msra.mxu0 %v5014_v43  ;;  %v5018_v46 = vpop.eup %5017 }
 0xec3   :  { %4679 = vmatprep.subr.mxu0 %v5016_v44  ;;  %v5020_v15 = vpop.eup %5019 }
 0xec4   :  { %4680 = vmatpush3.msra.mxu0 %v5016_v44 }
 0xec5   :  { %4681 = vmatprep.subr.mxu0 %v5018_v46 }
 0xec6   :  { %4682 = vmatpush3.msra.mxu0 %v5018_v46 }
 0xec7   :  { %4683 = vmatprep.subr.mxu0 %v5020_v15 }
 0xec8   :  { %4684 = vmatpush3.msra.mxu0 %v5020_v15 }
 0xec9   :  { %4686 = vmatmul.mubr.msk.f32.vlgmr.msra.gmra.mxu0 %vm877_vm4, %v6017_v56 }
 0xeca   :  { %4692 = vmatprep.mubr.msk.f32.mxu0 %vm580_vm1, %v5949_v17 }
 0xf89   :  { %v4687_v47 = vpop.f32.mrf.mxu0 }
 0xf8a   :  { %4688 = vmatprep.subr.mxu0 %v4687_v47 }
 0xf8b   :  { %v2148_v48 = vpop.f32.mrf.mxu0  ;;  %4689 = vmatpush3.msra.mxu0 %v4687_v47 }
 0xf8c   :  { %4690 = vmatprep.subr.mxu0 %v2148_v48 }
 0xf8d   :  { %4691 = vmatpush3.msra.mxu0 %v2148_v48 }
 0xf8e   :  { %4693 = vmatmul.mubr.msk.f32.vlgmr.msra.gmra.mxu0 %vm580_vm1, %v5958_v19 }
 0xf8f   :  { %4695 = vmatprep.mubr.msk.f32.mxu0 %vm580_vm1, %v5965_v21 }
 0xf92   :  { %4696 = vmatmul.mubr.msk.f32.gmra.mxu0 %vm580_vm1, %v5974_v23 }
0x104e   :  { %v4694_v49 = vpop.f32.mrf.mxu0 }
0x104f   :  { %v2229_v4 = vadd.f32 1e-16, %v4694_v49 }
0x1050   :  { %v2223_v50 = vpop.f32.mrf.mxu0 }
0x1051   :  { %v2224_v51 = vadd.f32 1e-16, %v2223_v50 }
0x1052   :  { %v4697_v12 = vpop.f32.mrf.mxu0 }
0x1053   :  { %v2239_v17 = vadd.f32 1e-16, %v4697_v12 }
0x1054   :  { %v2233_v52 = vpop.f32.mrf.mxu0 }
0x1055   :  { %5021 = vrcp.f32 %v2239_v17  ;;  %v2234_v53 = vadd.f32 1e-16, %v2233_v52 }
0x1056   :  { %5023 = vrcp.f32 %v2224_v51 }
0x1057   :  { %5025 = vrcp.f32 %v2234_v53 }
0x1058   :  { %5027 = vrcp.f32 %v2229_v4 }
0x1062   :  { %v5022_v54 = vpop.eup %5021 }
0x1063   :  { %v5024_v19 = vpop.eup %5023  ;;  %v2249_v55 = vmul.f32 %v5022_v54, %v5014_v43 }
0x1064   :  { %v5026_v58 = vpop.eup %5025  ;;  %v2246_v23 = vmul.f32 %v5024_v19, %v5020_v15 }
0x1065   :  { %2267 = vperm.xlu0 %4959, %v2249_v55   ;;  %v2248_v21 = vmul.f32 %v5026_v58, %v5016_v44  ;;  %v5028_v60 = vpop.eup %5027 }
0x1066   :  { %v2247_v61 = vmul.f32 %v5028_v60, %v5018_v46 }
0x1067   :  { %2262 = vperm.xlu1 %4960, %v2248_v21  }
0x1069   :  { %2252 = vperm.xlu0 %4959, %v2246_v23  }
0x106b   :  { %2257 = vperm.xlu1 %4960, %v2247_v61  }
0x10e0   :  { %v2268_v63 = vpop.permute.xlu0 %2267 }
0x10e1   :  { %v2273_v1 = vmul.f32 %v6131_v20, %v2268_v63  ;;  %v2363_v20 = vld [vmem:[#allocation20 + $0x10] sm:$0xff] }
0x10e2   :  { %v2263_v2 = vpop.permute.xlu1 %2262 }
0x10e3   :  { %v2272_v59 = vmul.f32 %v2263_v2, %v6133_v45  ;;  %4698 = vmatprep.subr.mxu1 %v2273_v1  ;;  %v2359_v45 = vld [vmem:[%s6483_s10 + $0x10] sm:$0xff] }
0x10e4   :  { %4699 = vmatpush3.msra.mxu1 %v2273_v1  ;;  %v2253_v57 = vpop.permute.xlu0 %2252 }
0x10e5   :  { %4700 = vmatprep.subr.mxu1 %v2272_v59  ;;  %v2270_v7 = vmul.f32 %v2253_v57, %v6126_v5  ;;  %v2361_v5 = vld [vmem:[#allocation20] sm:$0xff] }
0x10e6   :  { %4701 = vmatpush3.msra.mxu1 %v2272_v59  ;;  %v2258_v62 = vpop.permute.xlu1 %2257 }
0x10e7   :  { %v2271_v0 = vmul.f32 %v6123_v37, %v2258_v62  ;;  %v2362_v37 = vld [vmem:[#allocation20 + $0x8] sm:$0xff] }
0x10e9   :  { %4702 = vmatprep.subr.mxu1 %v2271_v0 }
0x10ea   :  { %4703 = vmatpush3.msra.mxu1 %v2271_v0 }
0x10eb   :  { %4704 = vmatprep.subr.mxu1 %v2270_v7 }
0x10ec   :  { %4705 = vmatpush3.msra.mxu1 %v2270_v7 }
0x10ed   :  { %4707 = vmatmul.mubr.msk.f32.vlgmr.msra.gmra.mxu1 %vm877_vm4, %v6017_v56  ;;  %4720 = vmatprep.subr.mxu1 %v2364_v8  ;;  %v2360_v56 = vld [vmem:[%s6483_s10 + $0x18] sm:$0xff] }
0x10ee   :  { %4721 = vmatpush3.msra.mxu1 %v2364_v8  ;;  %4728 = vmatprep.mubr.msk.f32.mxu1 %vm877_vm4, %v6094_v33  ;;  %v2357_v33 = vld [vmem:[%s6483_s10] sm:$0xff] }
0x10ef   :  { %4722 = vmatprep.subr.mxu1 %v2363_v20  ;;  %4709 = vmatprep.subr.mxu0 %v2360_v56 }
0x10f0   :  { %4723 = vmatpush3.msra.mxu1 %v2363_v20  ;;  %4710 = vmatpush3.msra.mxu0 %v2360_v56 }
0x10f1   :  { %4724 = vmatprep.subr.mxu1 %v2362_v37  ;;  %4711 = vmatprep.subr.mxu0 %v2359_v45 }
0x10f2   :  { %4725 = vmatpush3.msra.mxu1 %v2362_v37  ;;  %4712 = vmatpush3.msra.mxu0 %v2359_v45 }
0x10f3   :  { %4726 = vmatprep.subr.mxu1 %v2361_v5  ;;  %4713 = vmatprep.subr.mxu0 %v2358_v9 }
0x10f4   :  { %4727 = vmatpush3.msra.mxu1 %v2361_v5  ;;  %4714 = vmatpush3.msra.mxu0 %v2358_v9 }
0x10f5   :  { %4729 = vmatmul.mubr.msk.f32.vlgmr.msra.gmra.mxu1 %vm877_vm4, %v6098_v34  ;;  %4715 = vmatprep.subr.mxu0 %v2357_v33  ;;  %v4282_v34 = vld [vmem:[#allocation23] ss:$0 sm:$0xff] }
0x10f6   :  { %4716 = vmatpush3.msra.mxu0 %v2357_v33  ;;  %v4288_v33 = vld [vmem:[%s6484_s30] ss:$0 sm:$0xff] }
0x11ad   :  { %v4708_v11 = vpop.f32.mrf.mxu1 }
0x11ae   :  { %v2352_v13 = vadd.f32 %v4708_v11, %v4276_v10  ;;  %v6189_v11 = vld [vmem:[#allocation25 + $0x18] sm:$0xff] }
0x11af   :  { %v2346_v18 = vpop.f32.mrf.mxu1  ;;  %4738 = vmatprep.subr.mxu1 %v6189_v11 }
0x11b0   :  { %v2347_v22 = vadd.f32 %v4276_v10, %v2346_v18  ;;  %v4287_v10 = vld [vmem:[%s6485_s11] ss:$0 sm:$0xff]  ;;  %v5667_v18 = vmov 0.0   ;;  %4739 = vmatpush3.msra.mxu1 %v6189_v11 }
0x11b1   :  { %4731 = vmatprep.subr.mxu0 %v5667_v18 }
0x11b2   :  { %5029 = vtanh.f32 %v2347_v22  ;;  %v6196_v22 = vld [vmem:[#allocation25 + $0x8] sm:$0xff] }
0x11b3   :  { %5031 = vtanh.f32 %v2352_v13  ;;  %v6191_v13 = vld [vmem:[#allocation25 + $0x10] sm:$0xff] }
0x11b4   :  { %4740 = vmatprep.subr.mxu1 %v6191_v13 }
0x11b5   :  { %v4730_v24 = vpop.f32.mrf.mxu1  ;;  %4741 = vmatpush3.msra.mxu1 %v6191_v13 }
0x11b6   :  { %v2534_v25 = vadd.f32 %v4730_v24, %v4282_v34  ;;  %4742 = vmatprep.subr.mxu1 %v6196_v22 }
0x11b7   :  { %v2528_v26 = vpop.f32.mrf.mxu1  ;;  %4743 = vmatpush3.msra.mxu1 %v6196_v22 }
0x11b8   :  { %v2529_v27 = vadd.f32 %v4282_v34, %v2528_v26  ;;  %2555 = vrot.lane.b32.xlu1 %v2534_v25, %s5665_s2 }
0x11ba   :  { %2553 = vrot.lane.b32.xlu0 %v2529_v27, %s5665_s2 }
0x11bf   :  { %v5030_v28 = vpop.eup %5029 }
0x11c0   :  { %v5032_v29 = vpop.eup %5031  ;;  %4717 = vmatprep.mubr.msk.f32.mxu0 %vm877_vm4, %v5030_v28 }
0x11c1   :  { %4718 = vmatmul.mubr.msk.f32.vlgmr.msra.gmra.mxu0 %vm877_vm4, %v5032_v29 }
0x11c2   :  { %4735 = vmatprep.mubr.msk.f32.mxu0 %vm5668_vm9, %v5667_v18 }
0x122a   :  { %v2556_v46 = vpop.permute.xlu1 %2555 }
0x122c   :  { %v2554_v48 = vpop.permute.xlu0 %2553 }
0x1281   :  { %v4719_v35 = vpop.f32.mrf.mxu0 }
0x1282   :  { %v2453_v36 = vadd.f32 %v4719_v35, %v4279_v30 }
0x1283   :  { %v2447_v3 = vpop.f32.mrf.mxu0 }
0x1284   :  { %v2538_v14 = vadd.f32 %v2534_v25, %v2453_v36  ;;  %v2448_v6 = vadd.f32 %v4279_v30, %v2447_v3 }
0x1286   :  { %v4286_v38 = vmul.f32 -1.442695, %v2538_v14  ;;  %v2537_v39 = vadd.f32 %v2529_v27, %v2448_v6 }
0x1288   :  { %5033 = vpow2.f32 %v4286_v38  ;;  %v4285_v16 = vmul.f32 -1.442695, %v2537_v39 }
0x128a   :  { %5035 = vpow2.f32 %v4285_v16 }
0x1295   :  { %v5034_v40 = vpop.eup %5033 }
0x1296   :  { %v2546_v41 = vadd.f32 1.0, %v5034_v40  ;;  %v6202_v40 = vld [vmem:[#allocation25] sm:$0xff] }
0x1297   :  { %v5036_v42 = vpop.eup %5035  ;;  %4744 = vmatprep.subr.mxu1 %v6202_v40 }
0x1298   :  { %5037 = vrcp.f32 %v2546_v41  ;;  %v2545_v43 = vadd.f32 1.0, %v5036_v42  ;;  %4745 = vmatpush3.msra.mxu1 %v6202_v40 }
0x129a   :  { %5039 = vrcp.f32 %v2545_v43  ;;  %v474_v43 = vld [vmem:[%s6486_s19] sm:$0x1] }
0x12a5   :  { %v5038_v44 = vpop.eup %5037 }
0x12a6   :  { %v2560_v15 = vmul.f32 %v5038_v44, %v2556_v46  ;;  %v2574_v53 = vsub.f32 1.0, %v5038_v44  ;;  %v2586_v19 = vmul.f32 %v5038_v44, %v6090_v32  ;;  %v6211_v46 = vunpack.c.l.bf16 %v474_v43 }
0x12a7   :  { %v5040_v47 = vpop.eup %5039 }
0x12a8   :  { %2565 = vrot.lane.b32.xlu1 %v2560_v15, %s5665_s2  ;;  %v2559_v49 = vmul.f32 %v5040_v47, %v2554_v48  ;;  %v2573_v58 = vsub.f32 1.0, %v5040_v47  ;;  %v2585_v23 = vmul.f32 %v5040_v47, %v6086_v31 }
0x12aa   :  { %2563 = vrot.lane.b32.xlu0 %v2559_v49, %s5665_s2 }
0x131a   :  { %v2566_v50 = vpop.permute.xlu1 %2565 }
0x131b   :  { %v2570_v51 = vadd.f32 %v2566_v50, %v2453_v36 }
0x131c   :  { %v2564_v12 = vpop.permute.xlu0 %2563 }
0x131d   :  { %5041 = vtanh.f32 %v2570_v51  ;;  %v2569_v17 = vadd.f32 %v2564_v12, %v2448_v6  ;;  %v4292_v51 = vld [vmem:[#allocation26] ss:$0 sm:$0xff] }
0x131f   :  { %5043 = vtanh.f32 %v2569_v17 }
0x132a   :  { %v5042_v52 = vpop.eup %5041 }
0x132b   :  { %2579 = vrot.lane.b32.xlu1 %v5042_v52, %s5666_s20 }
0x132c   :  { %v5044_v4 = vpop.eup %5043 }
0x132d   :  { %2577 = vrot.lane.b32.xlu0 %v5044_v4, %s5666_s20 }
0x139d   :  { %v2580_v54 = vpop.permute.xlu1 %2579 }
0x139e   :  { %v2584_v55 = vmul.f32 %v2580_v54, %v2574_v53  ;;  %v6243_v54 = vld [vmem:[#allocation28] ss:$0 sm:$0xff] }
0x139f   :  { %v2578_v21 = vpop.permute.xlu0 %2577 }
0x13a0   :  { %v2588_v60 = vadd.f32 %v2586_v19, %v2584_v55  ;;  %v2583_v61 = vmul.f32 %v2578_v21, %v2573_v58 }
0x13a2   :  { %v2587_v63 = vadd.f32 %v2585_v23, %v2583_v61  ;;  %2593 = vrot.lane.b32.xlu1 %v2588_v60, %s5666_s20 }
0x13a4   :  { %2591 = vrot.lane.b32.xlu0 %v2587_v63, %s5666_s20 }
0x1414   :  { %v2594_v1 = vpop.permute.xlu1 %2593 }
0x1415   :  { %v2600_v2 = vsel %vm877_vm4, %v2594_v1, 0.0 }
0x1416   :  { %2601 = vadd.xlane.f32.xlu1 %v2600_v2  ;;  %v2592_v59 = vpop.permute.xlu0 %2591 }
0x1417   :  { %v2597_v57 = vsel %vm877_vm4, %v2592_v59, 0.0 }
0x1418   :  { %2598 = vadd.xlane.f32.xlu0 %v2597_v57 }
0x149f   :  { %v2602_v32 = vpop.xlane.xlu1 %2601 }
0x14a0   :  { %v2604_v62 = vmul.f32 0.03125, %v2602_v32 }
0x14a1   :  { %v2599_v0 = vpop.xlane.xlu0 %2598 }
0x14a2   :  { %v2606_v31 = vsub.f32 %v2588_v60, %v2604_v62  ;;  %v2603_v7 = vmul.f32 0.03125, %v2599_v0  ;;  %v4344_v60 = vld [vmem:[%s6487_s15] sm:$0xff]  }
0x14a3   :  { %v6248_v23 = vunpack.c.l.bf16 %v4344_v60  ;;  %v6252_v61 = vunpack.c.h.bf16 %v4344_v60 }
0x14a4   :  { %v2605_v8 = vsub.f32 %v2587_v63, %v2603_v7  ;;  %v2608_v20 = vmul.f32 %v2606_v31, %v2606_v31 }
0x14a6   :  { %2613 = vrot.lane.b32.xlu0 %v2608_v20, %s5666_s20  ;;  %v2607_v37 = vmul.f32 %v2605_v8, %v2605_v8 }
0x14a8   :  { %2611 = vrot.lane.b32.xlu1 %v2607_v37, %s5666_s20 }
0x1518   :  { %v2614_v5 = vpop.permute.xlu0 %2613 }
0x1519   :  { %v2620_v56 = vsel %vm877_vm4, %v2614_v5, 0.0 }
0x151a   :  { %v2612_v45 = vpop.permute.xlu1 %2611  ;;  %2621 = vadd.xlane.f32.xlu1 %v2620_v56 }
0x151b   :  { %v2617_v9 = vsel %vm877_vm4, %v2612_v45, 0.0 }
0x151c   :  { %2618 = vadd.xlane.f32.xlu0 %v2617_v9 }
0x152b   :  { %2646 = vrot.lane.b32.xlu1 %v4288_v33, %s5664_s28 }
0x1532   :  { %2636 = vrot.lane.b32.xlu0 %v4287_v10, %s5664_s28 }
0x15a3   :  { %v2622_v34 = vpop.xlane.xlu1 %2621 }
0x15a4   :  { %v2624_v24 = vmul.f32 0.03125, %v2622_v34 }
0x15a5   :  { %v2619_v25 = vpop.xlane.xlu0 %2618 }
0x15a6   :  { %v2626_v26 = vadd.f32 1e-05, %v2624_v24  ;;  %v2623_v27 = vmul.f32 0.03125, %v2619_v25 }
0x15a7   :  { %v2647_v3 = vpop.permute.xlu1 %2646 }
0x15a8   :  { %5045 = vrsqrt.f32 %v2626_v26  ;;  %v2625_v28 = vadd.f32 1e-05, %v2623_v27 }
0x15a9   :  { %v2637_v30 = vpop.permute.xlu0 %2636 }
0x15aa   :  { %5047 = vrsqrt.f32 %v2625_v28 }
0x15b5   :  { %v5046_v29 = vpop.eup %5045 }
0x15b6   :  { %v2630_v35 = vmul.f32 %v5046_v29, %v2606_v31 }
0x15b7   :  { %v5048_v36 = vpop.eup %5047 }
0x15b8   :  { %v2629_v14 = vmul.f32 %v5048_v36, %v2605_v8  ;;  %v2640_v6 = vmul.f32 %v2637_v30, %v2630_v35 }
0x15ba   :  { %v2639_v38 = vmul.f32 %v2637_v30, %v2629_v14  ;;  %v2650_v39 = vadd.f32 %v2647_v3, %v2640_v6 }
0x15bc   :  { %v2649_v16 = vadd.f32 %v2647_v3, %v2639_v38  ;;  %5049 = vtanh.f32 %v2650_v39 }
0x15be   :  { %5051 = vtanh.f32 %v2649_v16 }
0x15c9   :  { %v5050_v41 = vpop.eup %5049 }
0x15ca   :  { %2657 = vrot.lane.b32.xlu1 %v5050_v41, %s5666_s20 }
0x15cb   :  { %v5052_v42 = vpop.eup %5051 }
0x15cc   :  { %2655 = vrot.lane.b32.xlu0 %v5052_v42, %s5666_s20 }
0x163c   :  { %v2658_v44 = vpop.permute.xlu1 %2657 }
0x163d   :  { %4732 = vmatpush3.msra.mxu0 %v2658_v44 }
0x163e   :  { %4733 = vmatprep.subr.mxu0 %v5667_v18  ;;  %v2656_v15 = vpop.permute.xlu0 %2655 }
0x163f   :  { %4734 = vmatpush3.msra.mxu0 %v2656_v15  ;;  %4746 = vmatprep.mubr.msk.f32.mxu1 %vm877_vm4, %v2656_v15 }
0x1640   :  { %4736 = vmatmul.mubr.msk.f32.vlgmr.msra.gmra.mxu0 %vm580_vm1, %v6211_v46  ;;  %4747 = vmatmul.mubr.msk.f32.vlgmr.msra.gmra.mxu1 %vm877_vm4, %v2658_v44 }
0x1641   :  { %4749 = vmatprep.subr.mxu0 %v5667_v18  ;;  %4757 = vmatprep.mubr.msk.f32.mxu0 %vm5668_vm9, %v5667_v18 }
0x1642   :  { %4750 = vmatpush3.msra.mxu0 %v6189_v11  ;;  %4762 = vmatprep.mubr.msk.f32.mxu1 %vm2929_vm11, %v6248_v23 }
0x1643   :  { %4751 = vmatprep.subr.mxu0 %v5667_v18 }
0x1644   :  { %4752 = vmatpush3.msra.mxu0 %v6191_v13 }
0x1645   :  { %4753 = vmatprep.subr.mxu0 %v5667_v18 }
0x1646   :  { %4754 = vmatpush3.msra.mxu0 %v6196_v22 }
0x1647   :  { %4755 = vmatprep.subr.mxu0 %v5667_v18 }
0x1648   :  { %4756 = vmatpush3.msra.mxu0 %v6202_v40 }
0x1649   :  { %4765 = vmatprep.subr.mxu0 %v5667_v18 }
0x1700   :  { %v2730_v47 = vpop.f32.mrf.mxu0  ;;  %v6229_v48 = vpop.f32.mrf.mxu1 }
0x1701   :  { %5053 = vtanh.f32 %v2730_v47  ;;  %v2838_v52 = vmul.f32 %v6229_v48, %v4292_v51 }
0x1702   :  { %v4737_v49 = vpop.f32.mrf.mxu0  ;;  %v6231_v50 = vpop.f32.mrf.mxu1 }
0x1703   :  { %v2837_v12 = vmul.f32 %v4292_v51, %v6231_v50  ;;  %v2842_v4 = vsel %vm877_vm4, %v2838_v52, 0.0  ;;  %v6284_v51 = vld [vmem:[#allocation32 + $0x18] sm:$0xff]  ;;  %v6299_v52 = vld [vmem:[#allocation32] sm:$0xff] }
0x1705   :  { %v2839_v17 = vsel %vm877_vm4, %v2837_v12, 0.0  ;;  %v6289_v12 = vld [vmem:[#allocation32 + $0x10] sm:$0xff] }
0x1706   :  { %2840 = vadd.xlane.f32.xlu0 %v2839_v17  ;;  %v6295_v17 = vld [vmem:[#allocation32 + $0x8] sm:$0xff] }
0x170a   :  { %2843 = vadd.xlane.f32.xlu0 %v2842_v4  ;;  %v6308_v4 = vld [vmem:[#allocation31 + $0x18] sm:$0xff] }
0x170e   :  { %v6237_v53 = vpop.eup %5053 }
0x170f   :  { %4758 = vmatmul.mubr.msk.f32.vlgmr.msra.gmra.mxu0 %vm877_vm4, %v6237_v53 }
0x1710   :  { %4769 = vmatprep.mubr.msk.f32.mxu0 %vm5668_vm9, %v5667_v18 }
0x178f   :  { %v6260_v1 = vpop.xlane.xlu0 %2840 }
0x1793   :  { %v6262_v2 = vpop.xlane.xlu0 %2843 }
0x17cf   :  { %v2914_v19 = vpop.f32.mrf.mxu0 }
0x17d0   :  { %v2924_v55 = vmul.f32 %v6243_v54, %v2914_v19  ;;  %v6312_v19 = vld [vmem:[#allocation31 + $0x10] sm:$0xff] }
0x17d1   :  { %v4759_v58 = vpop.f32.mrf.mxu0 }
0x17d2   :  { %v2926_v21 = vsel %vm2925_vm10, %v2924_v55, 0.0  ;;  %v6314_v55 = vld [vmem:[#allocation31 + $0x8] sm:$0xff]  ;;  %v6318_v58 = vld [vmem:[#allocation31] sm:$0xff] }
0x17d3   :  { %2927 = vadd.xlane.f32.xlu1 %v2926_v21  ;;  %v6324_v21 = vld [vmem:[#allocation29] ss:$0 sm:$0xff] }
0x185c   :  { %v2928_v63 = vpop.xlane.xlu1 %2927 }
0x185d   :  { %4760 = vmatprep.subr.msk.mxu1 %vm2936_vm12, %v2928_v63 }
0x185e   :  { %4761 = vmatpush3.msk.msra.mxu1 %vm2936_vm12, %v2928_v63 }
0x185f   :  { %4763 = vmatmul.mubr.msk.f32.vlgmr.msra.gmra.mxu1 %vm2929_vm11, %v6252_v61 }
0x1860   :  { %4774 = vmatprep.mubr.msk.f32.mxu1 %vm2929_vm11, %v6248_v23 }
0x191f   :  { %v4764_v59 = vpop.f32.mrf.mxu1 }
0x1920   :  { %v3016_v57 = vadd.f32 %v4764_v59, %v6262_v2 }
0x1921   :  { %v3006_v32 = vpop.f32.mrf.mxu1 }
0x1922   :  { %vm3018_vm13 = vcmp.gt.f32.partialorder %v3016_v57, 0.0  ;;  %v3020_v62 = vmul.f32 0.01, %v3016_v57  ;;  %v3015_v0 = vadd.f32 %v3006_v32, %v6260_v1 }
0x1924   :  { %vm3017_vm14 = vcmp.gt.f32.partialorder %v3015_v0, 0.0  ;;  %v3019_v31 = vmul.f32 0.01, %v3015_v0  ;;  %v3022_v7 = vsel %vm3018_vm13, %v3016_v57, %v3020_v62  ;;  %v6327_v57 = vld [vmem:[#allocation35] ss:$0 sm:$0xff] }
0x1925   :  { %v3025_v37 = vsel %vm3023_vm15, %v3022_v7, -inf }
0x1926   :  { %v3021_v8 = vsel %vm3017_vm14, %v3015_v0, %v3019_v31 }
0x1927   :  { %v3024_v20 = vsel %vm3023_vm15, %v3021_v8, -inf }
0x1928   :  { %v3026_v5 = vmax.f32 %v3024_v20, %v3025_v37 }
0x192a   :  { %3027 = vmax.xlane.f32.xlu1 %v3026_v5 }
0x19b3   :  { %v3028_v56 = vpop.xlane.xlu1 %3027 }
0x19b4   :  { %v3029_v45 = vrot.slane %v3028_v56, 4 }
0x19b6   :  { %v3030_v9 = vmax.f32 %v3028_v56, %v3029_v45 }
0x19b8   :  { %v3031_v33 = vrot.slane %v3030_v9, 2 }
0x19ba   :  { %v3032_v10 = vmax.f32 %v3030_v9, %v3031_v33 }
0x19bc   :  { %v3033_v34 = vrot.slane %v3032_v10, 1 }
0x19be   :  { %v3034_v24 = vmax.f32 %v3032_v10, %v3033_v34 }
0x19c0   :  { %4882 = vpush %v3034_v24 }
0x19f1   :  { %s4883_s6 = spop %4882 }
0x19f2   :  { %v3036_v25 = vstv %s4883_s6 }
0x19f3   :  { %v3037_v26 = vsub.f32 %v3021_v8, %v3036_v25  ;;  %v3038_v27 = vsub.f32 %v3022_v7, %v3036_v25  ;;  %v6341_v7 = vld [vmem:[#allocation34] ss:$0 sm:$0xff] }
0x19f5   :  { %v3041_v28 = vmul.f32 1.442695, %v3038_v27  ;;  %v3039_v29 = vmul.f32 1.442695, %v3037_v26 }
0x19f7   :  { %5055 = vpow2.f32 %v3041_v28 }
0x19f8   :  { %5057 = vpow2.f32 %v3039_v29 }
0x1a04   :  { %v5056_v30 = vpop.eup %5055 }
0x1a05   :  { %4766 = vmatpush3.msra.mxu0 %v5056_v30  ;;  %v5058_v35 = vpop.eup %5057 }
0x1a06   :  { %4767 = vmatprep.subr.mxu0 %v5667_v18 }
0x1a07   :  { %4768 = vmatpush3.msra.mxu0 %v5058_v35 }
0x1a08   :  { %4770 = vmatmul.mubr.msk.f32.vlgmr.msra.gmra.mxu0 %vm580_vm1, %v6211_v46  ;;  %4777 = vmatprep.subr.mxu0 %v5667_v18 }
0x1a09   :  { %4781 = vmatprep.mubr.msk.f32.mxu0 %vm5668_vm9, %v5667_v18 }
0x1ac8   :  { %v3109_v36 = vpop.f32.mrf.mxu0 }
0x1ac9   :  { %4772 = vmatprep.subr.msk.mxu1 %vm2936_vm12, %v3109_v36 }
0x1aca   :  { %v4771_v3 = vpop.f32.mrf.mxu0  ;;  %4773 = vmatpush3.msk.msra.mxu1 %vm2936_vm12, %v3109_v36 }
0x1acb   :  { %4775 = vmatmul.mubr.msk.f32.vlgmr.msra.gmra.mxu1 %vm2929_vm11, %v6252_v61  ;;  %4784 = vmatprep.subr.mxu1 %v5667_v18 }
0x1acc   :  { %4792 = vmatprep.mubr.msk.f32.mxu1 %vm5668_vm9, %v5667_v18  ;;  %4785 = vmatpush3.msra.mxu1 %v6308_v4 }
0x1acd   :  { %4786 = vmatprep.subr.mxu1 %v5667_v18 }
0x1ace   :  { %4787 = vmatpush3.msra.mxu1 %v6312_v19 }
0x1acf   :  { %4788 = vmatprep.subr.mxu1 %v5667_v18 }
0x1ad0   :  { %4789 = vmatpush3.msra.mxu1 %v6314_v55 }
0x1ad1   :  { %4790 = vmatprep.subr.mxu1 %v5667_v18 }
0x1ad2   :  { %4791 = vmatpush3.msra.mxu1 %v6318_v58 }
0x1ad3   :  { %4806 = vmatprep.subr.mxu1 %v5667_v18 }
0x1b8b   :  { %v4776_v14 = vpop.f32.mrf.mxu1 }
0x1b8c   :  { %v3188_v6 = vadd.f32 1e-16, %v4776_v14 }
0x1b8d   :  { %v3182_v38 = vpop.f32.mrf.mxu1 }
0x1b8e   :  { %5059 = vrcp.f32 %v3188_v6  ;;  %v3183_v39 = vadd.f32 1e-16, %v3182_v38 }
0x1b90   :  { %5061 = vrcp.f32 %v3183_v39 }
0x1b9b   :  { %v5060_v16 = vpop.eup %5059 }
0x1b9c   :  { %v3194_v41 = vmul.f32 %v5060_v16, %v5056_v30 }
0x1b9d   :  { %v5062_v42 = vpop.eup %5061 }
0x1b9e   :  { %3202 = vperm.xlu0 %4959, %v3194_v41   ;;  %v3193_v43 = vmul.f32 %v5062_v42, %v5058_v35 }
0x1ba0   :  { %3197 = vperm.xlu1 %4960, %v3193_v43  }
0x1c19   :  { %v3203_v44 = vpop.permute.xlu0 %3202 }
0x1c1a   :  { %v3206_v15 = vmul.f32 %v6229_v48, %v3203_v44 }
0x1c1b   :  { %v3198_v47 = vpop.permute.xlu1 %3197 }
0x1c1c   :  { %v3205_v49 = vmul.f32 %v3198_v47, %v6231_v50  ;;  %4778 = vmatpush3.msra.mxu0 %v3206_v15 }
0x1c1d   :  { %4779 = vmatprep.subr.mxu0 %v5667_v18 }
0x1c1e   :  { %4780 = vmatpush3.msra.mxu0 %v3205_v49 }
0x1c1f   :  { %4782 = vmatmul.mubr.msk.f32.vlgmr.msra.gmra.mxu0 %vm580_vm1, %v6211_v46  ;;  %4795 = vmatprep.subr.mxu0 %v5667_v18 }
0x1c20   :  { %4796 = vmatpush3.msra.mxu0 %v6284_v51  ;;  %4803 = vmatprep.mubr.msk.f32.mxu0 %vm5668_vm9, %v5667_v18 }
0x1c21   :  { %4797 = vmatprep.subr.mxu0 %v5667_v18 }
0x1c22   :  { %4798 = vmatpush3.msra.mxu0 %v6289_v12 }
0x1c23   :  { %4799 = vmatprep.subr.mxu0 %v5667_v18 }
0x1c24   :  { %4800 = vmatpush3.msra.mxu0 %v6295_v17 }
0x1c25   :  { %4801 = vmatprep.subr.mxu0 %v5667_v18 }
0x1c26   :  { %4802 = vmatpush3.msra.mxu0 %v6299_v52 }
0x1c27   :  { %4804 = vmatmul.mubr.msk.f32.vlgmr.msra.gmra.mxu0 %vm877_vm4, %v6237_v53 }
0x1c28   :  { %4819 = vmatprep.mubr.msk.f32.mxu0 %vm2929_vm11, %v6248_v23 }
0x1cdf   :  { %v3279_v60 = vpop.f32.mrf.mxu0 }
0x1ce0   :  { %v3280_v63 = vadd.f32 %v6324_v21, %v3279_v60 }
0x1ce1   :  { %v4783_v59 = vpop.f32.mrf.mxu0 }
0x1ce2   :  { %5063 = vtanh.f32 %v3280_v63 }
0x1ce7   :  { %v3435_v32 = vpop.f32.mrf.mxu0 }
0x1ce8   :  { %v3436_v62 = vadd.f32 %v6327_v57, %v3435_v32 }
0x1ce9   :  { %v4805_v0 = vpop.f32.mrf.mxu0 }
0x1cea   :  { %3447 = vrot.lane.b32.xlu1 %v3436_v62, %s5665_s2 }
0x1cef   :  { %v5064_v31 = vpop.eup %5063 }
0x1cf0   :  { %4793 = vmatmul.mubr.msk.f32.vlgmr.msra.gmra.mxu1 %vm877_vm4, %v5064_v31 }
0x1cf1   :  { %4807 = vmatpush3.msra.mxu1 %v6189_v11  ;;  %4814 = vmatprep.mubr.msk.f32.mxu1 %vm5668_vm9, %v5667_v18 }
0x1cf2   :  { %4808 = vmatprep.subr.mxu1 %v5667_v18 }
0x1cf3   :  { %4809 = vmatpush3.msra.mxu1 %v6191_v13 }
0x1cf4   :  { %4810 = vmatprep.subr.mxu1 %v5667_v18 }
0x1cf5   :  { %4811 = vmatpush3.msra.mxu1 %v6196_v22 }
0x1cf6   :  { %4812 = vmatprep.subr.mxu1 %v5667_v18 }
0x1cf7   :  { %4813 = vmatpush3.msra.mxu1 %v6202_v40 }
0x1d5c   :  { %v3448_v9 = vpop.permute.xlu1 %3447 }
0x1db0   :  { %v3359_v8 = vpop.f32.mrf.mxu1 }
0x1db1   :  { %v3360_v11 = vadd.f32 %v6341_v7, %v3359_v8 }
0x1db2   :  { %v4794_v20 = vpop.f32.mrf.mxu1 }
0x1db3   :  { %v3439_v37 = vadd.f32 %v3436_v62, %v3360_v11 }
0x1db5   :  { %v4308_v5 = vmul.f32 -1.442695, %v3439_v37 }
0x1db7   :  { %5065 = vpow2.f32 %v4308_v5 }
0x1dc4   :  { %v5066_v56 = vpop.eup %5065 }
0x1dc5   :  { %v3443_v45 = vadd.f32 1.0, %v5066_v56 }
0x1dc7   :  { %5067 = vrcp.f32 %v3443_v45 }
0x1dd4   :  { %v5068_v13 = vpop.eup %5067 }
0x1dd5   :  { %v3450_v33 = vmul.f32 %v5068_v13, %v3448_v9  ;;  %v3457_v24 = vsub.f32 1.0, %v5068_v13 }
0x1dd7   :  { %3452 = vrot.lane.b32.xlu0 %v3450_v33, %s5665_s2 }
0x1ddb   :  { %3463 = vrot.lane.b32.xlu0 %v6237_v53, %s5664_s28 }
0x1e49   :  { %v3453_v22 = vpop.permute.xlu0 %3452 }
0x1e4a   :  { %v3455_v40 = vadd.f32 %v3453_v22, %v3360_v11 }
0x1e4c   :  { %5069 = vtanh.f32 %v3455_v40 }
0x1e4d   :  { %v3464_v34 = vpop.permute.xlu0 %3463 }
0x1e4e   :  { %v3466_v26 = vmul.f32 %v5068_v13, %v3464_v34 }
0x1e59   :  { %v5070_v10 = vpop.eup %5069 }
0x1e5a   :  { %3459 = vrot.lane.b32.xlu1 %v5070_v10, %s5666_s20 }
0x1ecc   :  { %v3460_v25 = vpop.permute.xlu1 %3459 }
0x1ecd   :  { %v3462_v27 = vmul.f32 %v3460_v25, %v3457_v24 }
0x1ecf   :  { %v3467_v28 = vadd.f32 %v3466_v26, %v3462_v27 }
0x1ed1   :  { %5071 = vtanh.f32 %v3467_v28 }
0x1ede   :  { %v6348_v29 = vpop.eup %5071 }
0x1edf   :  { %3470 = vrot.lane.b32.xlu1 %v6348_v29, %s5666_s20 }
0x1f51   :  { %v6352_v30 = vpop.permute.xlu1 %3470 }
0x1f52   :  { %4815 = vmatmul.mubr.msk.f32.vlgmr.msra.gmra.mxu1 %vm877_vm4, %v6352_v30 }
0x1f53   :  { %4831 = vmatprep.mubr.msk.f32.mxu1 %vm2929_vm11, %v6248_v23 }
0x2012   :  { %v3540_v53 = vpop.f32.mrf.mxu1 }
0x2013   :  { %v3544_v35 = vmul.f32 %v6243_v54, %v3540_v53 }
0x2014   :  { %v4816_v36 = vpop.f32.mrf.mxu1 }
0x2015   :  { %v3545_v3 = vsel %vm2925_vm10, %v3544_v35, 0.0  ;;  %v4061_v36 = vld [vmem:[%s5873_s13 + $0x18] sm:$0xff] }
0x2016   :  { %3546 = vadd.xlane.f32.xlu0 %v3545_v3  ;;  %v4060_v3 = vld [vmem:[%s5873_s13 + $0x10] sm:$0xff] }
0x209f   :  { %v3547_v14 = vpop.xlane.xlu0 %3546 }
0x20a0   :  { %4817 = vmatprep.subr.msk.mxu0 %vm2936_vm12, %v3547_v14 }
0x20a1   :  { %4818 = vmatpush3.msk.msra.mxu0 %vm2936_vm12, %v3547_v14  ;;  %v4059_v14 = vld [vmem:[%s5873_s13 + $0x8] sm:$0xff] }
0x20a2   :  { %4820 = vmatmul.mubr.msk.f32.vlgmr.msra.gmra.mxu0 %vm2929_vm11, %v6252_v61  ;;  %4822 = vmatprep.subr.mxu0 %v5667_v18 }
0x20a3   :  { %4826 = vmatprep.mubr.msk.f32.mxu0 %vm5668_vm9, %v5667_v18 }
0x2162   :  { %v4821_v23 = vpop.f32.mrf.mxu0 }
0x2163   :  { %v3627_v54 = vadd.f32 %v4821_v23, %v6262_v2  ;;  %v4058_v23 = vld [vmem:[%s5873_s13] sm:$0xff]  ;;  %s4152_s13 = sshll.u32 %s5669_s14, 4  ;;  %s4153_s13 = int_to_ptr.vmem [resolvable:$true] %s4152_s13 }
0x2164   :  { %v3617_v6 = vpop.f32.mrf.mxu0  ;;  %s5551_s5 = scalar_lea.vmem %s4153_s13, 32  ;;  %p5556_p4 = scmp.lt.s32.totalorder %s4153_s13, %s4153_s13 }
0x2165   :  { %vm3629_vm0 = vcmp.gt.f32.partialorder %v3627_v54, 0.0  ;;  %v3631_v38 = vmul.f32 0.01, %v3627_v54  ;;  %v3626_v39 = vadd.f32 %v3617_v6, %v6260_v1  ;;  %p5552_p3 = scmp.ne.s32.totalorder %s4153_s13, %s5551_s5  ;;  %p5557_p5 = scmp.lt.s32.totalorder %s5551_s5, %s5551_s5 }
0x2167   :  { %vm3628_vm2 = vcmp.gt.f32.partialorder %v3626_v39, 0.0  ;;  %v3630_v16 = vmul.f32 0.01, %v3626_v39  ;;  %v3633_v41 = vsel %vm3629_vm0, %v3627_v54, %v3631_v38  ;;  %p5558_p6 = por %p5557_p5, %p5556_p4 }
0x2168   :  { %v3635_v44 = vsel %vm3023_vm15, %v3633_v41, -inf }
0x2169   :  { %v3632_v42 = vsel %vm3628_vm2, %v3626_v39, %v3630_v16  ;;  %p5559_p7 = pnand %p5558_p6, %p5552_p3 }
0x216a   :  { %v3634_v43 = vsel %vm3023_vm15, %v3632_v42, -inf }
0x216b   :  { %v3636_v15 = vmax.f32 %v3634_v43, %v3635_v44  ;;  %v4321_v43 = vld [vmem:[#allocation37] ss:$0 sm:$0xff] }
0x216d   :  { %3637 = vmax.xlane.f32.xlu1 %v3636_v15 }
0x21f6   :  { %v3638_v47 = vpop.xlane.xlu1 %3637 }
0x21f7   :  { %v3639_v49 = vrot.slane %v3638_v47, 4 }
0x21f9   :  { %v3640_v60 = vmax.f32 %v3638_v47, %v3639_v49 }
0x21fb   :  { %v3641_v63 = vrot.slane %v3640_v60, 2 }
0x21fd   :  { %v3642_v2 = vmax.f32 %v3640_v60, %v3641_v63 }
0x21ff   :  { %v3643_v59 = vrot.slane %v3642_v2, 1 }
0x2201   :  { %v3644_v32 = vmax.f32 %v3642_v2, %v3643_v59 }
0x2203   :  { %4884 = vpush %v3644_v32 }
0x2234   :  { %s4885_s0 = spop %4884 }
0x2235   :  { %v3646_v1 = vstv %s4885_s0 }
0x2236   :  { %v3647_v62 = vsub.f32 %v3632_v42, %v3646_v1  ;;  %v3648_v0 = vsub.f32 %v3633_v41, %v3646_v1 }
0x2238   :  { %v3651_v31 = vmul.f32 1.442695, %v3648_v0  ;;  %v3649_v8 = vmul.f32 1.442695, %v3647_v62 }
0x223a   :  { %5073 = vpow2.f32 %v3651_v31 }
0x223b   :  { %5075 = vpow2.f32 %v3649_v8 }
0x2247   :  { %v5074_v11 = vpop.eup %5073 }
0x2248   :  { %4823 = vmatpush3.msra.mxu0 %v5074_v11  ;;  %v5076_v20 = vpop.eup %5075 }
0x2249   :  { %4824 = vmatprep.subr.mxu0 %v5667_v18 }
0x224a   :  { %4825 = vmatpush3.msra.mxu0 %v5076_v20 }
0x224b   :  { %4827 = vmatmul.mubr.msk.f32.vlgmr.msra.gmra.mxu0 %vm580_vm1, %v6211_v46  ;;  %4834 = vmatprep.subr.mxu0 %v5667_v18 }
0x224c   :  { %4838 = vmatprep.mubr.msk.f32.mxu0 %vm5668_vm9, %v5667_v18 }
0x230b   :  { %v3719_v37 = vpop.f32.mrf.mxu0 }
0x230c   :  { %4829 = vmatprep.subr.msk.mxu1 %vm2936_vm12, %v3719_v37 }
0x230d   :  { %v4828_v5 = vpop.f32.mrf.mxu0  ;;  %4830 = vmatpush3.msk.msra.mxu1 %vm2936_vm12, %v3719_v37 }
0x230e   :  { %4832 = vmatmul.mubr.msk.f32.vlgmr.msra.gmra.mxu1 %vm2929_vm11, %v6252_v61  ;;  %4841 = vmatprep.subr.mxu1 %v5667_v18 }
0x230f   :  { %4842 = vmatpush3.msra.mxu1 %v6308_v4  ;;  %4849 = vmatprep.mubr.msk.f32.mxu1 %vm5668_vm9, %v5667_v18 }
0x2310   :  { %4843 = vmatprep.subr.mxu1 %v5667_v18 }
0x2311   :  { %4844 = vmatpush3.msra.mxu1 %v6312_v19 }
0x2312   :  { %4845 = vmatprep.subr.mxu1 %v5667_v18 }
0x2313   :  { %4846 = vmatpush3.msra.mxu1 %v6314_v55 }
0x2314   :  { %4847 = vmatprep.subr.mxu1 %v5667_v18 }
0x2315   :  { %4848 = vmatpush3.msra.mxu1 %v6318_v58 }
0x2316   :  { %4863 = vmatprep.subr.mxu1 %v5667_v18 }
0x23ce   :  { %v4833_v61 = vpop.f32.mrf.mxu1 }
0x23cf   :  { %v3798_v56 = vadd.f32 1e-16, %v4833_v61 }
0x23d0   :  { %v3792_v4 = vpop.f32.mrf.mxu1 }
0x23d1   :  { %5077 = vrcp.f32 %v3798_v56  ;;  %v3793_v45 = vadd.f32 1e-16, %v3792_v4 }
0x23d3   :  { %5079 = vrcp.f32 %v3793_v45 }
0x23de   :  { %v5078_v13 = vpop.eup %5077 }
0x23df   :  { %v3804_v9 = vmul.f32 %v5078_v13, %v5074_v11 }
0x23e0   :  { %v5080_v33 = vpop.eup %5079 }
0x23e1   :  { %3812 = vperm.xlu0 %4959, %v3804_v9   ;;  %v3803_v19 = vmul.f32 %v5080_v33, %v5076_v20 }
0x23e3   :  { %3807 = vperm.xlu1 %4960, %v3803_v19  }
0x245c   :  { %v3813_v22 = vpop.permute.xlu0 %3812 }
0x245d   :  { %v3816_v55 = vmul.f32 %v6229_v48, %v3813_v22 }
0x245e   :  { %v3808_v40 = vpop.permute.xlu1 %3807 }
0x245f   :  { %v3815_v58 = vmul.f32 %v3808_v40, %v6231_v50  ;;  %4835 = vmatpush3.msra.mxu0 %v3816_v55 }
0x2460   :  { %4836 = vmatprep.subr.mxu0 %v5667_v18 }
0x2461   :  { %4837 = vmatpush3.msra.mxu0 %v3815_v58 }
0x2462   :  { %4839 = vmatmul.mubr.msk.f32.vlgmr.msra.gmra.mxu0 %vm580_vm1, %v6211_v46  ;;  %4852 = vmatprep.subr.mxu0 %v5667_v18  ;;  %vm4144_vm1 = vcmask 25600  }
0x2463   :  { %4853 = vmatpush3.msra.mxu0 %v6284_v51  ;;  %4860 = vmatprep.mubr.msk.f32.mxu0 %vm5668_vm9, %v5667_v18 }
0x2464   :  { %4854 = vmatprep.subr.mxu0 %v5667_v18 }
0x2465   :  { %4855 = vmatpush3.msra.mxu0 %v6289_v12 }
0x2466   :  { %4856 = vmatprep.subr.mxu0 %v5667_v18 }
0x2467   :  { %4857 = vmatpush3.msra.mxu0 %v6295_v17 }
0x2468   :  { %4858 = vmatprep.subr.mxu0 %v5667_v18 }
0x2469   :  { %4859 = vmatpush3.msra.mxu0 %v6299_v52 }
0x246a   :  { %4861 = vmatmul.mubr.msk.f32.vlgmr.msra.gmra.mxu0 %vm877_vm4, %v6352_v30 }
0x2522   :  { %v3883_v46 = vpop.f32.mrf.mxu0 }
0x2523   :  { %v3884_v48 = vadd.f32 %v6324_v21, %v3883_v46 }
0x2524   :  { %v4840_v50 = vpop.f32.mrf.mxu0 }
0x2525   :  { %5081 = vtanh.f32 %v3884_v48 }
0x252a   :  { %v4027_v51 = vpop.f32.mrf.mxu0 }
0x252b   :  { %v4028_v10 = vadd.f32 %v6327_v57, %v4027_v51 }
0x252c   :  { %v4862_v12 = vpop.f32.mrf.mxu0 }
0x252d   :  { %4039 = vrot.lane.b32.xlu0 %v4028_v10, %s5665_s2 }
0x2532   :  { %v5082_v34 = vpop.eup %5081 }
0x2533   :  { %4850 = vmatmul.mubr.msk.f32.vlgmr.msra.gmra.mxu1 %vm877_vm4, %v5082_v34 }
0x2534   :  { %4871 = vmatprep.mubr.msk.f32.mxu1 %vm5668_vm9, %v5667_v18  ;;  %4864 = vmatpush3.msra.mxu1 %v4061_v36 }
0x2535   :  { %4865 = vmatprep.subr.mxu1 %v5667_v18 }
0x2536   :  { %4866 = vmatpush3.msra.mxu1 %v4060_v3 }
0x2537   :  { %4867 = vmatprep.subr.mxu1 %v5667_v18 }
0x2538   :  { %4868 = vmatpush3.msra.mxu1 %v4059_v14 }
0x2539   :  { %4869 = vmatprep.subr.mxu1 %v5667_v18 }
0x253a   :  { %4870 = vmatpush3.msra.mxu1 %v4058_v23 }
0x259f   :  { %v4040_v28 = vpop.permute.xlu0 %4039 }
0x25f3   :  { %v3957_v17 = vpop.f32.mrf.mxu1 }
0x25f4   :  { %v3958_v52 = vadd.f32 %v6341_v7, %v3957_v17 }
0x25f5   :  { %v4851_v24 = vpop.f32.mrf.mxu1 }
0x25f6   :  { %v4031_v21 = vadd.f32 %v4028_v10, %v3958_v52 }
0x25f8   :  { %v4320_v25 = vmul.f32 -1.442695, %v4031_v21 }
0x25fa   :  { %5083 = vpow2.f32 %v4320_v25 }
0x2607   :  { %v5084_v26 = vpop.eup %5083 }
0x2608   :  { %v4035_v57 = vadd.f32 1.0, %v5084_v26 }
0x260a   :  { %5085 = vrcp.f32 %v4035_v57 }
0x2617   :  { %v5086_v27 = vpop.eup %5085 }
0x2618   :  { %v4042_v30 = vmul.f32 %v5086_v27, %v4040_v28  ;;  %v4049_v54 = vsub.f32 1.0, %v5086_v27  ;;  %v4055_v38 = vmul.f32 %v5086_v27, %v6348_v29 }
0x261a   :  { %4044 = vrot.lane.b32.xlu1 %v4042_v30, %s5665_s2 }
0x268c   :  { %v4045_v53 = vpop.permute.xlu1 %4044 }
0x268d   :  { %v4047_v35 = vadd.f32 %v4045_v53, %v3958_v52 }
0x268f   :  { %5087 = vtanh.f32 %v4047_v35 }
0x269c   :  { %v5088_v7 = vpop.eup %5087 }
0x269d   :  { %4051 = vrot.lane.b32.xlu0 %v5088_v7, %s5666_s20 }
0x270f   :  { %v4052_v6 = vpop.permute.xlu0 %4051 }
0x2710   :  { %v4054_v39 = vmul.f32 %v4052_v6, %v4049_v54 }
0x2712   :  { %v4056_v16 = vadd.f32 %v4055_v38, %v4054_v39 }
0x2714   :  { %5089 = vtanh.f32 %v4056_v16 }
0x2721   :  { %v5090_v41 = vpop.eup %5089 }
0x2722   :  { %4070 = vrot.lane.b32.xlu1 %v5090_v41, %s5666_s20 }
0x2794   :  { %v4071_v42 = vpop.permute.xlu1 %4070 }
0x2795   :  { %4872 = vmatmul.mubr.msk.f32.vlgmr.msra.gmra.mxu1 %vm877_vm4, %v4071_v42 }
0x2855   :  { %v4140_v44 = vpop.f32.mrf.mxu1 }
0x2856   :  { %v4141_v18 = vadd.f32 %v4321_v43, %v4140_v44 }
0x2857   :  { %v4873_v15 = vpop.f32.mrf.mxu1 }
0x2858   :  { %4145 = vst.msk [vmem:[#allocation38] sm:$0x3] %vm4144_vm1, %v4141_v18 }
0x2859   :  { %5562 = shalt.err (!%p5559_p7)
}
0x285a   :  { %4155 = dma.vmem_to_hbm [thread:$0]  %s4153_s13, 32, %s5883_s27, [#allocation4]  }
0x285b   :  { %5595 = dma.done.wait [#allocation4], 32  }
0x285c   :  { %5596 = vsyncadd [#allocation4], 4294967264 }
0x285d   :  { %4159 = vsyncpa [#allocation3], 1 }
0x285e   :  { %4160 = vsyncpa [#allocation6], 1 }
0x285f   :  { %4161 = vsyncpa [#allocation9], 1 }
0x2860   :  { %4162 = vsyncpa [#allocation12], 1 }
0x2861   :  { %4163 = vsyncpa [#allocation15], 1 }
0x2862   :  { %4164 = vsyncpa [#allocation18], 1 }
0x2863   :  { %4165 = vsyncpa [#allocation21], 1 }
0x2864   :  { %4166 = vsyncpa [#allocation24], 1 }
0x2865   :  { %4167 = vsyncpa [#allocation27], 1 }
0x2866   :  { %4168 = vsyncpa [#allocation30], 1 }
0x2867   :  { %4169 = vsyncpa [#allocation33], 1 }
0x2868   :  { %4170 = vsyncpa [#allocation36], 1 }
0x2869   :  { %4171 = vsyncpa [#allocation4], 1 }

</bundles_post_ra>
